<compile_context>
chip_gen: v7x
topology: tpu7x:2x2x1
jax: 0.10.0
libtpu: 0.0.40
codegen_flags: <defaults>
</compile_context>

<pallas_src>
import functools

import numpy as np

import jax
import jax.numpy as jnp
from jax.experimental import pallas as pl
from jax.experimental.pallas import tpu as pltpu


IMG_C = 3                       # image channels
FLOW_C = 2                      # flow channels
HID_C = 8                       # hidden channels of each conv block
M1_IN = 2 * IMG_C + FLOW_C      # 8  = model1 input channels
M2_IN = 4 * IMG_C               # 12 = model2 input channels
N_GROUPS = 5                    # frame groups 1, 3, 4, 5, 7


# ----------------------------------------------------------------------------
# In-kernel im2col: 3x3 "same" conv as one patch block + one MXU matmul.
# a: (C, L) activations (L = k*HW images concatenated on the lane axis)
# masks: (9, L) per-tap validity masks (zero padding + image-boundary guard)
# Returns (9*C + 1, L): 9 rolled/masked taps stacked on sublanes plus a ones
# row so the bias can live as the last column of the weight matrix.
# ----------------------------------------------------------------------------
def _im2col_bias(a, masks, W, out_dtype=jnp.bfloat16):
    L = a.shape[1]
    taps = []
    t = 0
    for dh in (-1, 0, 1):
        for dw in (-1, 0, 1):
            shift = dh * W + dw
            if shift == 0:
                shifted = a
            else:
                shifted = pltpu.roll(a, (-shift) % L, axis=1)
            if dh == 0 and dw == 0:
                taps.append(shifted)                    # center tap: all valid
            else:
                taps.append(shifted * masks[t:t + 1, :])
            t += 1
    taps.append(jnp.ones((1, L), a.dtype))              # bias row
    return jnp.concatenate(taps, axis=0).astype(out_dtype)


# ----------------------------------------------------------------------------
# Fully fused forward kernel: one grid step = one batch image.
#   5x model1 (conv3x3+ReLU -> conv3x3), lane-batched across the 5 groups,
#   then model2 (conv3x3+ReLU -> conv3x3) on frames 1,3,5,7 -- all in VMEM.
# ----------------------------------------------------------------------------
def _net_kernel(H, W, mask_ref,
                i1_ref, n1_ref, fl1_ref, i3_ref, n3_ref, fl3_ref,
                i4_ref, n4_ref, fl4_ref, i5_ref, n5_ref, fl5_ref,
                i7_ref, n7_ref, fl7_ref,
                m1w1_ref, m1w2_ref, m2w1_ref, m2w2_ref,
                x_ref, fr1_ref, fr3_ref, fr4_ref, fr5_ref, fr7_ref):
    HW = H * W
    masks5 = mask_ref[...]                               # (9, 5*HW) f32
    masks1 = masks5[:, :HW]                              # (9, HW): one image tile

    def pack(i_ref, n_ref, f_ref):
        # channel concat [image(3), neighbor(3), flow(2)] -> (8, HW), f32
        return jnp.concatenate([i_ref[0], n_ref[0], f_ref[0]], axis=0)

    # ---- model1: all 5 frame groups batched along the lane axis ----------
    X = jnp.concatenate([pack(i1_ref, n1_ref, fl1_ref),
                         pack(i3_ref, n3_ref, fl3_ref),
                         pack(i4_ref, n4_ref, fl4_ref),
                         pack(i5_ref, n5_ref, fl5_ref),
                         pack(i7_ref, n7_ref, fl7_ref)], axis=1)  # (8, 5*HW)

    p1 = _im2col_bias(X, masks5, W)                      # (73, 5*HW) bf16
    h = jnp.dot(m1w1_ref[...], p1,
                preferred_element_type=jnp.float32)      # (8, 5*HW) f32
    h = jnp.maximum(h, 0.0)

    p2 = _im2col_bias(h, masks5, W)                      # (73, 5*HW) bf16
    frames = jnp.dot(m1w2_ref[...], p2,
                     preferred_element_type=jnp.float32)  # (3, 5*HW) f32

    frame_refs = (fr1_ref, fr3_ref, fr4_ref, fr5_ref, fr7_ref)
    for g in range(N_GROUPS):
        frame_refs[g][0] = frames[:, g * HW:(g + 1) * HW].astype(
            frame_refs[g].dtype)                          # lane-dense stores

    # ---- model2 on frames 1, 3, 5, 7 (never leaves VMEM) -----------------
    f12 = jnp.concatenate([frames[:, 0 * HW:1 * HW],
                           frames[:, 1 * HW:2 * HW],
                           frames[:, 3 * HW:4 * HW],
                           frames[:, 4 * HW:5 * HW]], axis=0)   # (12, HW)

    q1 = _im2col_bias(f12, masks1, W)                    # (109, HW) bf16
    h2 = jnp.dot(m2w1_ref[...], q1,
                 preferred_element_type=jnp.float32)     # (8, HW) f32
    h2 = jnp.maximum(h2, 0.0)

    q2 = _im2col_bias(h2, masks1, W)                     # (73, HW) bf16
    x = jnp.dot(m2w2_ref[...], q2,
                preferred_element_type=jnp.float32)      # (3, HW) f32
    x_ref[0] = x.astype(x_ref.dtype)


def _net_pallas(masks5, imgs, weights, N, H, W):
    HW = H * W
    L5 = N_GROUPS * HW

    img_specs = [pl.BlockSpec((1, a.shape[1], HW), lambda n: (n, 0, 0))
                 for a in imgs]
    w_specs = [pl.BlockSpec(w.shape, lambda n: (0, 0)) for w in weights]

    out_shape = tuple(jax.ShapeDtypeStruct((N, IMG_C, HW), jnp.float32)
                      for _ in range(6))
    out_specs = tuple(pl.BlockSpec((1, IMG_C, HW), lambda n: (n, 0, 0))
                      for _ in range(6))

    flops = N * (2 * L5 * (HID_C * 73 + IMG_C * 73)
                 + 2 * HW * (HID_C * 109 + IMG_C * 73))
    bytes_accessed = (4 * (masks5.size + sum(a.size for a in imgs)
                           + 6 * N * IMG_C * HW)
                      + 2 * sum(w.size for w in weights))

    return pl.pallas_call(
        functools.partial(_net_kernel, H, W),
        out_shape=out_shape,
        grid=(N,),
        in_specs=[pl.BlockSpec((9, L5), lambda n: (0, 0))] + img_specs + w_specs,
        out_specs=out_specs,
        compiler_params=pltpu.CompilerParams(
            dimension_semantics=("parallel",)),
        cost_estimate=pl.CostEstimate(flops=int(flops), transcendentals=0,
                                      bytes_accessed=int(bytes_accessed)),
    )(masks5, *imgs, *weights)


# ----------------------------------------------------------------------------
# Host-side constant / parameter preparation (once, at trace time).
# ----------------------------------------------------------------------------
def _tap_masks_tiled(H, W, reps):
    """(9, reps*H*W) f32 validity masks, one image tile repeated along lanes."""
    r = np.arange(H)[:, None]
    c = np.arange(W)[None, :]
    masks = []
    for dh in (-1, 0, 1):
        for dw in (-1, 0, 1):
            m = ((r + dh >= 0) & (r + dh < H) & (c + dw >= 0) & (c + dw < W))
            masks.append(m.reshape(-1))
    m = np.stack(masks, axis=0).astype(np.float32)        # (9, HW)
    return jnp.asarray(np.tile(m, (1, reps)))              # (9, reps*HW)


def _w_mat(w_oihw):
    """OIHW -> (O, 9*C), tap-major / channel-minor (matches _im2col_bias)."""
    O, C, KH, KW = w_oihw.shape
    return jnp.transpose(w_oihw, (0, 2, 3, 1)).reshape(O, KH * KW * C)


def _aug(w_oihw, b):
    """Weight matrix with the bias folded in as the last column, cast to bf16."""
    wm = _w_mat(w_oihw)
    return jnp.concatenate([wm, b[:, None]], axis=1).astype(jnp.bfloat16)


def _init_raw_params():
    key = jax.random.PRNGKey(42)
    ks = jax.random.split(key, 4)

    def conv_init(k, cout, cin):
        kw_, kb_ = jax.random.split(k)
        w = jax.random.normal(kw_, (cout, cin, 3, 3), jnp.float32) * 0.05
        b = jax.random.normal(kb_, (cout,), jnp.float32) * 0.01
        return w, b

    raw = {}
    raw["m1_w1"], raw["m1_b1"] = conv_init(ks[0], HID_C, M1_IN)
    raw["m1_w2"], raw["m1_b2"] = conv_init(ks[1], IMG_C, HID_C)
    raw["m2_w1"], raw["m2_b1"] = conv_init(ks[2], HID_C, M2_IN)
    raw["m2_w2"], raw["m2_b2"] = conv_init(ks[3], IMG_C, HID_C)
    return raw


def _prep_params(raw):
    return {
        "m1_w1a": _aug(raw["m1_w1"], raw["m1_b1"]),   # (8, 73)  bf16
        "m1_w2a": _aug(raw["m1_w2"], raw["m1_b2"]),   # (3, 73)  bf16
        "m2_w1a": _aug(raw["m2_w1"], raw["m2_b1"]),   # (8, 109) bf16
        "m2_w2a": _aug(raw["m2_w2"], raw["m2_b2"]),   # (3, 73)  bf16
    }


# ----------------------------------------------------------------------------
# Net forward: matches the PyTorch wrapper semantics.
# ----------------------------------------------------------------------------
def net_forward(params,
                input1, neigbor1, flow1,
                input3, neigbor3, flow3,
                input4, neigbor4, flow4,
                input5, neigbor5, flow5,
                input7, neigbor7, flow7):
    N, _, H, W = input1.shape
    HW = H * W
    masks5 = _tap_masks_tiled(H, W, N_GROUPS)            # trace-time constant

    def flat(a):                                         # free reshape (NCHW contiguous)
        return a.reshape(a.shape[0], a.shape[1], HW)

    imgs = [flat(a) for a in (input1, neigbor1, flow1,
                              input3, neigbor3, flow3,
                              input4, neigbor4, flow4,
                              input5, neigbor5, flow5,
                              input7, neigbor7, flow7)]
    weights = (params["m1_w1a"], params["m1_w2a"],
               params["m2_w1a"], params["m2_w2a"])

    x, fr1, fr3, fr4, fr5, fr7 = _net_pallas(masks5, imgs, weights, N, H, W)

    def unflat(a):
        return a.reshape(N, IMG_C, H, W)

    return (unflat(x), unflat(fr1), unflat(fr3),
            unflat(fr4), unflat(fr5), unflat(fr7))


# ----------------------------------------------------------------------------
# Pure-JAX reference (lax.conv) of the same synthetic model1/model2 blocks,
# used only for the in-script correctness check.
# ----------------------------------------------------------------------------
def _conv_ref(x, w, b, relu):
    y = jax.lax.conv_general_dilated(
        x, w, window_strides=(1, 1), padding=((1, 1), (1, 1)),
        dimension_numbers=("NCHW", "OIHW", "NCHW"),
        precision=jax.lax.Precision.HIGHEST)
    y = y + b[None, :, None, None]
    return jnp.maximum(y, 0.0) if relu else y


def _net_forward_ref(raw, i1, n1, fl1, i3, n3, fl3, i4, n4, fl4,
                     i5, n5, fl5, i7, n7, fl7):
    def m1(i, n, f):
        x = jnp.concatenate([i, n, f], axis=1)
        h = _conv_ref(x, raw["m1_w1"], raw["m1_b1"], True)
        return _conv_ref(h, raw["m1_w2"], raw["m1_b2"], False)

    fr1 = m1(i1, n1, fl1)
    fr3 = m1(i3, n3, fl3)
    fr4 = m1(i4, n4, fl4)
    fr5 = m1(i5, n5, fl5)
    fr7 = m1(i7, n7, fl7)
    x = jnp.concatenate([fr1, fr3, fr5, fr7], axis=1)
    h = _conv_ref(x, raw["m2_w1"], raw["m2_b1"], True)
    out = _conv_ref(h, raw["m2_w2"], raw["m2_b2"], False)
    return (out, fr1, fr3, fr4, fr5, fr7)


if __name__ == "__main__":
    N, H, W = 2, 16, 16

    raw = _init_raw_params()
    params = _prep_params(raw)

    key = jax.random.PRNGKey(0)
    keys = jax.random.split(key, 5)

    def triple(k3):
        ki, kn, kf = jax.random.split(k3, 3)
        return (jax.random.normal(ki, (N, IMG_C, H, W), jnp.float32),
                jax.random.normal(kn, (N, IMG_C, H, W), jnp.float32),
                jax.random.normal(kf, (N, FLOW_C, H, W), jnp.float32))

    args = []
    for i in range(5):
        args.extend(triple(keys[i]))

    fwd = jax.jit(functools.partial(net_forward, params))
    outs = jax.block_until_ready(fwd(*args))

    x, f1, f3, f4, f5, f7 = outs
    assert x.shape == (N, IMG_C, H, W)
    for f in (f1, f3, f4, f5, f7):
        assert f.shape == (N, IMG_C, H, W)
    assert all(bool(jnp.all(jnp.isfinite(o))) for o in outs)

    # Correctness: compare every output against the pure-JAX conv reference.
    refs = jax.block_until_ready(
        jax.jit(functools.partial(_net_forward_ref, raw))(*args))
    for got, want in zip(outs, refs):
        assert got.shape == want.shape
        err = float(jnp.max(jnp.abs(got - want)))
        assert err < 5e-2, f"max abs error vs reference: {err}"

    print("KERNEL_OK")
</pallas_src>

<mosaic_0001>
module attributes {stable_mosaic.version = 11 : i64} {
  func.func @_net_kernel(%arg0: i32, %arg1: memref<9x1280xf32, #tpu.memory_space<vmem>>, %arg2: memref<1x3x256xf32, #tpu.memory_space<vmem>>, %arg3: memref<1x3x256xf32, #tpu.memory_space<vmem>>, %arg4: memref<1x2x256xf32, #tpu.memory_space<vmem>>, %arg5: memref<1x3x256xf32, #tpu.memory_space<vmem>>, %arg6: memref<1x3x256xf32, #tpu.memory_space<vmem>>, %arg7: memref<1x2x256xf32, #tpu.memory_space<vmem>>, %arg8: memref<1x3x256xf32, #tpu.memory_space<vmem>>, %arg9: memref<1x3x256xf32, #tpu.memory_space<vmem>>, %arg10: memref<1x2x256xf32, #tpu.memory_space<vmem>>, %arg11: memref<1x3x256xf32, #tpu.memory_space<vmem>>, %arg12: memref<1x3x256xf32, #tpu.memory_space<vmem>>, %arg13: memref<1x2x256xf32, #tpu.memory_space<vmem>>, %arg14: memref<1x3x256xf32, #tpu.memory_space<vmem>>, %arg15: memref<1x3x256xf32, #tpu.memory_space<vmem>>, %arg16: memref<1x2x256xf32, #tpu.memory_space<vmem>>, %arg17: memref<8x73xbf16, #tpu.memory_space<vmem>>, %arg18: memref<3x73xbf16, #tpu.memory_space<vmem>>, %arg19: memref<8x109xbf16, #tpu.memory_space<vmem>>, %arg20: memref<3x73xbf16, #tpu.memory_space<vmem>>, %arg21: memref<1x3x256xf32, #tpu.memory_space<vmem>>, %arg22: memref<1x3x256xf32, #tpu.memory_space<vmem>>, %arg23: memref<1x3x256xf32, #tpu.memory_space<vmem>>, %arg24: memref<1x3x256xf32, #tpu.memory_space<vmem>>, %arg25: memref<1x3x256xf32, #tpu.memory_space<vmem>>, %arg26: memref<1x3x256xf32, #tpu.memory_space<vmem>>) attributes {dimension_semantics = [#tpu.dimension_semantics<parallel>], iteration_bounds = array<i64: 2>, scalar_prefetch = 0 : i64, scratch_operands = 0 : i64, tpu.core_type = #tpu.core_type<tc>, window_params = [{pipeline_mode = #tpu.pipeline_mode<synchronous>, transform_indices = @transform_0, window_bounds = array<i64: 9, 1280>}, {transform_indices = @transform_1, window_bounds = array<i64: 1, 3, 256>}, {transform_indices = @transform_2, window_bounds = array<i64: 1, 3, 256>}, {transform_indices = @transform_3, window_bounds = array<i64: 1, 2, 256>}, {transform_indices = @transform_4, window_bounds = array<i64: 1, 3, 256>}, {transform_indices = @transform_5, window_bounds = array<i64: 1, 3, 256>}, {transform_indices = @transform_6, window_bounds = array<i64: 1, 2, 256>}, {transform_indices = @transform_7, window_bounds = array<i64: 1, 3, 256>}, {transform_indices = @transform_8, window_bounds = array<i64: 1, 3, 256>}, {transform_indices = @transform_9, window_bounds = array<i64: 1, 2, 256>}, {transform_indices = @transform_10, window_bounds = array<i64: 1, 3, 256>}, {transform_indices = @transform_11, window_bounds = array<i64: 1, 3, 256>}, {transform_indices = @transform_12, window_bounds = array<i64: 1, 2, 256>}, {transform_indices = @transform_13, window_bounds = array<i64: 1, 3, 256>}, {transform_indices = @transform_14, window_bounds = array<i64: 1, 3, 256>}, {transform_indices = @transform_15, window_bounds = array<i64: 1, 2, 256>}, {pipeline_mode = #tpu.pipeline_mode<synchronous>, transform_indices = @transform_16, window_bounds = array<i64: 8, 73>}, {pipeline_mode = #tpu.pipeline_mode<synchronous>, transform_indices = @transform_17, window_bounds = array<i64: 3, 73>}, {pipeline_mode = #tpu.pipeline_mode<synchronous>, transform_indices = @transform_18, window_bounds = array<i64: 8, 109>}, {pipeline_mode = #tpu.pipeline_mode<synchronous>, transform_indices = @transform_19, window_bounds = array<i64: 3, 73>}, {transform_indices = @transform_20, window_bounds = array<i64: 1, 3, 256>}, {transform_indices = @transform_21, window_bounds = array<i64: 1, 3, 256>}, {transform_indices = @transform_22, window_bounds = array<i64: 1, 3, 256>}, {transform_indices = @transform_23, window_bounds = array<i64: 1, 3, 256>}, {transform_indices = @transform_24, window_bounds = array<i64: 1, 3, 256>}, {transform_indices = @transform_25, window_bounds = array<i64: 1, 3, 256>}]} {
    %c0 = arith.constant 0 : index
    %c0_0 = arith.constant 0 : index
    %0 = vector.load %arg1[%c0, %c0_0] : memref<9x1280xf32, #tpu.memory_space<vmem>>, vector<9x1280xf32>
    %1 = vector.extract_strided_slice %0 {offsets = [0, 0], sizes = [9, 256], strides = [1, 1]} : vector<9x1280xf32> to vector<9x256xf32>
    %c0_1 = arith.constant 0 : index
    %c0_2 = arith.constant 0 : index
    %c0_3 = arith.constant 0 : index
    %2 = vector.load %arg2[%c0_1, %c0_2, %c0_3] : memref<1x3x256xf32, #tpu.memory_space<vmem>>, vector<1x3x256xf32>
    %3 = vector.shape_cast %2 : vector<1x3x256xf32> to vector<3x256xf32>
    %c0_4 = arith.constant 0 : index
    %c0_5 = arith.constant 0 : index
    %c0_6 = arith.constant 0 : index
    %4 = vector.load %arg3[%c0_4, %c0_5, %c0_6] : memref<1x3x256xf32, #tpu.memory_space<vmem>>, vector<1x3x256xf32>
    %5 = vector.shape_cast %4 : vector<1x3x256xf32> to vector<3x256xf32>
    %c0_7 = arith.constant 0 : index
    %c0_8 = arith.constant 0 : index
    %c0_9 = arith.constant 0 : index
    %6 = vector.load %arg4[%c0_7, %c0_8, %c0_9] : memref<1x2x256xf32, #tpu.memory_space<vmem>>, vector<1x2x256xf32>
    %7 = vector.shape_cast %6 : vector<1x2x256xf32> to vector<2x256xf32>
    %8 = tpu.concatenate %3, %5, %7 in 0 : vector<3x256xf32>, vector<3x256xf32>, vector<2x256xf32> -> vector<8x256xf32>
    %c0_10 = arith.constant 0 : index
    %c0_11 = arith.constant 0 : index
    %c0_12 = arith.constant 0 : index
    %9 = vector.load %arg5[%c0_10, %c0_11, %c0_12] : memref<1x3x256xf32, #tpu.memory_space<vmem>>, vector<1x3x256xf32>
    %10 = vector.shape_cast %9 : vector<1x3x256xf32> to vector<3x256xf32>
    %c0_13 = arith.constant 0 : index
    %c0_14 = arith.constant 0 : index
    %c0_15 = arith.constant 0 : index
    %11 = vector.load %arg6[%c0_13, %c0_14, %c0_15] : memref<1x3x256xf32, #tpu.memory_space<vmem>>, vector<1x3x256xf32>
    %12 = vector.shape_cast %11 : vector<1x3x256xf32> to vector<3x256xf32>
    %c0_16 = arith.constant 0 : index
    %c0_17 = arith.constant 0 : index
    %c0_18 = arith.constant 0 : index
    %13 = vector.load %arg7[%c0_16, %c0_17, %c0_18] : memref<1x2x256xf32, #tpu.memory_space<vmem>>, vector<1x2x256xf32>
    %14 = vector.shape_cast %13 : vector<1x2x256xf32> to vector<2x256xf32>
    %15 = tpu.concatenate %10, %12, %14 in 0 : vector<3x256xf32>, vector<3x256xf32>, vector<2x256xf32> -> vector<8x256xf32>
    %c0_19 = arith.constant 0 : index
    %c0_20 = arith.constant 0 : index
    %c0_21 = arith.constant 0 : index
    %16 = vector.load %arg8[%c0_19, %c0_20, %c0_21] : memref<1x3x256xf32, #tpu.memory_space<vmem>>, vector<1x3x256xf32>
    %17 = vector.shape_cast %16 : vector<1x3x256xf32> to vector<3x256xf32>
    %c0_22 = arith.constant 0 : index
    %c0_23 = arith.constant 0 : index
    %c0_24 = arith.constant 0 : index
    %18 = vector.load %arg9[%c0_22, %c0_23, %c0_24] : memref<1x3x256xf32, #tpu.memory_space<vmem>>, vector<1x3x256xf32>
    %19 = vector.shape_cast %18 : vector<1x3x256xf32> to vector<3x256xf32>
    %c0_25 = arith.constant 0 : index
    %c0_26 = arith.constant 0 : index
    %c0_27 = arith.constant 0 : index
    %20 = vector.load %arg10[%c0_25, %c0_26, %c0_27] : memref<1x2x256xf32, #tpu.memory_space<vmem>>, vector<1x2x256xf32>
    %21 = vector.shape_cast %20 : vector<1x2x256xf32> to vector<2x256xf32>
    %22 = tpu.concatenate %17, %19, %21 in 0 : vector<3x256xf32>, vector<3x256xf32>, vector<2x256xf32> -> vector<8x256xf32>
    %c0_28 = arith.constant 0 : index
    %c0_29 = arith.constant 0 : index
    %c0_30 = arith.constant 0 : index
    %23 = vector.load %arg11[%c0_28, %c0_29, %c0_30] : memref<1x3x256xf32, #tpu.memory_space<vmem>>, vector<1x3x256xf32>
    %24 = vector.shape_cast %23 : vector<1x3x256xf32> to vector<3x256xf32>
    %c0_31 = arith.constant 0 : index
    %c0_32 = arith.constant 0 : index
    %c0_33 = arith.constant 0 : index
    %25 = vector.load %arg12[%c0_31, %c0_32, %c0_33] : memref<1x3x256xf32, #tpu.memory_space<vmem>>, vector<1x3x256xf32>
    %26 = vector.shape_cast %25 : vector<1x3x256xf32> to vector<3x256xf32>
    %c0_34 = arith.constant 0 : index
    %c0_35 = arith.constant 0 : index
    %c0_36 = arith.constant 0 : index
    %27 = vector.load %arg13[%c0_34, %c0_35, %c0_36] : memref<1x2x256xf32, #tpu.memory_space<vmem>>, vector<1x2x256xf32>
    %28 = vector.shape_cast %27 : vector<1x2x256xf32> to vector<2x256xf32>
    %29 = tpu.concatenate %24, %26, %28 in 0 : vector<3x256xf32>, vector<3x256xf32>, vector<2x256xf32> -> vector<8x256xf32>
    %c0_37 = arith.constant 0 : index
    %c0_38 = arith.constant 0 : index
    %c0_39 = arith.constant 0 : index
    %30 = vector.load %arg14[%c0_37, %c0_38, %c0_39] : memref<1x3x256xf32, #tpu.memory_space<vmem>>, vector<1x3x256xf32>
    %31 = vector.shape_cast %30 : vector<1x3x256xf32> to vector<3x256xf32>
    %c0_40 = arith.constant 0 : index
    %c0_41 = arith.constant 0 : index
    %c0_42 = arith.constant 0 : index
    %32 = vector.load %arg15[%c0_40, %c0_41, %c0_42] : memref<1x3x256xf32, #tpu.memory_space<vmem>>, vector<1x3x256xf32>
    %33 = vector.shape_cast %32 : vector<1x3x256xf32> to vector<3x256xf32>
    %c0_43 = arith.constant 0 : index
    %c0_44 = arith.constant 0 : index
    %c0_45 = arith.constant 0 : index
    %34 = vector.load %arg16[%c0_43, %c0_44, %c0_45] : memref<1x2x256xf32, #tpu.memory_space<vmem>>, vector<1x2x256xf32>
    %35 = vector.shape_cast %34 : vector<1x2x256xf32> to vector<2x256xf32>
    %36 = tpu.concatenate %31, %33, %35 in 0 : vector<3x256xf32>, vector<3x256xf32>, vector<2x256xf32> -> vector<8x256xf32>
    %37 = tpu.concatenate %8, %15, %22, %29, %36 in 1 : vector<8x256xf32>, vector<8x256xf32>, vector<8x256xf32>, vector<8x256xf32>, vector<8x256xf32> -> vector<8x1280xf32>
    %c17_i32 = arith.constant 17 : i32
    %38 = tpu.dynamic_rotate %37 by %c17_i32 dim 1 : vector<8x1280xf32>, i32 -> vector<8x1280xf32>
    %39 = vector.extract_strided_slice %0 {offsets = [0, 0], sizes = [1, 1280], strides = [1, 1]} : vector<9x1280xf32> to vector<1x1280xf32>
    %40 = vector.broadcast %39 : vector<1x1280xf32> to vector<8x1280xf32>
    %41 = arith.mulf %38, %40 : vector<8x1280xf32>
    %c16_i32 = arith.constant 16 : i32
    %42 = tpu.dynamic_rotate %37 by %c16_i32 dim 1 : vector<8x1280xf32>, i32 -> vector<8x1280xf32>
    %43 = vector.extract_strided_slice %0 {offsets = [1, 0], sizes = [1, 1280], strides = [1, 1]} : vector<9x1280xf32> to vector<1x1280xf32>
    %44 = vector.broadcast %43 : vector<1x1280xf32> to vector<8x1280xf32>
    %45 = arith.mulf %42, %44 : vector<8x1280xf32>
    %c15_i32 = arith.constant 15 : i32
    %46 = tpu.dynamic_rotate %37 by %c15_i32 dim 1 : vector<8x1280xf32>, i32 -> vector<8x1280xf32>
    %47 = vector.extract_strided_slice %0 {offsets = [2, 0], sizes = [1, 1280], strides = [1, 1]} : vector<9x1280xf32> to vector<1x1280xf32>
    %48 = vector.broadcast %47 : vector<1x1280xf32> to vector<8x1280xf32>
    %49 = arith.mulf %46, %48 : vector<8x1280xf32>
    %c1_i32 = arith.constant 1 : i32
    %50 = tpu.dynamic_rotate %37 by %c1_i32 dim 1 : vector<8x1280xf32>, i32 -> vector<8x1280xf32>
    %51 = vector.extract_strided_slice %0 {offsets = [3, 0], sizes = [1, 1280], strides = [1, 1]} : vector<9x1280xf32> to vector<1x1280xf32>
    %52 = vector.broadcast %51 : vector<1x1280xf32> to vector<8x1280xf32>
    %53 = arith.mulf %50, %52 : vector<8x1280xf32>
    %c1279_i32 = arith.constant 1279 : i32
    %54 = tpu.dynamic_rotate %37 by %c1279_i32 dim 1 : vector<8x1280xf32>, i32 -> vector<8x1280xf32>
    %55 = vector.extract_strided_slice %0 {offsets = [5, 0], sizes = [1, 1280], strides = [1, 1]} : vector<9x1280xf32> to vector<1x1280xf32>
    %56 = vector.broadcast %55 : vector<1x1280xf32> to vector<8x1280xf32>
    %57 = arith.mulf %54, %56 : vector<8x1280xf32>
    %c1265_i32 = arith.constant 1265 : i32
    %58 = tpu.dynamic_rotate %37 by %c1265_i32 dim 1 : vector<8x1280xf32>, i32 -> vector<8x1280xf32>
    %59 = vector.extract_strided_slice %0 {offsets = [6, 0], sizes = [1, 1280], strides = [1, 1]} : vector<9x1280xf32> to vector<1x1280xf32>
    %60 = vector.broadcast %59 : vector<1x1280xf32> to vector<8x1280xf32>
    %61 = arith.mulf %58, %60 : vector<8x1280xf32>
    %c1264_i32 = arith.constant 1264 : i32
    %62 = tpu.dynamic_rotate %37 by %c1264_i32 dim 1 : vector<8x1280xf32>, i32 -> vector<8x1280xf32>
    %63 = vector.extract_strided_slice %0 {offsets = [7, 0], sizes = [1, 1280], strides = [1, 1]} : vector<9x1280xf32> to vector<1x1280xf32>
    %64 = vector.broadcast %63 : vector<1x1280xf32> to vector<8x1280xf32>
    %65 = arith.mulf %62, %64 : vector<8x1280xf32>
    %c1263_i32 = arith.constant 1263 : i32
    %66 = tpu.dynamic_rotate %37 by %c1263_i32 dim 1 : vector<8x1280xf32>, i32 -> vector<8x1280xf32>
    %67 = vector.extract_strided_slice %0 {offsets = [8, 0], sizes = [1, 1280], strides = [1, 1]} : vector<9x1280xf32> to vector<1x1280xf32>
    %68 = vector.broadcast %67 : vector<1x1280xf32> to vector<8x1280xf32>
    %69 = arith.mulf %66, %68 : vector<8x1280xf32>
    %cst = arith.constant 1.000000e+00 : f32
    %70 = vector.broadcast %cst : f32 to vector<1x1280xf32>
    %71 = tpu.concatenate %41, %45, %49, %53, %37, %57, %61, %65, %69, %70 in 0 : vector<8x1280xf32>, vector<8x1280xf32>, vector<8x1280xf32>, vector<8x1280xf32>, vector<8x1280xf32>, vector<8x1280xf32>, vector<8x1280xf32>, vector<8x1280xf32>, vector<8x1280xf32>, vector<1x1280xf32> -> vector<73x1280xf32>
    %72 = arith.truncf %71 : vector<73x1280xf32> to vector<73x1280xbf16>
    %c0_46 = arith.constant 0 : index
    %c0_47 = arith.constant 0 : index
    %73 = vector.load %arg17[%c0_46, %c0_47] : memref<8x73xbf16, #tpu.memory_space<vmem>>, vector<8x73xbf16>
    %cst_48 = arith.constant dense<0.000000e+00> : vector<8x1280xf32>
    %74 = tpu.matmul %73, %72, %cst_48 {dimension_numbers = #tpu.dot_dimension_numbers<[1], [0], [0], [1], [0, 0, 1, 1], [], []>} : vector<8x73xbf16>, vector<73x1280xbf16>, vector<8x1280xf32> -> vector<8x1280xf32>
    %cst_49 = arith.constant 0.000000e+00 : f32
    %75 = vector.broadcast %cst_49 : f32 to vector<8x1280xf32>
    %76 = arith.maximumf %74, %75 : vector<8x1280xf32>
    %c17_i32_50 = arith.constant 17 : i32
    %77 = tpu.dynamic_rotate %76 by %c17_i32_50 dim 1 : vector<8x1280xf32>, i32 -> vector<8x1280xf32>
    %78 = vector.extract_strided_slice %0 {offsets = [0, 0], sizes = [1, 1280], strides = [1, 1]} : vector<9x1280xf32> to vector<1x1280xf32>
    %79 = vector.broadcast %78 : vector<1x1280xf32> to vector<8x1280xf32>
    %80 = arith.mulf %77, %79 : vector<8x1280xf32>
    %c16_i32_51 = arith.constant 16 : i32
    %81 = tpu.dynamic_rotate %76 by %c16_i32_51 dim 1 : vector<8x1280xf32>, i32 -> vector<8x1280xf32>
    %82 = vector.extract_strided_slice %0 {offsets = [1, 0], sizes = [1, 1280], strides = [1, 1]} : vector<9x1280xf32> to vector<1x1280xf32>
    %83 = vector.broadcast %82 : vector<1x1280xf32> to vector<8x1280xf32>
    %84 = arith.mulf %81, %83 : vector<8x1280xf32>
    %c15_i32_52 = arith.constant 15 : i32
    %85 = tpu.dynamic_rotate %76 by %c15_i32_52 dim 1 : vector<8x1280xf32>, i32 -> vector<8x1280xf32>
    %86 = vector.extract_strided_slice %0 {offsets = [2, 0], sizes = [1, 1280], strides = [1, 1]} : vector<9x1280xf32> to vector<1x1280xf32>
    %87 = vector.broadcast %86 : vector<1x1280xf32> to vector<8x1280xf32>
    %88 = arith.mulf %85, %87 : vector<8x1280xf32>
    %c1_i32_53 = arith.constant 1 : i32
    %89 = tpu.dynamic_rotate %76 by %c1_i32_53 dim 1 : vector<8x1280xf32>, i32 -> vector<8x1280xf32>
    %90 = vector.extract_strided_slice %0 {offsets = [3, 0], sizes = [1, 1280], strides = [1, 1]} : vector<9x1280xf32> to vector<1x1280xf32>
    %91 = vector.broadcast %90 : vector<1x1280xf32> to vector<8x1280xf32>
    %92 = arith.mulf %89, %91 : vector<8x1280xf32>
    %c1279_i32_54 = arith.constant 1279 : i32
    %93 = tpu.dynamic_rotate %76 by %c1279_i32_54 dim 1 : vector<8x1280xf32>, i32 -> vector<8x1280xf32>
    %94 = vector.extract_strided_slice %0 {offsets = [5, 0], sizes = [1, 1280], strides = [1, 1]} : vector<9x1280xf32> to vector<1x1280xf32>
    %95 = vector.broadcast %94 : vector<1x1280xf32> to vector<8x1280xf32>
    %96 = arith.mulf %93, %95 : vector<8x1280xf32>
    %c1265_i32_55 = arith.constant 1265 : i32
    %97 = tpu.dynamic_rotate %76 by %c1265_i32_55 dim 1 : vector<8x1280xf32>, i32 -> vector<8x1280xf32>
    %98 = vector.extract_strided_slice %0 {offsets = [6, 0], sizes = [1, 1280], strides = [1, 1]} : vector<9x1280xf32> to vector<1x1280xf32>
    %99 = vector.broadcast %98 : vector<1x1280xf32> to vector<8x1280xf32>
    %100 = arith.mulf %97, %99 : vector<8x1280xf32>
    %c1264_i32_56 = arith.constant 1264 : i32
    %101 = tpu.dynamic_rotate %76 by %c1264_i32_56 dim 1 : vector<8x1280xf32>, i32 -> vector<8x1280xf32>
    %102 = vector.extract_strided_slice %0 {offsets = [7, 0], sizes = [1, 1280], strides = [1, 1]} : vector<9x1280xf32> to vector<1x1280xf32>
    %103 = vector.broadcast %102 : vector<1x1280xf32> to vector<8x1280xf32>
    %104 = arith.mulf %101, %103 : vector<8x1280xf32>
    %c1263_i32_57 = arith.constant 1263 : i32
    %105 = tpu.dynamic_rotate %76 by %c1263_i32_57 dim 1 : vector<8x1280xf32>, i32 -> vector<8x1280xf32>
    %106 = vector.extract_strided_slice %0 {offsets = [8, 0], sizes = [1, 1280], strides = [1, 1]} : vector<9x1280xf32> to vector<1x1280xf32>
    %107 = vector.broadcast %106 : vector<1x1280xf32> to vector<8x1280xf32>
    %108 = arith.mulf %105, %107 : vector<8x1280xf32>
    %cst_58 = arith.constant 1.000000e+00 : f32
    %109 = vector.broadcast %cst_58 : f32 to vector<1x1280xf32>
    %110 = tpu.concatenate %80, %84, %88, %92, %76, %96, %100, %104, %108, %109 in 0 : vector<8x1280xf32>, vector<8x1280xf32>, vector<8x1280xf32>, vector<8x1280xf32>, vector<8x1280xf32>, vector<8x1280xf32>, vector<8x1280xf32>, vector<8x1280xf32>, vector<8x1280xf32>, vector<1x1280xf32> -> vector<73x1280xf32>
    %111 = arith.truncf %110 : vector<73x1280xf32> to vector<73x1280xbf16>
    %c0_59 = arith.constant 0 : index
    %c0_60 = arith.constant 0 : index
    %112 = vector.load %arg18[%c0_59, %c0_60] : memref<3x73xbf16, #tpu.memory_space<vmem>>, vector<3x73xbf16>
    %cst_61 = arith.constant dense<0.000000e+00> : vector<3x1280xf32>
    %113 = tpu.matmul %112, %111, %cst_61 {dimension_numbers = #tpu.dot_dimension_numbers<[1], [0], [0], [1], [0, 0, 1, 1], [], []>} : vector<3x73xbf16>, vector<73x1280xbf16>, vector<3x1280xf32> -> vector<3x1280xf32>
    %114 = vector.extract_strided_slice %113 {offsets = [0, 0], sizes = [3, 256], strides = [1, 1]} : vector<3x1280xf32> to vector<3x256xf32>
    %c0_62 = arith.constant 0 : index
    %c0_63 = arith.constant 0 : index
    %c0_64 = arith.constant 0 : index
    %115 = vector.load %arg22[%c0_62, %c0_63, %c0_64] : memref<1x3x256xf32, #tpu.memory_space<vmem>>, vector<1x3x256xf32>
    %116 = vector.shape_cast %115 : vector<1x3x256xf32> to vector<3x256xf32>
    %117 = vector.shape_cast %114 : vector<3x256xf32> to vector<1x3x256xf32>
    tpu.vector_store %arg22[%c0_62, %c0_63, %c0_64], %117 {strides = array<i32>} : memref<1x3x256xf32, #tpu.memory_space<vmem>>, vector<1x3x256xf32>,
    %118 = vector.extract_strided_slice %113 {offsets = [0, 256], sizes = [3, 256], strides = [1, 1]} : vector<3x1280xf32> to vector<3x256xf32>
    %c0_65 = arith.constant 0 : index
    %c0_66 = arith.constant 0 : index
    %c0_67 = arith.constant 0 : index
    %119 = vector.load %arg23[%c0_65, %c0_66, %c0_67] : memref<1x3x256xf32, #tpu.memory_space<vmem>>, vector<1x3x256xf32>
    %120 = vector.shape_cast %119 : vector<1x3x256xf32> to vector<3x256xf32>
    %121 = vector.shape_cast %118 : vector<3x256xf32> to vector<1x3x256xf32>
    tpu.vector_store %arg23[%c0_65, %c0_66, %c0_67], %121 {strides = array<i32>} : memref<1x3x256xf32, #tpu.memory_space<vmem>>, vector<1x3x256xf32>,
    %122 = vector.extract_strided_slice %113 {offsets = [0, 512], sizes = [3, 256], strides = [1, 1]} : vector<3x1280xf32> to vector<3x256xf32>
    %c0_68 = arith.constant 0 : index
    %c0_69 = arith.constant 0 : index
    %c0_70 = arith.constant 0 : index
    %123 = vector.load %arg24[%c0_68, %c0_69, %c0_70] : memref<1x3x256xf32, #tpu.memory_space<vmem>>, vector<1x3x256xf32>
    %124 = vector.shape_cast %123 : vector<1x3x256xf32> to vector<3x256xf32>
    %125 = vector.shape_cast %122 : vector<3x256xf32> to vector<1x3x256xf32>
    tpu.vector_store %arg24[%c0_68, %c0_69, %c0_70], %125 {strides = array<i32>} : memref<1x3x256xf32, #tpu.memory_space<vmem>>, vector<1x3x256xf32>,
    %126 = vector.extract_strided_slice %113 {offsets = [0, 768], sizes = [3, 256], strides = [1, 1]} : vector<3x1280xf32> to vector<3x256xf32>
    %c0_71 = arith.constant 0 : index
    %c0_72 = arith.constant 0 : index
    %c0_73 = arith.constant 0 : index
    %127 = vector.load %arg25[%c0_71, %c0_72, %c0_73] : memref<1x3x256xf32, #tpu.memory_space<vmem>>, vector<1x3x256xf32>
    %128 = vector.shape_cast %127 : vector<1x3x256xf32> to vector<3x256xf32>
    %129 = vector.shape_cast %126 : vector<3x256xf32> to vector<1x3x256xf32>
    tpu.vector_store %arg25[%c0_71, %c0_72, %c0_73], %129 {strides = array<i32>} : memref<1x3x256xf32, #tpu.memory_space<vmem>>, vector<1x3x256xf32>,
    %130 = vector.extract_strided_slice %113 {offsets = [0, 1024], sizes = [3, 256], strides = [1, 1]} : vector<3x1280xf32> to vector<3x256xf32>
    %c0_74 = arith.constant 0 : index
    %c0_75 = arith.constant 0 : index
    %c0_76 = arith.constant 0 : index
    %131 = vector.load %arg26[%c0_74, %c0_75, %c0_76] : memref<1x3x256xf32, #tpu.memory_space<vmem>>, vector<1x3x256xf32>
    %132 = vector.shape_cast %131 : vector<1x3x256xf32> to vector<3x256xf32>
    %133 = vector.shape_cast %130 : vector<3x256xf32> to vector<1x3x256xf32>
    tpu.vector_store %arg26[%c0_74, %c0_75, %c0_76], %133 {strides = array<i32>} : memref<1x3x256xf32, #tpu.memory_space<vmem>>, vector<1x3x256xf32>,
    %134 = vector.extract_strided_slice %113 {offsets = [0, 0], sizes = [3, 256], strides = [1, 1]} : vector<3x1280xf32> to vector<3x256xf32>
    %135 = vector.extract_strided_slice %113 {offsets = [0, 256], sizes = [3, 256], strides = [1, 1]} : vector<3x1280xf32> to vector<3x256xf32>
    %136 = vector.extract_strided_slice %113 {offsets = [0, 768], sizes = [3, 256], strides = [1, 1]} : vector<3x1280xf32> to vector<3x256xf32>
    %137 = vector.extract_strided_slice %113 {offsets = [0, 1024], sizes = [3, 256], strides = [1, 1]} : vector<3x1280xf32> to vector<3x256xf32>
    %138 = tpu.concatenate %134, %135, %136, %137 in 0 : vector<3x256xf32>, vector<3x256xf32>, vector<3x256xf32>, vector<3x256xf32> -> vector<12x256xf32>
    %c17_i32_77 = arith.constant 17 : i32
    %139 = tpu.dynamic_rotate %138 by %c17_i32_77 dim 1 : vector<12x256xf32>, i32 -> vector<12x256xf32>
    %140 = vector.extract_strided_slice %1 {offsets = [0, 0], sizes = [1, 256], strides = [1, 1]} : vector<9x256xf32> to vector<1x256xf32>
    %141 = vector.broadcast %140 : vector<1x256xf32> to vector<12x256xf32>
    %142 = arith.mulf %139, %141 : vector<12x256xf32>
    %c16_i32_78 = arith.constant 16 : i32
    %143 = tpu.dynamic_rotate %138 by %c16_i32_78 dim 1 : vector<12x256xf32>, i32 -> vector<12x256xf32>
    %144 = vector.extract_strided_slice %1 {offsets = [1, 0], sizes = [1, 256], strides = [1, 1]} : vector<9x256xf32> to vector<1x256xf32>
    %145 = vector.broadcast %144 : vector<1x256xf32> to vector<12x256xf32>
    %146 = arith.mulf %143, %145 : vector<12x256xf32>
    %c15_i32_79 = arith.constant 15 : i32
    %147 = tpu.dynamic_rotate %138 by %c15_i32_79 dim 1 : vector<12x256xf32>, i32 -> vector<12x256xf32>
    %148 = vector.extract_strided_slice %1 {offsets = [2, 0], sizes = [1, 256], strides = [1, 1]} : vector<9x256xf32> to vector<1x256xf32>
    %149 = vector.broadcast %148 : vector<1x256xf32> to vector<12x256xf32>
    %150 = arith.mulf %147, %149 : vector<12x256xf32>
    %c1_i32_80 = arith.constant 1 : i32
    %151 = tpu.dynamic_rotate %138 by %c1_i32_80 dim 1 : vector<12x256xf32>, i32 -> vector<12x256xf32>
    %152 = vector.extract_strided_slice %1 {offsets = [3, 0], sizes = [1, 256], strides = [1, 1]} : vector<9x256xf32> to vector<1x256xf32>
    %153 = vector.broadcast %152 : vector<1x256xf32> to vector<12x256xf32>
    %154 = arith.mulf %151, %153 : vector<12x256xf32>
    %c255_i32 = arith.constant 255 : i32
    %155 = tpu.dynamic_rotate %138 by %c255_i32 dim 1 : vector<12x256xf32>, i32 -> vector<12x256xf32>
    %156 = vector.extract_strided_slice %1 {offsets = [5, 0], sizes = [1, 256], strides = [1, 1]} : vector<9x256xf32> to vector<1x256xf32>
    %157 = vector.broadcast %156 : vector<1x256xf32> to vector<12x256xf32>
    %158 = arith.mulf %155, %157 : vector<12x256xf32>
    %c241_i32 = arith.constant 241 : i32
    %159 = tpu.dynamic_rotate %138 by %c241_i32 dim 1 : vector<12x256xf32>, i32 -> vector<12x256xf32>
    %160 = vector.extract_strided_slice %1 {offsets = [6, 0], sizes = [1, 256], strides = [1, 1]} : vector<9x256xf32> to vector<1x256xf32>
    %161 = vector.broadcast %160 : vector<1x256xf32> to vector<12x256xf32>
    %162 = arith.mulf %159, %161 : vector<12x256xf32>
    %c240_i32 = arith.constant 240 : i32
    %163 = tpu.dynamic_rotate %138 by %c240_i32 dim 1 : vector<12x256xf32>, i32 -> vector<12x256xf32>
    %164 = vector.extract_strided_slice %1 {offsets = [7, 0], sizes = [1, 256], strides = [1, 1]} : vector<9x256xf32> to vector<1x256xf32>
    %165 = vector.broadcast %164 : vector<1x256xf32> to vector<12x256xf32>
    %166 = arith.mulf %163, %165 : vector<12x256xf32>
    %c239_i32 = arith.constant 239 : i32
    %167 = tpu.dynamic_rotate %138 by %c239_i32 dim 1 : vector<12x256xf32>, i32 -> vector<12x256xf32>
    %168 = vector.extract_strided_slice %1 {offsets = [8, 0], sizes = [1, 256], strides = [1, 1]} : vector<9x256xf32> to vector<1x256xf32>
    %169 = vector.broadcast %168 : vector<1x256xf32> to vector<12x256xf32>
    %170 = arith.mulf %167, %169 : vector<12x256xf32>
    %cst_81 = arith.constant 1.000000e+00 : f32
    %171 = vector.broadcast %cst_81 : f32 to vector<1x256xf32>
    %172 = tpu.concatenate %142, %146, %150, %154, %138, %158, %162, %166, %170, %171 in 0 : vector<12x256xf32>, vector<12x256xf32>, vector<12x256xf32>, vector<12x256xf32>, vector<12x256xf32>, vector<12x256xf32>, vector<12x256xf32>, vector<12x256xf32>, vector<12x256xf32>, vector<1x256xf32> -> vector<109x256xf32>
    %173 = arith.truncf %172 : vector<109x256xf32> to vector<109x256xbf16>
    %c0_82 = arith.constant 0 : index
    %c0_83 = arith.constant 0 : index
    %174 = vector.load %arg19[%c0_82, %c0_83] : memref<8x109xbf16, #tpu.memory_space<vmem>>, vector<8x109xbf16>
    %cst_84 = arith.constant dense<0.000000e+00> : vector<8x256xf32>
    %175 = tpu.matmul %174, %173, %cst_84 {dimension_numbers = #tpu.dot_dimension_numbers<[1], [0], [0], [1], [0, 0, 1, 1], [], []>} : vector<8x109xbf16>, vector<109x256xbf16>, vector<8x256xf32> -> vector<8x256xf32>
    %cst_85 = arith.constant 0.000000e+00 : f32
    %176 = vector.broadcast %cst_85 : f32 to vector<8x256xf32>
    %177 = arith.maximumf %175, %176 : vector<8x256xf32>
    %c17_i32_86 = arith.constant 17 : i32
    %178 = tpu.dynamic_rotate %177 by %c17_i32_86 dim 1 : vector<8x256xf32>, i32 -> vector<8x256xf32>
    %179 = vector.extract_strided_slice %1 {offsets = [0, 0], sizes = [1, 256], strides = [1, 1]} : vector<9x256xf32> to vector<1x256xf32>
    %180 = vector.broadcast %179 : vector<1x256xf32> to vector<8x256xf32>
    %181 = arith.mulf %178, %180 : vector<8x256xf32>
    %c16_i32_87 = arith.constant 16 : i32
    %182 = tpu.dynamic_rotate %177 by %c16_i32_87 dim 1 : vector<8x256xf32>, i32 -> vector<8x256xf32>
    %183 = vector.extract_strided_slice %1 {offsets = [1, 0], sizes = [1, 256], strides = [1, 1]} : vector<9x256xf32> to vector<1x256xf32>
    %184 = vector.broadcast %183 : vector<1x256xf32> to vector<8x256xf32>
    %185 = arith.mulf %182, %184 : vector<8x256xf32>
    %c15_i32_88 = arith.constant 15 : i32
    %186 = tpu.dynamic_rotate %177 by %c15_i32_88 dim 1 : vector<8x256xf32>, i32 -> vector<8x256xf32>
    %187 = vector.extract_strided_slice %1 {offsets = [2, 0], sizes = [1, 256], strides = [1, 1]} : vector<9x256xf32> to vector<1x256xf32>
    %188 = vector.broadcast %187 : vector<1x256xf32> to vector<8x256xf32>
    %189 = arith.mulf %186, %188 : vector<8x256xf32>
    %c1_i32_89 = arith.constant 1 : i32
    %190 = tpu.dynamic_rotate %177 by %c1_i32_89 dim 1 : vector<8x256xf32>, i32 -> vector<8x256xf32>
    %191 = vector.extract_strided_slice %1 {offsets = [3, 0], sizes = [1, 256], strides = [1, 1]} : vector<9x256xf32> to vector<1x256xf32>
    %192 = vector.broadcast %191 : vector<1x256xf32> to vector<8x256xf32>
    %193 = arith.mulf %190, %192 : vector<8x256xf32>
    %c255_i32_90 = arith.constant 255 : i32
    %194 = tpu.dynamic_rotate %177 by %c255_i32_90 dim 1 : vector<8x256xf32>, i32 -> vector<8x256xf32>
    %195 = vector.extract_strided_slice %1 {offsets = [5, 0], sizes = [1, 256], strides = [1, 1]} : vector<9x256xf32> to vector<1x256xf32>
    %196 = vector.broadcast %195 : vector<1x256xf32> to vector<8x256xf32>
    %197 = arith.mulf %194, %196 : vector<8x256xf32>
    %c241_i32_91 = arith.constant 241 : i32
    %198 = tpu.dynamic_rotate %177 by %c241_i32_91 dim 1 : vector<8x256xf32>, i32 -> vector<8x256xf32>
    %199 = vector.extract_strided_slice %1 {offsets = [6, 0], sizes = [1, 256], strides = [1, 1]} : vector<9x256xf32> to vector<1x256xf32>
    %200 = vector.broadcast %199 : vector<1x256xf32> to vector<8x256xf32>
    %201 = arith.mulf %198, %200 : vector<8x256xf32>
    %c240_i32_92 = arith.constant 240 : i32
    %202 = tpu.dynamic_rotate %177 by %c240_i32_92 dim 1 : vector<8x256xf32>, i32 -> vector<8x256xf32>
    %203 = vector.extract_strided_slice %1 {offsets = [7, 0], sizes = [1, 256], strides = [1, 1]} : vector<9x256xf32> to vector<1x256xf32>
    %204 = vector.broadcast %203 : vector<1x256xf32> to vector<8x256xf32>
    %205 = arith.mulf %202, %204 : vector<8x256xf32>
    %c239_i32_93 = arith.constant 239 : i32
    %206 = tpu.dynamic_rotate %177 by %c239_i32_93 dim 1 : vector<8x256xf32>, i32 -> vector<8x256xf32>
    %207 = vector.extract_strided_slice %1 {offsets = [8, 0], sizes = [1, 256], strides = [1, 1]} : vector<9x256xf32> to vector<1x256xf32>
    %208 = vector.broadcast %207 : vector<1x256xf32> to vector<8x256xf32>
    %209 = arith.mulf %206, %208 : vector<8x256xf32>
    %cst_94 = arith.constant 1.000000e+00 : f32
    %210 = vector.broadcast %cst_94 : f32 to vector<1x256xf32>
    %211 = tpu.concatenate %181, %185, %189, %193, %177, %197, %201, %205, %209, %210 in 0 : vector<8x256xf32>, vector<8x256xf32>, vector<8x256xf32>, vector<8x256xf32>, vector<8x256xf32>, vector<8x256xf32>, vector<8x256xf32>, vector<8x256xf32>, vector<8x256xf32>, vector<1x256xf32> -> vector<73x256xf32>
    %212 = arith.truncf %211 : vector<73x256xf32> to vector<73x256xbf16>
    %c0_95 = arith.constant 0 : index
    %c0_96 = arith.constant 0 : index
    %213 = vector.load %arg20[%c0_95, %c0_96] : memref<3x73xbf16, #tpu.memory_space<vmem>>, vector<3x73xbf16>
    %cst_97 = arith.constant dense<0.000000e+00> : vector<3x256xf32>
    %214 = tpu.matmul %213, %212, %cst_97 {dimension_numbers = #tpu.dot_dimension_numbers<[1], [0], [0], [1], [0, 0, 1, 1], [], []>} : vector<3x73xbf16>, vector<73x256xbf16>, vector<3x256xf32> -> vector<3x256xf32>
    %c0_98 = arith.constant 0 : index
    %c0_99 = arith.constant 0 : index
    %c0_100 = arith.constant 0 : index
    %215 = vector.load %arg21[%c0_98, %c0_99, %c0_100] : memref<1x3x256xf32, #tpu.memory_space<vmem>>, vector<1x3x256xf32>
    %216 = vector.shape_cast %215 : vector<1x3x256xf32> to vector<3x256xf32>
    %217 = vector.shape_cast %214 : vector<3x256xf32> to vector<1x3x256xf32>
    tpu.vector_store %arg21[%c0_98, %c0_99, %c0_100], %217 {strides = array<i32>} : memref<1x3x256xf32, #tpu.memory_space<vmem>>, vector<1x3x256xf32>,
    return
  }
  func.func @transform_0(%arg0: i32) -> (i32, i32) {
    %c0_i32 = arith.constant 0 : i32
    %c0_i32_0 = arith.constant 0 : i32
    %c0_i32_1 = arith.constant 0 : i32
    return %c0_i32, %c0_i32_0 : i32, i32
  }
  func.func @transform_1(%arg0: i32) -> (i32, i32, i32) {
    %c0_i32 = arith.constant 0 : i32
    %c0_i32_0 = arith.constant 0 : i32
    %c0_i32_1 = arith.constant 0 : i32
    return %arg0, %c0_i32, %c0_i32_0 : i32, i32, i32
  }
  func.func @transform_2(%arg0: i32) -> (i32, i32, i32) {
    %c0_i32 = arith.constant 0 : i32
    %c0_i32_0 = arith.constant 0 : i32
    %c0_i32_1 = arith.constant 0 : i32
    return %arg0, %c0_i32, %c0_i32_0 : i32, i32, i32
  }
  func.func @transform_3(%arg0: i32) -> (i32, i32, i32) {
    %c0_i32 = arith.constant 0 : i32
    %c0_i32_0 = arith.constant 0 : i32
    %c0_i32_1 = arith.constant 0 : i32
    return %arg0, %c0_i32, %c0_i32_0 : i32, i32, i32
  }
  func.func @transform_4(%arg0: i32) -> (i32, i32, i32) {
    %c0_i32 = arith.constant 0 : i32
    %c0_i32_0 = arith.constant 0 : i32
    %c0_i32_1 = arith.constant 0 : i32
    return %arg0, %c0_i32, %c0_i32_0 : i32, i32, i32
  }
  func.func @transform_5(%arg0: i32) -> (i32, i32, i32) {
    %c0_i32 = arith.constant 0 : i32
    %c0_i32_0 = arith.constant 0 : i32
    %c0_i32_1 = arith.constant 0 : i32
    return %arg0, %c0_i32, %c0_i32_0 : i32, i32, i32
  }
  func.func @transform_6(%arg0: i32) -> (i32, i32, i32) {
    %c0_i32 = arith.constant 0 : i32
    %c0_i32_0 = arith.constant 0 : i32
    %c0_i32_1 = arith.constant 0 : i32
    return %arg0, %c0_i32, %c0_i32_0 : i32, i32, i32
  }
  func.func @transform_7(%arg0: i32) -> (i32, i32, i32) {
    %c0_i32 = arith.constant 0 : i32
    %c0_i32_0 = arith.constant 0 : i32
    %c0_i32_1 = arith.constant 0 : i32
    return %arg0, %c0_i32, %c0_i32_0 : i32, i32, i32
  }
  func.func @transform_8(%arg0: i32) -> (i32, i32, i32) {
    %c0_i32 = arith.constant 0 : i32
    %c0_i32_0 = arith.constant 0 : i32
    %c0_i32_1 = arith.constant 0 : i32
    return %arg0, %c0_i32, %c0_i32_0 : i32, i32, i32
  }
  func.func @transform_9(%arg0: i32) -> (i32, i32, i32) {
    %c0_i32 = arith.constant 0 : i32
    %c0_i32_0 = arith.constant 0 : i32
    %c0_i32_1 = arith.constant 0 : i32
    return %arg0, %c0_i32, %c0_i32_0 : i32, i32, i32
  }
  func.func @transform_10(%arg0: i32) -> (i32, i32, i32) {
    %c0_i32 = arith.constant 0 : i32
    %c0_i32_0 = arith.constant 0 : i32
    %c0_i32_1 = arith.constant 0 : i32
    return %arg0, %c0_i32, %c0_i32_0 : i32, i32, i32
  }
  func.func @transform_11(%arg0: i32) -> (i32, i32, i32) {
    %c0_i32 = arith.constant 0 : i32
    %c0_i32_0 = arith.constant 0 : i32
    %c0_i32_1 = arith.constant 0 : i32
    return %arg0, %c0_i32, %c0_i32_0 : i32, i32, i32
  }
  func.func @transform_12(%arg0: i32) -> (i32, i32, i32) {
    %c0_i32 = arith.constant 0 : i32
    %c0_i32_0 = arith.constant 0 : i32
    %c0_i32_1 = arith.constant 0 : i32
    return %arg0, %c0_i32, %c0_i32_0 : i32, i32, i32
  }
  func.func @transform_13(%arg0: i32) -> (i32, i32, i32) {
    %c0_i32 = arith.constant 0 : i32
    %c0_i32_0 = arith.constant 0 : i32
    %c0_i32_1 = arith.constant 0 : i32
    return %arg0, %c0_i32, %c0_i32_0 : i32, i32, i32
  }
  func.func @transform_14(%arg0: i32) -> (i32, i32, i32) {
    %c0_i32 = arith.constant 0 : i32
    %c0_i32_0 = arith.constant 0 : i32
    %c0_i32_1 = arith.constant 0 : i32
    return %arg0, %c0_i32, %c0_i32_0 : i32, i32, i32
  }
  func.func @transform_15(%arg0: i32) -> (i32, i32, i32) {
    %c0_i32 = arith.constant 0 : i32
    %c0_i32_0 = arith.constant 0 : i32
    %c0_i32_1 = arith.constant 0 : i32
    return %arg0, %c0_i32, %c0_i32_0 : i32, i32, i32
  }
  func.func @transform_16(%arg0: i32) -> (i32, i32) {
    %c0_i32 = arith.constant 0 : i32
    %c0_i32_0 = arith.constant 0 : i32
    %c0_i32_1 = arith.constant 0 : i32
    return %c0_i32, %c0_i32_0 : i32, i32
  }
  func.func @transform_17(%arg0: i32) -> (i32, i32) {
    %c0_i32 = arith.constant 0 : i32
    %c0_i32_0 = arith.constant 0 : i32
    %c0_i32_1 = arith.constant 0 : i32
    return %c0_i32, %c0_i32_0 : i32, i32
  }
  func.func @transform_18(%arg0: i32) -> (i32, i32) {
    %c0_i32 = arith.constant 0 : i32
    %c0_i32_0 = arith.constant 0 : i32
    %c0_i32_1 = arith.constant 0 : i32
    return %c0_i32, %c0_i32_0 : i32, i32
  }
  func.func @transform_19(%arg0: i32) -> (i32, i32) {
    %c0_i32 = arith.constant 0 : i32
    %c0_i32_0 = arith.constant 0 : i32
    %c0_i32_1 = arith.constant 0 : i32
    return %c0_i32, %c0_i32_0 : i32, i32
  }
  func.func @transform_20(%arg0: i32) -> (i32, i32, i32) {
    %c0_i32 = arith.constant 0 : i32
    %c0_i32_0 = arith.constant 0 : i32
    %c0_i32_1 = arith.constant 0 : i32
    return %arg0, %c0_i32, %c0_i32_0 : i32, i32, i32
  }
  func.func @transform_21(%arg0: i32) -> (i32, i32, i32) {
    %c0_i32 = arith.constant 0 : i32
    %c0_i32_0 = arith.constant 0 : i32
    %c0_i32_1 = arith.constant 0 : i32
    return %arg0, %c0_i32, %c0_i32_0 : i32, i32, i32
  }
  func.func @transform_22(%arg0: i32) -> (i32, i32, i32) {
    %c0_i32 = arith.constant 0 : i32
    %c0_i32_0 = arith.constant 0 : i32
    %c0_i32_1 = arith.constant 0 : i32
    return %arg0, %c0_i32, %c0_i32_0 : i32, i32, i32
  }
  func.func @transform_23(%arg0: i32) -> (i32, i32, i32) {
    %c0_i32 = arith.constant 0 : i32
    %c0_i32_0 = arith.constant 0 : i32
    %c0_i32_1 = arith.constant 0 : i32
    return %arg0, %c0_i32, %c0_i32_0 : i32, i32, i32
  }
  func.func @transform_24(%arg0: i32) -> (i32, i32, i32) {
    %c0_i32 = arith.constant 0 : i32
    %c0_i32_0 = arith.constant 0 : i32
    %c0_i32_1 = arith.constant 0 : i32
    return %arg0, %c0_i32, %c0_i32_0 : i32, i32, i32
  }
  func.func @transform_25(%arg0: i32) -> (i32, i32, i32) {
    %c0_i32 = arith.constant 0 : i32
    %c0_i32_0 = arith.constant 0 : i32
    %c0_i32_1 = arith.constant 0 : i32
    return %arg0, %c0_i32, %c0_i32_0 : i32, i32, i32
  }
}

</mosaic_0001>

<bundles_post_ra>
// kernel: net_forward.1
= control target key start
LH: loop header
LB: loop body
LE: loop exit
PB: predicated region body
PF: predicated region fallthrough
CT: control target
= control target key end

     0   :  { %s3944_s29 = smov 0   ;;  %s6146_s0 = inlined_call_operand.vmem [shape: f32[9,1280], index: 0, kind: input, shape index: {}]   ;;  %s6147_s1 = inlined_call_operand.vmem [shape: f32[2,3,256], index: 1, kind: input, shape index: {}]   ;;  %s6148_s2 = inlined_call_operand.vmem [shape: f32[2,3,256], index: 2, kind: input, shape index: {}]   ;;  %s6149_s3 = inlined_call_operand.vmem [shape: f32[2,2,256], index: 3, kind: input, shape index: {}]   ;;  %s6150_s4 = inlined_call_operand.vmem [shape: f32[2,3,256], index: 4, kind: input, shape index: {}]   ;;  %s6151_s5 = inlined_call_operand.vmem [shape: f32[2,3,256], index: 5, kind: input, shape index: {}]   ;;  %s6152_s6 = inlined_call_operand.vmem [shape: f32[2,2,256], index: 6, kind: input, shape index: {}]   ;;  %s6153_s7 = inlined_call_operand.vmem [shape: f32[2,3,256], index: 7, kind: input, shape index: {}]   ;;  %s6154_s8 = inlined_call_operand.vmem [shape: f32[2,3,256], index: 8, kind: input, shape index: {}]   ;;  %s6155_s9 = inlined_call_operand.vmem [shape: f32[2,2,256], index: 9, kind: input, shape index: {}]   ;;  %s6156_s10 = inlined_call_operand.vmem [shape: f32[2,3,256], index: 10, kind: input, shape index: {}]   ;;  %s6157_s11 = inlined_call_operand.vmem [shape: f32[2,3,256], index: 11, kind: input, shape index: {}]   ;;  %s6158_s12 = inlined_call_operand.vmem [shape: f32[2,2,256], index: 12, kind: input, shape index: {}]   ;;  %s6159_s13 = inlined_call_operand.vmem [shape: f32[2,3,256], index: 13, kind: input, shape index: {}]   ;;  %s6160_s14 = inlined_call_operand.vmem [shape: f32[2,3,256], index: 14, kind: input, shape index: {}]   ;;  %s6161_s15 = inlined_call_operand.vmem [shape: f32[2,2,256], index: 15, kind: input, shape index: {}]   ;;  %s6162_s16 = inlined_call_operand.vmem [shape: bf16[8,73], index: 16, kind: input, shape index: {}]   ;;  %s6163_s17 = inlined_call_operand.vmem [shape: bf16[3,73], index: 17, kind: input, shape index: {}]   ;;  %s6164_s18 = inlined_call_operand.vmem [shape: bf16[8,109], index: 18, kind: input, shape index: {}]   ;;  %s6165_s19 = inlined_call_operand.vmem [shape: bf16[3,73], index: 19, kind: input, shape index: {}]   ;;  %s6166_s20 = inlined_call_operand.vmem [shape: f32[2,3,256], index: 20, kind: output, shape index: {0}]   ;;  %s6167_s21 = inlined_call_operand.vmem [shape: f32[2,3,256], index: 21, kind: output, shape index: {1}]   ;;  %s6168_s22 = inlined_call_operand.vmem [shape: f32[2,3,256], index: 22, kind: output, shape index: {2}]   ;;  %s6169_s23 = inlined_call_operand.vmem [shape: f32[2,3,256], index: 23, kind: output, shape index: {3}]   ;;  %s6170_s24 = inlined_call_operand.vmem [shape: f32[2,3,256], index: 24, kind: output, shape index: {4}]   ;;  %s6171_s25 = inlined_call_operand.vmem [shape: f32[2,3,256], index: 25, kind: output, shape index: {5}]  }
   0x1   :  { %6289 = sst [smem:[#allocation66_spill]] %s6146_s0 }
   0x2   :  { %6290 = sst [smem:[#allocation67_spill]] %s6147_s1 }
   0x3   :  { %6291 = sst [smem:[#allocation68_spill]] %s6148_s2 }
   0x4   :  { %6292 = sst [smem:[#allocation69_spill]] %s6149_s3 }
   0x5   :  { %6293 = sst [smem:[#allocation70_spill]] %s6150_s4 }
   0x6   :  { %6294 = sst [smem:[#allocation71_spill]] %s6151_s5 }
   0x7   :  { %6295 = sst [smem:[#allocation72_spill]] %s6152_s6 }
   0x8   :  { %6296 = sst [smem:[#allocation73_spill]] %s6153_s7 }
   0x9   :  { %6297 = sst [smem:[#allocation74_spill]] %s6154_s8 }
   0xa   :  { %6298 = sst [smem:[#allocation75_spill]] %s6155_s9 }
   0xb   :  { %6299 = sst [smem:[#allocation76_spill]] %s6156_s10 }
   0xc   :  { %6300 = sst [smem:[#allocation77_spill]] %s6159_s13 }
   0xd LB: > { %6301 = sst [smem:[#allocation2_spill]] %s3800_s29  ;;  %s3659_s2 = sadd.s32 4294967295, %s3800_s29   ;;  %s3800_s29 = sphi %s3944_s29, %s36_s29  }
   0xe   : > { %p3663_p0 = scmp.ge.s32.totalorder %s3800_s29, 1  ;;  %p838_p1 = scmp.lt.s32.totalorder %s3800_s29, 3 }
  0x10   : > { %p839_p2 = pnand %p3663_p0, %p838_p1 }
  0x12   : > { %842 = sbr.rel (%p839_p2) target bundleno = 1783 (0x6f7), region = 100 }
  0x19   : > { %p1001_p3 = scmp.lt.s32.totalorder %s3659_s2, 1  ;;  %v1144_v0 = vlaneseq  ;;  %v3802_v1 = vmov 1983009808   ;;  %s6302_s26 = sld [smem:[#allocation67_spill]]  ;;  %vm1151_vm0 = vcmask 1042432   ;;  %vm1154_vm1 = vcmask 1045504  }
  0x1a   : > { %v1142_v2 = vunpack.c.l.s4 %v3802_v1  ;;  %s6303_s4 = sld [smem:[#allocation68_spill]]  ;;  %s6304_s0 = sld [smem:[#allocation69_spill]]  ;;  %v6192_v56 = vmov 0   ;;  %vm1974_vm9 = vcmask 1043456   ;;  %vm1975_vm11 = vcmask 1044480  }
  0x1b   : > { %s6494_s2 = smov (!%p1001_p3, %s3659_s2), 1  ;;  %v3953_v3 = vshrl.u32 %v1144_v0, 7  ;;  %s6305_s13 = sld [smem:[#allocation77_spill]]  ;;  %2040 = vmatprep.mubr.bf16.mxu0 %v6192_v56  ;;  %2081 = vmatprep.mubr.bf16.mxu1 %v6192_v56  ;;  %vm1970_vm12 = vcmask 596992   ;;  %vm2873_vm13 = vcmask 1040384   ;;  %vm3089_vm14 = vcmask 1046528  }
  0x1c   : > { %v1143_v4 = vunpack.c.0.s8 %v1142_v2  ;;  %s3955_s6 = sshll.u32 %s6494_s2, 3  ;;  %s3957_s30 = sshll.u32 %s6494_s2, 2  ;;  %vm3085_vm15 = vcmask 891904  }
  0x1d   : > { %s1070_s27 = scalar_lea.vmem %s6160_s14, %s3955_s6  ;;  %s6306_s5 = sld [smem:[#allocation72_spill]] }
  0x1e   : > { %v3968_v5 = vsub.s32 %v1143_v4, %v3953_v3  ;;  %v1242_v12 = vld [vmem:[%s1070_s27] sm:$0x77]  ;;  %s6181_s8 = smov 16   ;;  %s6175_s27 = smov 17  }
  0x1f   : > { %s1005_s1 = scalar_lea.vmem %s6302_s26, %s3955_s6  ;;  %v1248_v17 = vcombine.high %v1242_v12, %v1242_v12  ;;  %v1249_v26 = vrot.slane %v1242_v12, 5  ;;  %s6308_s2 = sld [smem:[#allocation71_spill]]  ;;  %v4204_v12 = vand.u32 127, %v1144_v0 }
  0x20   : > { %s1010_s28 = scalar_lea.vmem %s6303_s4, %s3955_s6  ;;  %s1015_s29 = scalar_lea.vmem %s6304_s0, %s3957_s30  ;;  %v1127_v6 = vld [vmem:[%s1005_s1] sm:$0x77] }
  0x21   : > { %v1128_v7 = vld [vmem:[%s1010_s28] sm:$0x77]  ;;  %s1065_s3 = scalar_lea.vmem %s6305_s13, %s3955_s6  ;;  %v1131_v8 = vcombine.high %v1127_v6, %v1127_v6  ;;  %s1075_s1 = scalar_lea.vmem %s6161_s15, %s3957_s30  ;;  %v1250_v20 = vrot.slane %v1248_v17, 5  ;;  %vm1291_vm2 = vcmp.lt.s32.totalorder %v4204_v12, 17  ;;  %vm1372_vm3 = vcmp.lt.s32.totalorder %v4204_v12, 16 }
  0x22   : > { %v1134_v9 = vcombine.high %v1128_v7, %v1128_v7  ;;  %v3773_v10 = vld [vmem:[%s1015_s29] ss:$0 sps:$4 sm:$0xff]   ;;  %v1135_v21 = vrot.slane %v1128_v7, 5  ;;  %s6179_s28 = smov 15   ;;  %s6313_s13 = smov 17   ;;  %vm1453_vm4 = vcmp.lt.s32.totalorder %v4204_v12, 15 }
  0x23   : > { %v1241_v11 = vld [vmem:[%s1065_s3] sm:$0x77]  ;;  %v1147_v15 = vrot.slane %v3773_v10, %v3968_v5  ;;  %s1030_s0 = scalar_lea.vmem %s6306_s5, %s3957_s30  ;;  %s6307_s3 = sld [smem:[#allocation75_spill]]  ;;  %vm1534_vm5 = vcmp.lt.s32.totalorder %v4204_v12, 1  ;;  %vm1615_vm6 = vcmp.lt.s32.totalorder %v4204_v12, 127  ;;  %vm1696_vm7 = vcmp.lt.s32.totalorder %v4204_v12, 113 }
  0x24   : > { %v3776_v13 = vld [vmem:[%s1075_s1] ss:$0 sps:$4 sm:$0xff]   ;;  %v1136_v14 = vrot.slane %v1134_v9, 5  ;;  %v1245_v16 = vcombine.high %v1241_v11, %v1241_v11  ;;  %v1152_v27 = vsel %vm1151_vm0, %v1127_v6, %v1135_v21  ;;  %v1265_v30 = vsel %vm1151_vm0, %v1241_v11, %v1249_v26  ;;  %s6309_s1 = sld [smem:[#allocation70_spill]]  ;;  %s6310_s5 = sld [smem:[#allocation74_spill]] }
  0x25   : > { %v1261_v18 = vrot.slane %v3776_v13, %v3968_v5  ;;  %v1148_v25 = vcombine.low %v1147_v15, %v1147_v15  ;;  %s1025_s7 = scalar_lea.vmem %s6308_s2, %s3955_s6  ;;  %v3778_v32 = vld [vmem:[%s1030_s0] ss:$0 sps:$4 sm:$0xff]   ;;  %s6183_s0 = smov 127   ;;  %v4237_v21 = vsub.s32 3, %v3953_v3  ;;  %vm1777_vm8 = vcmp.lt.s32.totalorder %v4204_v12, 112 }
  0x26   : > { %v1153_v19 = vsel %vm1151_vm0, %v1131_v8, %v1136_v14  ;;  %v1266_v23 = vsel %vm1151_vm0, %v1245_v16, %v1250_v20  ;;  %v1158_v33 = vld [vmem:[%s1025_s7] sm:$0x77]  ;;  %v1177_v34 = vrot.slane %v3778_v32, %v3968_v5  ;;  %s6187_s7 = smov 112   ;;  %s6316_s4 = smov 15   ;;  %v4214_v16 = vsub.s32 1, %v3953_v3 }
  0x27   : > { %v3994_v22 = vsel %vm1154_vm1, %v1153_v19, %v1147_v15  ;;  %v4006_v24 = vsel %vm1154_vm1, %v1266_v23, %v1261_v18  ;;  %v1262_v28 = vcombine.low %v1261_v18, %v1261_v18  ;;  %v4018_v29 = vsel %vm1154_vm1, %v1152_v27, %v1148_v25  ;;  %s6317_s10 = sld [smem:[#allocation76_spill]]  ;;  %s6324_s29 = sld [smem:[#allocation66_spill]] }
  0x28   : > { %1354 = vrot.lane.b32.xlu1 %v3994_v22, %s6181_s8  ;;  %1271 = vrot.lane.b32.xlu0 %v3994_v22, %s6175_s27  ;;  %v1165_v35 = vrot.slane %v1158_v33, 5  ;;  %v1178_v37 = vcombine.low %v1177_v34, %v1177_v34  ;;  %v1164_v51 = vcombine.high %v1158_v33, %v1158_v33  ;;  %v4211_v15 = vsub.s32 0, %v3953_v3 }
  0x29   : > { %v4022_v31 = vsel %vm1154_vm1, %v1265_v30, %v1262_v28  ;;  %v4234_v20 = vsub.s32 2, %v3953_v3  ;;  %vm1858_vm10 = vcmp.lt.s32.totalorder %v4204_v12, 111 }
  0x2a   : > { %s1020_s26 = scalar_lea.vmem %s6309_s1, %s3955_s6  ;;  %s1040_s2 = scalar_lea.vmem %s6310_s5, %s3955_s6  ;;  %v1166_v55 = vrot.slane %v1164_v51, 5 }
  0x2b   : > { %v1157_v36 = vld [vmem:[%s1020_s26] sm:$0x77]  ;;  %s6227_s26 = smov 113   ;;  %s6185_s1 = smov 111  }
  0x2c   : > { %1370 = vrot.lane.b32.xlu1 %v4006_v24, %s6181_s8  ;;  %1287 = vrot.lane.b32.xlu0 %v4006_v24, %s6175_s27  ;;  %v1181_v38 = vsel %vm1151_vm0, %v1157_v36, %v1165_v35  ;;  %v1186_v40 = vld [vmem:[%s1040_s2] sm:$0x77]  ;;  %v1161_v54 = vcombine.high %v1157_v36, %v1157_v36  ;;  %s6315_s2 = scalar_lea.vmem %s6158_s12, %s3957_s30 }
  0x2d   : > { %v4051_v39 = vsel %vm1154_vm1, %v1181_v38, %v1178_v37  ;;  %v1192_v42 = vcombine.high %v1186_v40, %v1186_v40  ;;  %v1193_v47 = vrot.slane %v1186_v40, 5  ;;  %v3784_v59 = vld [vmem:[%s6315_s2] ss:$0 sps:$4 sm:$0xff]   ;;  %s6325_s5 = smov %s6324_s29  ;;  %v4223_v0 = vld [vmem:[%s6324_s29 + $0x8] sm:$0xff]  ;;  %s6400_s2 = smov 113  }
  0x2e   : > { %v1182_v57 = vsel %vm1151_vm0, %v1161_v54, %v1166_v55  ;;  %v1233_v61 = vrot.slane %v3784_v59, %v3968_v5  ;;  %v4229_v17 = vld [vmem:[%s6325_s5] sm:$0xff]  ;;  %v4241_v23 = vrot.slane %v4223_v0, %v4211_v15  ;;  %v4245_v25 = vrot.slane %v4223_v0, %v4214_v16  ;;  %s1105_s29 = scalar_lea.vmem %s6171_s25, %s3955_s6 }
  0x2f   : > { %v1194_v46 = vrot.slane %v1192_v42, 5  ;;  %v4111_v58 = vsel %vm1154_vm1, %v1182_v57, %v1177_v34  ;;  %v4257_v27 = vrot.slane %v4229_v17, %v4211_v15  ;;  %v4261_v28 = vrot.slane %v4229_v17, %v4214_v16 }
  0x30   : > { %1435 = vrot.lane.b32.xlu1 %v3994_v22, %s6179_s28  ;;  %1269 = vrot.lane.b32.xlu0 %v4018_v29, %s6175_s27  ;;  %s6177_s27 = smov 1   ;;  %v1234_v1 = vcombine.low %v1233_v61, %v1233_v61  ;;  %6326 = vst [vmem:[#allocation5_spill] sm:$0xff] %v4241_v23  ;;  %6327 = vst [vmem:[#allocation6_spill] sm:$0xff] %v4245_v25  ;;  %v4269_v33 = vrot.slane %v4223_v0, %v4234_v20  ;;  %v4313_v55 = vsub.s32 5, %v3953_v3 }
  0x31   : > { %6328 = vst [vmem:[#allocation7_spill] sm:$0xff] %v4257_v27  ;;  %6329 = vst [vmem:[#allocation8_spill] sm:$0xff] %v4261_v28  ;;  %v4276_v36 = vrot.slane %v4223_v0, %v4237_v21  ;;  %v4310_v54 = vrot.slane %v4229_v17, %v4237_v21 }
  0x32   : > { %6330 = vst [vmem:[#allocation9_spill] sm:$0xff] %v4269_v33 }
  0x33   : > { %6331 = vst [vmem:[#allocation10_spill] sm:$0xff] %v4276_v36  ;;  %6333 = vst [vmem:[#allocation12_spill] sm:$0xff] %v4310_v54 }
  0x34   : > { %1352 = vrot.lane.b32.xlu1 %v4018_v29, %s6181_s8  ;;  %1433 = vrot.lane.b32.xlu0 %v4018_v29, %s6179_s28  ;;  %s6314_s8 = smov 16  }
  0x38   : > { %1516 = vrot.lane.b32.xlu1 %v3994_v22, %s6177_s27  ;;  %1514 = vrot.lane.b32.xlu0 %v4018_v29, %s6177_s27 }
  0x3c   : > { %1532 = vrot.lane.b32.xlu1 %v4006_v24, %s6177_s27  ;;  %1451 = vrot.lane.b32.xlu0 %v4006_v24, %s6179_s28  ;;  %s6311_s27 = sld [smem:[#allocation73_spill]] }
  0x40   : > { %1599 = vrot.lane.b32.xlu1 %v4051_v39, %s6183_s0  ;;  %1597 = vrot.lane.b32.xlu0 %v3994_v22, %s6183_s0 }
  0x42   : > { %s1035_s28 = scalar_lea.vmem %s6311_s27, %s3955_s6  ;;  %s6318_s27 = smov 1  }
  0x43   : > { %v1185_v43 = vld [vmem:[%s1035_s28] sm:$0x77]  ;;  %s1080_s28 = scalar_lea.vmem %s6166_s20, %s3955_s6 }
  0x44   : > { %1678 = vrot.lane.b32.xlu1 %v3994_v22, %s6227_s26  ;;  %1595 = vrot.lane.b32.xlu0 %v4018_v29, %s6183_s0  ;;  %s6312_s0 = scalar_lea.vmem %s6307_s3, %s3957_s30  ;;  %v1189_v45 = vcombine.high %v1185_v43, %v1185_v43  ;;  %v1209_v50 = vsel %vm1151_vm0, %v1185_v43, %v1193_v47  ;;  %s6320_s30 = smov 127  }
  0x45   : > { %v3781_v41 = vld [vmem:[%s6312_s0] ss:$0 sps:$4 sm:$0xff]   ;;  %s1055_s0 = scalar_lea.vmem %s6157_s11, %s3955_s6  ;;  %s1085_s3 = scalar_lea.vmem %s6167_s21, %s3955_s6 }
  0x46   : > { %v1205_v44 = vrot.slane %v3781_v41, %v3968_v5  ;;  %v1210_v49 = vsel %vm1151_vm0, %v1189_v45, %v1194_v46  ;;  %v1214_v60 = vld [vmem:[%s1055_s0] sm:$0x77] }
  0x47   : > { %v1221_v62 = vrot.slane %v1214_v60, 5  ;;  %v1220_v5 = vcombine.high %v1214_v60, %v1214_v60 }
  0x48   : > { %1759 = vrot.lane.b32.xlu1 %v3994_v22, %s6187_s7  ;;  %1680 = vrot.lane.b32.xlu0 %v4051_v39, %s6227_s26  ;;  %v1206_v48 = vcombine.low %v1205_v44, %v1205_v44  ;;  %v4094_v52 = vsel %vm1154_vm1, %v1210_v49, %v1205_v44  ;;  %v4300_v49 = vrot.slane %v4229_v17, %v4234_v20 }
  0x49   : > { %v1222_v7 = vrot.slane %v1220_v5, 5 }
  0x4a   : > { %v4097_v53 = vsel %vm1154_vm1, %v1209_v50, %v1206_v48  ;;  %6332 = vst [vmem:[#allocation11_spill] sm:$0xff] %v4300_v49 }
  0x4c   : > { %1676 = vrot.lane.b32.xlu1 %v4018_v29, %s6227_s26  ;;  %1761 = vrot.lane.b32.xlu0 %v4051_v39, %s6187_s7 }
  0x50   : > { %1840 = vrot.lane.b32.xlu1 %v3994_v22, %s6185_s1  ;;  %1757 = vrot.lane.b32.xlu0 %v4018_v29, %s6187_s7  ;;  %s1050_s7 = scalar_lea.vmem %s6317_s10, %s3955_s6  ;;  %s1100_s10 = scalar_lea.vmem %s6170_s24, %s3955_s6 }
  0x51   : > { %v1213_v63 = vld [vmem:[%s1050_s7] sm:$0x77]  ;;  %s6321_s7 = smov 112  }
  0x52   : > { %v1237_v2 = vsel %vm1151_vm0, %v1213_v63, %v1221_v62  ;;  %v1217_v6 = vcombine.high %v1213_v63, %v1213_v63 }
  0x53   : > { %v4145_v4 = vsel %vm1154_vm1, %v1237_v2, %v1234_v1  ;;  %v4334_v2 = vrot.slane %v4223_v0, %v4313_v55 }
  0x54   : > { %1838 = vrot.lane.b32.xlu1 %v4018_v29, %s6185_s1  ;;  %1842 = vrot.lane.b32.xlu0 %v4051_v39, %s6185_s1  ;;  %6319 = vst [vmem:[#allocation3_spill] sm:$0xff] %v4145_v4  ;;  %s6322_s1 = smov 111   ;;  %v1238_v8 = vsel %vm1151_vm0, %v1217_v6, %v1222_v7 }
  0x55   : > { %v4177_v9 = vsel %vm1154_vm1, %v1238_v8, %v1233_v61  ;;  %6334 = vst [vmem:[#allocation13_spill] sm:$0xff] %v4334_v2 }
  0x56   : > { %6323 = vst [vmem:[#allocation4_spill] sm:$0xff] %v4177_v9 }
  0x58   : > { %1279 = vrot.lane.b32.xlu1 %v4094_v52, %s6313_s13  ;;  %1277 = vrot.lane.b32.xlu0 %v4097_v53, %s6313_s13 }
  0x5c   : > { %1362 = vrot.lane.b32.xlu1 %v4094_v52, %s6314_s8  ;;  %1360 = vrot.lane.b32.xlu0 %v4097_v53, %s6314_s8 }
  0x60   : > { %1358 = vrot.lane.b32.xlu1 %v4111_v58, %s6314_s8  ;;  %1275 = vrot.lane.b32.xlu0 %v4111_v58, %s6313_s13 }
  0x64   : > { %1443 = vrot.lane.b32.xlu1 %v4094_v52, %s6316_s4  ;;  %1441 = vrot.lane.b32.xlu0 %v4097_v53, %s6316_s4 }
  0x68   : > { %1524 = vrot.lane.b32.xlu1 %v4094_v52, %s6318_s27  ;;  %1522 = vrot.lane.b32.xlu0 %v4097_v53, %s6318_s27 }
  0x6c   : > { %1520 = vrot.lane.b32.xlu1 %v4111_v58, %s6318_s27  ;;  %1439 = vrot.lane.b32.xlu0 %v4111_v58, %s6316_s4 }
  0x70   : > { %1607 = vrot.lane.b32.xlu1 %v4145_v4, %s6320_s30  ;;  %1605 = vrot.lane.b32.xlu0 %v4094_v52, %s6320_s30 }
  0x74   : > { %1686 = vrot.lane.b32.xlu1 %v4094_v52, %s6227_s26  ;;  %1603 = vrot.lane.b32.xlu0 %v4097_v53, %s6320_s30 }
  0x78   : > { %1767 = vrot.lane.b32.xlu1 %v4094_v52, %s6321_s7  ;;  %1688 = vrot.lane.b32.xlu0 %v4145_v4, %s6227_s26 }
  0x7c   : > { %1684 = vrot.lane.b32.xlu1 %v4097_v53, %s6227_s26  ;;  %1769 = vrot.lane.b32.xlu0 %v4145_v4, %s6321_s7 }
  0x80   : > { %1848 = vrot.lane.b32.xlu1 %v4094_v52, %s6322_s1  ;;  %1765 = vrot.lane.b32.xlu0 %v4097_v53, %s6321_s7 }
  0x84   : > { %1846 = vrot.lane.b32.xlu1 %v4097_v53, %s6322_s1  ;;  %1850 = vrot.lane.b32.xlu0 %v4145_v4, %s6322_s1 }
  0x88   : > { %1368 = vrot.lane.b32.xlu1 %v4022_v31, %s6314_s8  ;;  %1285 = vrot.lane.b32.xlu0 %v4022_v31, %s6313_s13 }
  0x8c   : > { %1366 = vrot.lane.b32.xlu1 %v4177_v9, %s6314_s8  ;;  %1283 = vrot.lane.b32.xlu0 %v4177_v9, %s6313_s13 }
  0x90   : > { %1530 = vrot.lane.b32.xlu1 %v4022_v31, %s6318_s27  ;;  %1449 = vrot.lane.b32.xlu0 %v4022_v31, %s6316_s4 }
  0x94   : > { %1528 = vrot.lane.b32.xlu1 %v4177_v9, %s6318_s27  ;;  %1447 = vrot.lane.b32.xlu0 %v4177_v9, %s6316_s4 }
  0x98   : > { %1356 = vrot.lane.b32.xlu1 %v4051_v39, %s6314_s8  ;;  %1273 = vrot.lane.b32.xlu0 %v4051_v39, %s6313_s13 }
  0x9a   : > { %v4195_v10 = vpop.permute.xlu1 %1354  ;;  %v4197_v11 = vpop.permute.xlu0 %1271 }
  0x9c   : > { %1611 = vrot.lane.b32.xlu1 %v4022_v31, %s6320_s30  ;;  %1613 = vrot.lane.b32.xlu0 %v4006_v24, %s6320_s30 }
  0x9e   : > { %v4206_v13 = vpop.permute.xlu1 %1370  ;;  %v4208_v14 = vpop.permute.xlu0 %1287 }
  0xa0   : > { %1518 = vrot.lane.b32.xlu1 %v4051_v39, %s6318_s27  ;;  %1437 = vrot.lane.b32.xlu0 %v4051_v39, %s6316_s4 }
  0xa2   : > { %v4231_v18 = vpop.permute.xlu1 %1435  ;;  %v1270_v19 = vpop.permute.xlu0 %1269 }
  0xa3   : > { %v1300_v26 = vsel %vm1291_vm2, %v1270_v19, %v4197_v11  ;;  %v1301_v30 = vsel %vm1291_vm2, %v4208_v14, %v1270_v19 }
  0xa4   : > { %1775 = vrot.lane.b32.xlu1 %v4006_v24, %s6321_s7  ;;  %1694 = vrot.lane.b32.xlu0 %v4006_v24, %s6227_s26  ;;  %v1343_v37 = vmul.f32 %v4241_v23, %v1300_v26  ;;  %v1342_v41 = vmul.f32 %v4257_v27, %v1301_v30  ;;  %v4348_v26 = vrot.slane %v4229_v17, %v4313_v55 }
  0xa6   : > { %v1353_v32 = vpop.permute.xlu1 %1352  ;;  %v1434_v34 = vpop.permute.xlu0 %1433  ;;  %6335 = vst [vmem:[#allocation14_spill] sm:$0xff] %v4348_v26 }
  0xa7   : > { %v1382_v35 = vsel %vm1372_vm3, %v4206_v13, %v1353_v32  ;;  %v1381_v38 = vsel %vm1372_vm3, %v1353_v32, %v4195_v10  ;;  %v1462_v43 = vsel %vm1453_vm4, %v1434_v34, %v4231_v18 }
  0xa8   : > { %1773 = vrot.lane.b32.xlu1 %v4022_v31, %s6321_s7  ;;  %1692 = vrot.lane.b32.xlu0 %v4022_v31, %s6227_s26  ;;  %v1424_v40 = vmul.f32 %v4245_v25, %v1381_v38  ;;  %v1423_v42 = vmul.f32 %v4261_v28, %v1382_v35  ;;  %v1505_v50 = vmul.f32 %v4269_v33, %v1462_v43  ;;  %v4362_v38 = vsub.s32 6, %v3953_v3 }
  0xaa   : > { %v4293_v44 = vpop.permute.xlu1 %1516  ;;  %v1515_v45 = vpop.permute.xlu0 %1514  ;;  %v1920_v46 = vpack.c.bf16 %v1424_v40, %v1343_v37  ;;  %v1919_v47 = vpack.c.bf16 %v1423_v42, %v1342_v41  ;;  %v4365_v40 = vsub.s32 7, %v3953_v3  ;;  %v4374_v43 = vrot.slane %v4223_v0, %v4362_v38 }
  0xab   : > { %v1543_v48 = vsel %vm1534_vm5, %v1515_v45, %v4293_v44 }
  0xac   : > { %v1586_v51 = vmul.f32 %v4276_v36, %v1543_v48  ;;  %1854 = vrot.lane.b32.xlu1 %v4022_v31, %s6322_s1  ;;  %1856 = vrot.lane.b32.xlu0 %v4006_v24, %s6322_s1  ;;  %6336 = vst [vmem:[#allocation15_spill] sm:$0xff] %v4374_v43  ;;  %v4382_v3 = vrot.slane %v4223_v0, %v4365_v40 }
  0xad   : > { %2008 = vmatprep.subr.bf16.mxu0 %v1920_v46 }
  0xae   : > { %2009 = vmatpush1.bf16.msra.mxu0 %v1919_v47  ;;  %v4315_v57 = vpop.permute.xlu1 %1532  ;;  %v4317_v59 = vpop.permute.xlu0 %1451  ;;  %v1930_v60 = vpack.c.bf16 %v1586_v51, %v1505_v50  ;;  %6337 = vst [vmem:[#allocation16_spill] sm:$0xff] %v4382_v3  ;;  %v4393_v47 = vrot.slane %v4229_v17, %v4362_v38  ;;  %v4406_v51 = vrot.slane %v4229_v17, %v4365_v40 }
  0xaf   : > { %v1544_v61 = vsel %vm1534_vm5, %v4315_v57, %v1515_v45  ;;  %v1463_v62 = vsel %vm1453_vm4, %v4317_v59, %v1434_v34 }
  0xb0   : > { %v1585_v63 = vmul.f32 %v4310_v54, %v1544_v61  ;;  %v1504_v1 = vmul.f32 %v4300_v49, %v1463_v62  ;;  %1682 = vrot.lane.b32.xlu1 %v4111_v58, %s6227_s26  ;;  %1601 = vrot.lane.b32.xlu0 %v4111_v58, %s6320_s30  ;;  %6338 = vst [vmem:[#allocation17_spill] sm:$0xff] %v4393_v47  ;;  %6339 = vst [vmem:[#allocation18_spill] sm:$0xff] %v4406_v51 }
  0xb1   : > { %2010 = vmatprep.subr.bf16.mxu0 %v1930_v60 }
  0xb2   : > { %v4336_v5 = vpop.permute.xlu1 %1599  ;;  %v1598_v6 = vpop.permute.xlu0 %1597  ;;  %v1929_v7 = vpack.c.bf16 %v1585_v63, %v1504_v1 }
  0xb3   : > { %v1623_v8 = vsel %vm1615_vm6, %v1598_v6, %v4336_v5 }
  0xb4   : > { %v1667_v19 = vmul.f32 %v4334_v2, %v1623_v8  ;;  %1844 = vrot.lane.b32.xlu1 %v4111_v58, %s6322_s1  ;;  %1763 = vrot.lane.b32.xlu0 %v4111_v58, %s6321_s7  ;;  %v3707_v8 = vld [vmem:[%s6325_s5 + $0x58] ss:$0 sm:$0xff] }
  0xb5   : > { %2011 = vmatpush1.bf16.msra.mxu0 %v1929_v7  ;;  %v3706_v7 = vld [vmem:[%s6325_s5 + $0x50] ss:$0 sm:$0xff] }
  0xb6   : > { %v1679_v30 = vpop.permute.xlu1 %1678  ;;  %v4350_v32 = vpop.permute.xlu0 %1595  ;;  %v1940_v34 = vpack.c.bf16 %v1667_v19, %v3994_v22 }
  0xb7   : > { %v1624_v35 = vsel %vm1615_vm6, %v4350_v32, %v1598_v6 }
  0xb8   : > { %v1666_v37 = vmul.f32 %v4348_v26, %v1624_v35  ;;  %1364 = vrot.lane.b32.xlu1 %v4145_v4, %s6314_s8  ;;  %1281 = vrot.lane.b32.xlu0 %v4145_v4, %s6313_s13  ;;  %v6189_v35 = vmov 65535  }
  0xb9   : > { %2012 = vmatprep.subr.bf16.mxu0 %v1940_v34 }
  0xba   : > { %v1760_v22 = vpop.permute.xlu1 %1759  ;;  %v4368_v41 = vpop.permute.xlu0 %1680  ;;  %v1939_v42 = vpack.c.bf16 %v1666_v37, %v4018_v29  ;;  %v1976_v37 = vsel %vm1974_vm9, 4294967295, %v6189_v35 }
  0xbb   : > { %v1704_v29 = vsel %vm1696_vm7, %v1679_v30, %v4368_v41 }
  0xbc   : > { %1526 = vrot.lane.b32.xlu1 %v4145_v4, %s6318_s27  ;;  %1445 = vrot.lane.b32.xlu0 %v4145_v4, %s6316_s4  ;;  %v1748_v0 = vmul.f32 %v4374_v43, %v1704_v29 }
  0xbd   : > { %2013 = vmatpush1.bf16.msra.mxu0 %v1939_v42 }
  0xbe   : > { %v4387_v45 = vpop.permute.xlu1 %1676  ;;  %v4389_v46 = vpop.permute.xlu0 %1761 }
  0xbf   : > { %v1785_v48 = vsel %vm1777_vm8, %v1760_v22, %v4389_v46  ;;  %v1705_v60 = vsel %vm1696_vm7, %v4387_v45, %v1679_v30 }
  0xc0   : > { %v1829_v50 = vmul.f32 %v4382_v3, %v1785_v48  ;;  %1690 = vrot.lane.b32.xlu1 %v4177_v9, %s6227_s26  ;;  %1609 = vrot.lane.b32.xlu0 %v4177_v9, %s6320_s30  ;;  %v1747_v6 = vmul.f32 %v4393_v47, %v1705_v60  ;;  %s1090_s26 = scalar_lea.vmem %s6168_s22, %s3955_s6 }
  0xc2   : > { %v1841_v61 = vpop.permute.xlu1 %1840  ;;  %v4411_v62 = vpop.permute.xlu0 %1757  ;;  %v1950_v63 = vpack.c.bf16 %v1829_v50, %v1748_v0  ;;  %v4444_v0 = vld [vmem:[%s6325_s5 + $0x28] sm:$0xff]  ;;  %v4446_v50 = vsel %vm1975_vm11, %v1976_v37, 0 }
  0xc3   : > { %v1786_v1 = vsel %vm1777_vm8, %v4411_v62, %v1760_v22  ;;  %v4509_v3 = vrot.slane %v4444_v0, %v4234_v20 }
  0xc4   : > { %v1828_v17 = vmul.f32 %v4406_v51, %v1786_v1  ;;  %1852 = vrot.lane.b32.xlu1 %v4177_v9, %s6322_s1  ;;  %1771 = vrot.lane.b32.xlu0 %v4177_v9, %s6321_s7  ;;  %v6190_v1 = vmov 1.0  }
  0xc5   : > { %2014 = vmatprep.subr.bf16.mxu0 %v1950_v63  ;;  %6346 = vst [vmem:[#allocation24_spill] sm:$0xff] %v4509_v3 }
  0xc6   : > { %v4429_v19 = vpop.permute.xlu1 %1838  ;;  %v4431_v30 = vpop.permute.xlu0 %1842  ;;  %v1949_v34 = vpack.c.bf16 %v1828_v17, %v1747_v6 }
  0xc7   : > { %v1867_v22 = vsel %vm1858_vm10, %v4429_v19, %v1841_v61  ;;  %v1866_v42 = vsel %vm1858_vm10, %v1841_v61, %v4431_v30  ;;  %v4454_v61 = vrot.slane %v4444_v0, %v4211_v15 }
  0xc8   : > { %v1909_v29 = vmul.f32 %v3706_v7, %v1867_v22  ;;  %v1910_v48 = vmul.f32 %v3707_v8, %v1866_v42  ;;  %2015 = vmatpush1.bf16.msra.mxu0 %v1949_v34  ;;  %v4459_v8 = vrot.slane %v4444_v0, %v4214_v16  ;;  %v4468_v22 = vld [vmem:[%s6325_s5 + $0x20] sm:$0xff] }
  0xc9   : > { %6340 = vst [vmem:[#allocation19_spill] sm:$0xff] %v4454_v61 }
  0xca   : > { %v4448_v60 = vpop.permute.xlu1 %1279  ;;  %v1278_v63 = vpop.permute.xlu0 %1277  ;;  %v1960_v6 = vpack.c.bf16 %v6190_v1, %v1910_v48  ;;  %v1959_v17 = vpack.c.bf16 %v6190_v1, %v1909_v29  ;;  %6341 = vst [vmem:[#allocation20_spill] sm:$0xff] %v4459_v8  ;;  %v4484_v1 = vrot.slane %v4468_v22, %v4214_v16 }
  0xcb   : > { %v1296_v37 = vsel %vm1291_vm2, %v1278_v63, %v4448_v60 }
  0xcc   : > { %v1982_v7 = vand.u32 %v4446_v50, %v1960_v6  ;;  %v1979_v34 = vand.u32 %v4446_v50, %v1959_v17  ;;  %v4478_v6 = vld [vmem:[%s6162_s16] sm:$0xf]  ;;  %v1347_v17 = vmul.f32 %v4454_v61, %v1296_v37  ;;  %6342 = vst [vmem:[#allocation21_spill] sm:$0xff] %v4484_v1  ;;  %v6344_v61 = vmov 0  }
  0xce   : > { %v4470_v42 = vpop.permute.xlu1 %1362  ;;  %2016 = vmatprep.subr.bf16.mxu0 %v1982_v7  ;;  %v1361_v29 = vpop.permute.xlu0 %1360  ;;  %v4488_v7 = vrot.slane %v4468_v22, %v4211_v15 }
  0xcf   : > { %v1377_v48 = vsel %vm1372_vm3, %v1361_v29, %v4470_v42  ;;  %2017 = vmatpush1.bf16.msra.mxu0 %v1979_v34 }
  0xd0   : > { %v1428_v35 = vmul.f32 %v4459_v8, %v1377_v48  ;;  %6343 = vst [vmem:[#allocation22_spill] sm:$0xff] %v4488_v7 }
  0xd2   : > { %v4490_v56 = vpop.permute.xlu1 %1358  ;;  %v4492_v34 = vpop.permute.xlu0 %1275  ;;  %v1924_v47 = vpack.c.bf16 %v1428_v35, %v1347_v17  ;;  %3716 = vmatmul.mubr.msk.bf16.vlgmr.msra.gmra.mrb[0].mxu0 %vm1970_vm12, %v4478_v6 }
  0xd3   : > { %v1378_v37 = vsel %vm1372_vm3, %v4490_v56, %v1361_v29  ;;  %v1297_v48 = vsel %vm1291_vm2, %v4492_v34, %v1278_v63  ;;  %2122 = vmatprep.mubr.bf16.mxu0 %v6344_v61  ;;  %v4513_v29 = vrot.slane %v4444_v0, %v4237_v21 }
  0xd4   : > { %v1427_v8 = vmul.f32 %v4484_v1, %v1378_v37  ;;  %v1346_v51 = vmul.f32 %v4488_v7, %v1297_v48  ;;  %2090 = vmatprep.subr.bf16.mxu0 %v1924_v47  ;;  %v4531_v7 = vrot.slane %v4468_v22, %v4234_v20 }
  0xd5   : > { %6347 = vst [vmem:[#allocation25_spill] sm:$0xff] %v4513_v29 }
  0xd6   : > { %v1923_v43 = vpack.c.bf16 %v1427_v8, %v1346_v51  ;;  %v4505_v35 = vpop.permute.xlu1 %1443  ;;  %v1442_v17 = vpop.permute.xlu0 %1441  ;;  %6350 = vst [vmem:[#allocation28_spill] sm:$0xff] %v4531_v7 }
  0xd7   : > { %6345 = vst [vmem:[#allocation23_spill] sm:$0xff] %v4505_v35  ;;  %v1458_v63 = vsel %vm1453_vm4, %v1442_v17, %v4505_v35 }
  0xd8   : > { %2091 = vmatpush1.bf16.msra.mxu0 %v1923_v43  ;;  %v1509_v8 = vmul.f32 %v4509_v3, %v1458_v63  ;;  %v4527_v43 = vrot.slane %v4468_v22, %v4237_v21 }
  0xda   : > { %v4518_v37 = vpop.permute.xlu1 %1524  ;;  %v1523_v47 = vpop.permute.xlu0 %1522  ;;  %6349 = vst [vmem:[#allocation27_spill] sm:$0xff] %v4527_v43 }
  0xdb   : > { %6348 = vst [vmem:[#allocation26_spill] sm:$0xff] %v4518_v37  ;;  %v1539_v51 = vsel %vm1534_vm5, %v1523_v47, %v4518_v37 }
  0xdc   : > { %v1590_v48 = vmul.f32 %v4513_v29, %v1539_v51  ;;  %v4547_v29 = vrot.slane %v4444_v0, %v4313_v55 }
  0xde   : > { %v4533_v1 = vpop.permute.xlu1 %1520  ;;  %v4535_v26 = vpop.permute.xlu0 %1439  ;;  %v1934_v54 = vpack.c.bf16 %v1590_v48, %v1509_v8  ;;  %6351 = vst [vmem:[#allocation29_spill] sm:$0xff] %v4547_v29 }
  0xdf   : > { %v1540_v49 = vsel %vm1534_vm5, %v4533_v1, %v1523_v47  ;;  %v1459_v63 = vsel %vm1453_vm4, %v4535_v26, %v1442_v17 }
  0xe0   : > { %v1589_v51 = vmul.f32 %v4527_v43, %v1540_v49  ;;  %v1508_v3 = vmul.f32 %v4531_v7, %v1459_v63  ;;  %2092 = vmatprep.subr.bf16.mxu0 %v1934_v54  ;;  %v4557_v49 = vrot.slane %v4468_v22, %v4313_v55 }
  0xe2   : > { %v1933_v2 = vpack.c.bf16 %v1589_v51, %v1508_v3  ;;  %v4549_v28 = vpop.permute.xlu1 %1607  ;;  %v1606_v8 = vpop.permute.xlu0 %1605  ;;  %6353 = vst [vmem:[#allocation31_spill] sm:$0xff] %v4557_v49 }
  0xe3   : > { %6352 = vst [vmem:[#allocation30_spill] sm:$0xff] %v4549_v28  ;;  %v1619_v47 = vsel %vm1615_vm6, %v1606_v8, %v4549_v28 }
  0xe4   : > { %v1671_v48 = vmul.f32 %v4547_v29, %v1619_v47  ;;  %2093 = vmatpush1.bf16.msra.mxu0 %v1933_v2  ;;  %v4571_v29 = vrot.slane %v4444_v0, %v4362_v38 }
  0xe6   : > { %v1687_v54 = vpop.permute.xlu1 %1686  ;;  %v4559_v17 = vpop.permute.xlu0 %1603  ;;  %v1944_v63 = vpack.c.bf16 %v1671_v48, %v4094_v52  ;;  %6355 = vst [vmem:[#allocation33_spill] sm:$0xff] %v4571_v29  ;;  %v4575_v52 = vrot.slane %v4444_v0, %v4365_v40 }
  0xe7   : > { %v1620_v3 = vsel %vm1615_vm6, %v4559_v17, %v1606_v8 }
  0xe8   : > { %v1670_v51 = vmul.f32 %v4557_v49, %v1620_v3  ;;  %2094 = vmatprep.subr.bf16.mxu0 %v1944_v63  ;;  %6356 = vst [vmem:[#allocation34_spill] sm:$0xff] %v4575_v52 }
  0xea   : > { %v1943_v7 = vpack.c.bf16 %v1670_v51, %v4097_v53  ;;  %v1768_v47 = vpop.permute.xlu1 %1767  ;;  %v4567_v2 = vpop.permute.xlu0 %1688  ;;  %v4595_v51 = vrot.slane %v4468_v22, %v4365_v40 }
  0xeb   : > { %6354 = vst [vmem:[#allocation32_spill] sm:$0xff] %v4567_v2  ;;  %v1700_v8 = vsel %vm1696_vm7, %v1687_v54, %v4567_v2 }
  0xec   : > { %2095 = vmatpush1.bf16.msra.mxu0 %v1943_v7  ;;  %v1752_v3 = vmul.f32 %v4571_v29, %v1700_v8  ;;  %v4590_v7 = vrot.slane %v4468_v22, %v4362_v38  ;;  %6359 = vst [vmem:[#allocation37_spill] sm:$0xff] %v4595_v51  ;;  %v3710_v22 = vld [vmem:[%s6325_s5 + $0x70] ss:$0 sm:$0xff] }
  0xee   : > { %v4580_v48 = vpop.permute.xlu1 %1684  ;;  %v4582_v63 = vpop.permute.xlu0 %1769  ;;  %6358 = vst [vmem:[#allocation36_spill] sm:$0xff] %v4590_v7 }
  0xef   : > { %6357 = vst [vmem:[#allocation35_spill] sm:$0xff] %v4582_v63  ;;  %v1781_v53 = vsel %vm1777_vm8, %v1768_v47, %v4582_v63  ;;  %v1701_v49 = vsel %vm1696_vm7, %v4580_v48, %v1687_v54  ;;  %v3711_v54 = vld [vmem:[%s6325_s5 + $0x78] ss:$0 sm:$0xff] }
  0xf0   : > { %v1833_v0 = vmul.f32 %v4575_v52, %v1781_v53  ;;  %v1751_v29 = vmul.f32 %v4590_v7, %v1701_v49  ;;  %v6363_v7 = vmov 1.0  }
  0xf2   : > { %v1849_v43 = vpop.permute.xlu1 %1848  ;;  %v4600_v27 = vpop.permute.xlu0 %1765  ;;  %v1954_v33 = vpack.c.bf16 %v1833_v0, %v1752_v3  ;;  %v4616_v3 = vld [vmem:[%s6325_s5 + $0x48] sm:$0xff] }
  0xf3   : > { %v1782_v8 = vsel %vm1777_vm8, %v4600_v27, %v1768_v47 }
  0xf4   : > { %v1832_v53 = vmul.f32 %v4595_v51, %v1782_v8  ;;  %2096 = vmatprep.subr.bf16.mxu0 %v1954_v33  ;;  %v4630_v51 = vrot.slane %v4616_v3, %v4214_v16 }
  0xf6   : > { %v1953_v0 = vpack.c.bf16 %v1832_v53, %v1751_v29  ;;  %v4618_v47 = vpop.permute.xlu1 %1846  ;;  %v4620_v49 = vpop.permute.xlu0 %1850  ;;  %6361 = vst [vmem:[#allocation39_spill] sm:$0xff] %v4630_v51  ;;  %v4634_v29 = vrot.slane %v4616_v3, %v4211_v15  ;;  %v4639_v53 = vld [vmem:[%s6325_s5 + $0x40] sm:$0xff] }
  0xf7   : > { %6360 = vst [vmem:[#allocation38_spill] sm:$0xff] %v4620_v49  ;;  %v1863_v33 = vsel %vm1858_vm10, %v4618_v47, %v1849_v43  ;;  %v1862_v8 = vsel %vm1858_vm10, %v1849_v43, %v4620_v49  ;;  %v4740_v9 = vrot.slane %v4639_v53, %v4313_v55 }
  0xf8   : > { %v1913_v52 = vmul.f32 %v3710_v22, %v1863_v33  ;;  %v1914_v36 = vmul.f32 %v3711_v54, %v1862_v8  ;;  %2097 = vmatpush1.bf16.msra.mxu0 %v1953_v0  ;;  %6362 = vst [vmem:[#allocation40_spill] sm:$0xff] %v4634_v29  ;;  %v4651_v33 = vrot.slane %v4639_v53, %v4214_v16 }
  0xf9   : > { %v4655_v8 = vrot.slane %v4639_v53, %v4211_v15  ;;  %6371 = vst [vmem:[#allocation48_spill] sm:$0xff] %v4740_v9 }
  0xfa   : > { %v1963_v25 = vpack.c.bf16 %v6363_v7, %v1913_v52  ;;  %v1369_v23 = vpop.permute.xlu1 %1368  ;;  %v1286_v43 = vpop.permute.xlu0 %1285  ;;  %v1964_v22 = vpack.c.bf16 %v6363_v7, %v1914_v36  ;;  %6364 = vst [vmem:[#allocation41_spill] sm:$0xff] %v4651_v33 }
  0xfb   : > { %v1373_v54 = vsel %vm1372_vm3, %v1369_v23, %v4206_v13  ;;  %v1292_v0 = vsel %vm1291_vm2, %v1286_v43, %v4208_v14  ;;  %6365 = vst [vmem:[#allocation42_spill] sm:$0xff] %v4655_v8 }
  0xfc   : > { %v1432_v52 = vmul.f32 %v4630_v51, %v1373_v54  ;;  %v1351_v36 = vmul.f32 %v4634_v29, %v1292_v0  ;;  %v1994_v4 = vand.u32 %v4446_v50, %v1964_v22  ;;  %v1991_v13 = vand.u32 %v4446_v50, %v1963_v25 }
  0xfd   : > { %v4679_v25 = vrot.slane %v4616_v3, %v4234_v20 }
  0xfe   : > { %v4661_v2 = vpop.permute.xlu1 %1366  ;;  %2098 = vmatprep.subr.bf16.mxu0 %v1994_v4  ;;  %v4663_v14 = vpop.permute.xlu0 %1283  ;;  %v1928_v63 = vpack.c.bf16 %v1432_v52, %v1351_v36  ;;  %v4675_v4 = vrot.slane %v4616_v3, %v4237_v21 }
  0xff   : > { %v1374_v49 = vsel %vm1372_vm3, %v4661_v2, %v1369_v23  ;;  %v1293_v54 = vsel %vm1291_vm2, %v4663_v14, %v1286_v43  ;;  %2099 = vmatpush1.bf16.msra.mxu0 %v1991_v13  ;;  %6367 = vst [vmem:[#allocation44_spill] sm:$0xff] %v4679_v25 }
 0x100   : > { %v1431_v0 = vmul.f32 %v4651_v33, %v1374_v49  ;;  %v1350_v22 = vmul.f32 %v4655_v8, %v1293_v54  ;;  %2172 = vmatprep.subr.bf16.mxu0 %v1928_v63  ;;  %6366 = vst [vmem:[#allocation43_spill] sm:$0xff] %v4675_v4  ;;  %v4694_v54 = vrot.slane %v4639_v53, %v4237_v21 }
 0x102   : > { %v1927_v52 = vpack.c.bf16 %v1431_v0, %v1350_v22  ;;  %v1531_v23 = vpop.permute.xlu1 %1530  ;;  %v1450_v36 = vpop.permute.xlu0 %1449  ;;  %3718 = vmatmul.mubr.msk.bf16.vlgmr.msra.gmra.mrb[4].mxu0 %vm1970_vm12, %v4478_v6  ;;  %6368 = vst [vmem:[#allocation45_spill] sm:$0xff] %v4694_v54  ;;  %v4698_v0 = vrot.slane %v4639_v53, %v4234_v20 }
 0x103   : > { %v1535_v49 = vsel %vm1534_vm5, %v1531_v23, %v4315_v57  ;;  %v1454_v63 = vsel %vm1453_vm4, %v1450_v36, %v4317_v59  ;;  %2204 = vmatprep.mubr.bf16.mxu0 %v6344_v61  ;;  %v4703_v57 = vld [vmem:[%s6325_s5 + $0x18] sm:$0xff]  ;;  %v4708_v59 = vld [vmem:[%s6325_s5 + $0x10] sm:$0xff] }
 0x104   : > { %v1594_v43 = vmul.f32 %v4675_v4, %v1535_v49  ;;  %v1513_v13 = vmul.f32 %v4679_v25, %v1454_v63  ;;  %2173 = vmatpush1.bf16.msra.mxu0 %v1927_v52  ;;  %6369 = vst [vmem:[#allocation46_spill] sm:$0xff] %v4698_v0  ;;  %v4722_v4 = vrot.slane %v4703_v57, %v4211_v15 }
 0x105   : > { %v4726_v8 = vrot.slane %v4703_v57, %v4214_v16 }
 0x106   : > { %v4710_v22 = vpop.permute.xlu1 %1528  ;;  %v4712_v52 = vpop.permute.xlu0 %1447  ;;  %v1938_v49 = vpack.c.bf16 %v1594_v43, %v1513_v13 }
 0x107   : > { %6370 = vst [vmem:[#allocation47_spill] sm:$0xff] %v4712_v52  ;;  %v1536_v63 = vsel %vm1534_vm5, %v4710_v22, %v1531_v23  ;;  %v1455_v25 = vsel %vm1453_vm4, %v4712_v52, %v1450_v36  ;;  %v4732_v23 = vrot.slane %v4708_v59, %v4211_v15  ;;  %v4736_v36 = vrot.slane %v4708_v59, %v4214_v16 }
 0x108   : > { %v1593_v33 = vmul.f32 %v4694_v54, %v1536_v63  ;;  %v1512_v43 = vmul.f32 %v4698_v0, %v1455_v25  ;;  %2174 = vmatprep.subr.bf16.mxu0 %v1938_v49  ;;  %v4744_v63 = vrot.slane %v4616_v3, %v4313_v55 }
 0x10a   : > { %v1937_v13 = vpack.c.bf16 %v1593_v33, %v1512_v43  ;;  %v1357_v29 = vpop.permute.xlu1 %1356  ;;  %v1274_v51 = vpop.permute.xlu0 %1273  ;;  %6372 = vst [vmem:[#allocation49_spill] sm:$0xff] %v4744_v63 }
 0x10b   : > { %v1380_v25 = vsel %vm1372_vm3, %v4195_v10, %v1357_v29  ;;  %v1299_v49 = vsel %vm1291_vm2, %v4197_v11, %v1274_v51  ;;  %v1298_v33 = vsel %vm1291_vm2, %v1274_v51, %v4492_v34  ;;  %v1379_v43 = vsel %vm1372_vm3, %v1357_v29, %v4490_v56 }
 0x10c   : > { %2175 = vmatpush1.bf16.msra.mxu0 %v1937_v13  ;;  %v1345_v54 = vmul.f32 %v4722_v4, %v1298_v33  ;;  %v1426_v0 = vmul.f32 %v4726_v8, %v1379_v43  ;;  %v1344_v28 = vmul.f32 %v4732_v23, %v1299_v49  ;;  %v1425_v10 = vmul.f32 %v4736_v36, %v1380_v25 }
 0x10d   : > { %v4772_v51 = vrot.slane %v4708_v59, %v4237_v21  ;;  %v4776_v29 = vrot.slane %v4703_v57, %v4237_v21  ;;  %v4792_v43 = vrot.slane %v4616_v3, %v4365_v40 }
 0x10e   : > { %v4762_v35 = vpop.permute.xlu1 %1611  ;;  %v1614_v11 = vpop.permute.xlu0 %1613  ;;  %v1922_v37 = vpack.c.bf16 %v1426_v0, %v1345_v54  ;;  %v1921_v52 = vpack.c.bf16 %v1425_v10, %v1344_v28  ;;  %v4782_v54 = vrot.slane %v4708_v59, %v4234_v20 }
 0x10f   : > { %v1616_v34 = vsel %vm1615_vm6, %v4762_v35, %v1614_v11  ;;  %v1625_v56 = vsel %vm1615_vm6, %v1614_v11, %v4350_v32  ;;  %v4786_v32 = vrot.slane %v4703_v57, %v4234_v20  ;;  %6373 = vst [vmem:[#allocation50_spill] sm:$0xff] %v4792_v43 }
 0x110   : > { %v1674_v13 = vmul.f32 %v4740_v9, %v1616_v34  ;;  %v1675_v28 = vmul.f32 %v4744_v63, %v1625_v56  ;;  %2049 = vmatprep.subr.bf16.mxu1 %v1922_v37  ;;  %v4796_v37 = vrot.slane %v4616_v3, %v4362_v38 }
 0x111   : > { %2050 = vmatpush1.bf16.msra.mxu1 %v1921_v52 }
 0x112   : > { %v1947_v0 = vpack.c.bf16 %v1674_v13, %v4022_v31  ;;  %v1519_v25 = vpop.permute.xlu1 %1518  ;;  %v1438_v49 = vpop.permute.xlu0 %1437  ;;  %v1948_v33 = vpack.c.bf16 %v1675_v28, %v4006_v24  ;;  %6374 = vst [vmem:[#allocation51_spill] sm:$0xff] %v4796_v37 }
 0x113   : > { %v1541_v10 = vsel %vm1534_vm5, %v1519_v25, %v4533_v1  ;;  %v1542_v31 = vsel %vm1534_vm5, %v4293_v44, %v1519_v25  ;;  %v1460_v24 = vsel %vm1453_vm4, %v1438_v49, %v4535_v26  ;;  %v1461_v52 = vsel %vm1453_vm4, %v4231_v18, %v1438_v49 }
 0x114   : > { %v1587_v11 = vmul.f32 %v4772_v51, %v1542_v31  ;;  %v1588_v3 = vmul.f32 %v4776_v29, %v1541_v10  ;;  %v1506_v34 = vmul.f32 %v4782_v54, %v1461_v52  ;;  %v1507_v1 = vmul.f32 %v4786_v32, %v1460_v24  ;;  %2176 = vmatprep.subr.bf16.mxu0 %v1948_v33 }
 0x115   : > { %2177 = vmatpush1.bf16.msra.mxu0 %v1947_v0  ;;  %v4824_v0 = vrot.slane %v4639_v53, %v4365_v40  ;;  %v4828_v33 = vrot.slane %v4639_v53, %v4362_v38  ;;  %v3714_v53 = vld [vmem:[%s6325_s5 + $0x90] ss:$0 sm:$0xff] }
 0x116   : > { %v1776_v56 = vpop.permute.xlu1 %1775  ;;  %v1695_v44 = vpop.permute.xlu0 %1694  ;;  %v1932_v13 = vpack.c.bf16 %v1588_v3, %v1507_v1  ;;  %v1931_v28 = vpack.c.bf16 %v1587_v11, %v1506_v34  ;;  %v3715_v3 = vld [vmem:[%s6325_s5 + $0x98] ss:$0 sm:$0xff] }
 0x117   : > { %v1787_v26 = vsel %vm1777_vm8, %v1776_v56, %v4411_v62  ;;  %v1706_v18 = vsel %vm1696_vm7, %v1695_v44, %v4387_v45  ;;  %6375 = vst [vmem:[#allocation52_spill] sm:$0xff] %v4824_v0  ;;  %6376 = vst [vmem:[#allocation53_spill] sm:$0xff] %v4828_v33 }
 0x118   : > { %v1837_v25 = vmul.f32 %v4792_v43, %v1787_v26  ;;  %v1756_v49 = vmul.f32 %v4796_v37, %v1706_v18  ;;  %2051 = vmatprep.subr.bf16.mxu1 %v1932_v13  ;;  %v4858_v18 = vrot.slane %v4708_v59, %v4313_v55 }
 0x119   : > { %2052 = vmatpush1.bf16.msra.mxu1 %v1931_v28 }
 0x11a   : > { %v4830_v10 = vpop.permute.xlu1 %1773  ;;  %v4832_v62 = vpop.permute.xlu0 %1692  ;;  %v1958_v31 = vpack.c.bf16 %v1837_v25, %v1756_v49  ;;  %v4862_v25 = vrot.slane %v4703_v57, %v4313_v55 }
 0x11b   : > { %v1778_v45 = vsel %vm1777_vm8, %v4830_v10, %v1776_v56  ;;  %v1697_v24 = vsel %vm1696_vm7, %v4832_v62, %v1695_v44 }
 0x11c   : > { %v1836_v52 = vmul.f32 %v4824_v0, %v1778_v45  ;;  %v1755_v11 = vmul.f32 %v4828_v33, %v1697_v24  ;;  %2178 = vmatprep.subr.bf16.mxu0 %v1958_v31  ;;  %v4867_v31 = vrot.slane %v4708_v59, %v4362_v38 }
 0x11e   : > { %v1957_v34 = vpack.c.bf16 %v1836_v52, %v1755_v11  ;;  %v4848_v1 = vpop.permute.xlu1 %1854  ;;  %v1857_v56 = vpop.permute.xlu0 %1856  ;;  %v4877_v11 = vld [vmem:[%s6325_s5 + $0x38] sm:$0xff] }
 0x11f   : > { %v1859_v44 = vsel %vm1858_vm10, %v4848_v1, %v1857_v56  ;;  %v1868_v13 = vsel %vm1858_vm10, %v1857_v56, %v4429_v19  ;;  %v4871_v19 = vrot.slane %v4703_v57, %v4362_v38 }
 0x120   : > { %v1917_v28 = vmul.f32 %v3714_v53, %v1859_v44  ;;  %v1918_v26 = vmul.f32 %v3715_v3, %v1868_v13  ;;  %2179 = vmatpush1.bf16.msra.mxu0 %v1957_v34 }
 0x122   : > { %v1967_v49 = vpack.c.bf16 %v6363_v7, %v1917_v28  ;;  %v1683_v45 = vpop.permute.xlu1 %1682  ;;  %v1602_v24 = vpop.permute.xlu0 %1601  ;;  %v1968_v52 = vpack.c.bf16 %v6363_v7, %v1918_v26  ;;  %v4895_v28 = vrot.slane %v4708_v59, %v4365_v40  ;;  %v4915_v59 = vrot.slane %v4877_v11, %v4214_v16 }
 0x123   : > { %v1702_v53 = vsel %vm1696_vm7, %v1683_v45, %v4580_v48  ;;  %v1703_v3 = vsel %vm1696_vm7, %v4368_v41, %v1683_v45  ;;  %v1621_v34 = vsel %vm1615_vm6, %v1602_v24, %v4559_v17  ;;  %v1622_v56 = vsel %vm1615_vm6, %v4336_v5, %v1602_v24  ;;  %v4904_v41 = vld [vmem:[%s6325_s5 + $0x60] ss:$0 sm:$0xff]  ;;  %v4909_v5 = vld [vmem:[%s6325_s5 + $0x68] ss:$0 sm:$0xff] }
 0x124   : > { %v1668_v44 = vmul.f32 %v4858_v18, %v1622_v56  ;;  %v1669_v13 = vmul.f32 %v4862_v25, %v1621_v34  ;;  %v4899_v48 = vrot.slane %v4703_v57, %v4365_v40  ;;  %v2006_v17 = vand.u32 %v4446_v50, %v1968_v52  ;;  %6377 = vst [vmem:[#allocation54_spill] sm:$0xff] %v4915_v59 }
 0x125   : > { %v2003_v26 = vand.u32 %v4446_v50, %v1967_v49  ;;  %v4919_v57 = vrot.slane %v4877_v11, %v4211_v15  ;;  %v1749_v45 = vmul.f32 %v4867_v31, %v1703_v3  ;;  %v1750_v24 = vmul.f32 %v4871_v19, %v1702_v53 }
 0x126   : > { %v1845_v34 = vpop.permute.xlu1 %1844  ;;  %v1764_v56 = vpop.permute.xlu0 %1763  ;;  %v1942_v37 = vpack.c.bf16 %v1669_v13, %v4111_v58  ;;  %v1941_v52 = vpack.c.bf16 %v1668_v44, %v4051_v39  ;;  %2180 = vmatprep.subr.bf16.mxu0 %v2006_v17 }
 0x127   : > { %v1864_v49 = vsel %vm1858_vm10, %v1845_v34, %v4618_v47  ;;  %v1865_v33 = vsel %vm1858_vm10, %v4431_v30, %v1845_v34  ;;  %v1783_v3 = vsel %vm1777_vm8, %v1764_v56, %v4600_v27  ;;  %v1784_v53 = vsel %vm1777_vm8, %v4389_v46, %v1764_v56  ;;  %2181 = vmatpush1.bf16.msra.mxu0 %v2003_v26  ;;  %v4944_v30 = vld [vmem:[%s6325_s5 + $0x30] sm:$0xff] }
 0x128   : > { %v1911_v58 = vmul.f32 %v4904_v41, %v1865_v33  ;;  %v1912_v39 = vmul.f32 %v4909_v5, %v1864_v49  ;;  %v1830_v44 = vmul.f32 %v4895_v28, %v1784_v53  ;;  %v1831_v47 = vmul.f32 %v4899_v48, %v1783_v3  ;;  %2053 = vmatprep.subr.bf16.mxu1 %v1942_v37 }
 0x129   : > { %2054 = vmatpush1.bf16.msra.mxu1 %v1941_v52  ;;  %v4949_v34 = vrot.slane %v4944_v30, %v4214_v16  ;;  %v4956_v56 = vrot.slane %v4944_v30, %v4211_v15  ;;  %v4979_v49 = vrot.slane %v4877_v11, %v4234_v20  ;;  %v4984_v3 = vrot.slane %v4944_v30, %v4237_v21 }
 0x12a   : > { %v1365_v27 = vpop.permute.xlu1 %1364  ;;  %v1282_v13 = vpop.permute.xlu0 %1281  ;;  %v1952_v17 = vpack.c.bf16 %v1831_v47, %v1750_v24  ;;  %v1951_v46 = vpack.c.bf16 %v1830_v44, %v1749_v45  ;;  %v1962_v33 = vpack.c.bf16 %v6363_v7, %v1912_v39  ;;  %3720 = vmatmul.mubr.msk.bf16.vlgmr.msra.gmra.mrb[8].mxu0 %vm1970_vm12, %v4478_v6  ;;  %v4967_v24 = vrot.slane %v4877_v11, %v4237_v21  ;;  %v6383_v39 = vld [vmem:[#allocation47_spill] sm:$0xff] }
 0x12b   : > { %v1375_v26 = vsel %vm1372_vm3, %v1365_v27, %v4661_v2  ;;  %6378 = vst [vmem:[#allocation55_spill] sm:$0xff] %v4956_v56  ;;  %v1294_v37 = vsel %vm1291_vm2, %v1282_v13, %v4663_v14  ;;  %v1961_v2 = vpack.c.bf16 %v6363_v7, %v1911_v58  ;;  %v1376_v15 = vsel %vm1372_vm3, %v4470_v42, %v1365_v27 }
 0x12c   : > { %v1430_v45 = vmul.f32 %v4915_v59, %v1375_v26  ;;  %v1349_v16 = vmul.f32 %v4919_v57, %v1294_v37  ;;  %2055 = vmatprep.subr.bf16.mxu1 %v1952_v17  ;;  %6379 = vst [vmem:[#allocation56_spill] sm:$0xff] %v4967_v24  ;;  %v1295_v14 = vsel %vm1291_vm2, %v4448_v60, %v1282_v13  ;;  %6380 = vst [vmem:[#allocation57_spill] sm:$0xff] %v4979_v49  ;;  %v6385_v17 = vld [vmem:[#allocation26_spill] sm:$0xff] }
 0x12d   : > { %v1988_v52 = vand.u32 %v4446_v50, %v1962_v33  ;;  %2700 = vmatprep.mubr.bf16.mxu0 %v6344_v61  ;;  %2056 = vmatpush1.bf16.msra.mxu1 %v1951_v46  ;;  %6381 = vst [vmem:[#allocation58_spill] sm:$0xff] %v4984_v3  ;;  %v4991_v60 = vrot.slane %v4944_v30, %v4234_v20  ;;  %v6386_v33 = vld [vmem:[#allocation23_spill] sm:$0xff] }
 0x12e   : > { %v1527_v53 = vpop.permute.xlu1 %1526  ;;  %v1446_v58 = vpop.permute.xlu0 %1445  ;;  %v4998_v47 = vrot.slane %v4877_v11, %v4313_v55  ;;  %v1429_v21 = vmul.f32 %v4949_v34, %v1376_v15  ;;  %v1348_v27 = vmul.f32 %v4956_v56, %v1295_v14  ;;  %v1985_v13 = vand.u32 %v4446_v50, %v1961_v2 }
 0x12f   : > { %v1537_v42 = vsel %vm1534_vm5, %v1527_v53, %v4710_v22  ;;  %2057 = vmatprep.subr.bf16.mxu1 %v1988_v52  ;;  %6382 = vst [vmem:[#allocation59_spill] sm:$0xff] %v4991_v60  ;;  %v1456_v44 = vsel %vm1453_vm4, %v1446_v58, %v6383_v39  ;;  %v1926_v22 = vpack.c.bf16 %v1430_v45, %v1349_v16 }
 0x130   : > { %6384 = vst [vmem:[#allocation47_spill] sm:$0xff] %v4998_v47  ;;  %v1538_v20 = vsel %vm1534_vm5, %v6385_v17, %v1527_v53  ;;  %v1592_v46 = vmul.f32 %v4967_v24, %v1537_v42  ;;  %v1457_v26 = vsel %vm1453_vm4, %v6386_v33, %v1446_v58  ;;  %v1511_v37 = vmul.f32 %v4979_v49, %v1456_v44  ;;  %v6388_v42 = vld [vmem:[#allocation30_spill] sm:$0xff] }
 0x131   : > { %2058 = vmatpush1.bf16.msra.mxu1 %v1985_v13  ;;  %v5013_v2 = vrot.slane %v4944_v30, %v4313_v55  ;;  %v1925_v16 = vpack.c.bf16 %v1429_v21, %v1348_v27  ;;  %v1591_v14 = vmul.f32 %v4984_v3, %v1538_v20  ;;  %v1510_v53 = vmul.f32 %v4991_v60, %v1457_v26  ;;  %v6393_v26 = vld [vmem:[#allocation4_spill] sm:$0xff] }
 0x132   : > { %v1691_v52 = vpop.permute.xlu1 %1690  ;;  %v1610_v15 = vpop.permute.xlu0 %1609  ;;  %2131 = vmatprep.subr.bf16.mxu1 %v1926_v22  ;;  %v1936_v55 = vpack.c.bf16 %v1592_v46, %v1511_v37  ;;  %v5028_v44 = vrot.slane %v4877_v11, %v4365_v40  ;;  %v5038_v13 = vrot.slane %v4877_v11, %v4362_v38  ;;  %v5045_v17 = vrot.slane %v4944_v30, %v4365_v40  ;;  %v6395_v40 = vld [vmem:[#allocation38_spill] sm:$0xff] }
 0x133   : > { %6387 = vst [vmem:[#allocation26_spill] sm:$0xff] %v5013_v2  ;;  %v1617_v45 = vsel %vm1615_vm6, %v1610_v15, %v4762_v35  ;;  %v1618_v39 = vsel %vm1615_vm6, %v6388_v42, %v1610_v15  ;;  %v5033_v35 = vld [vmem:[%s6325_s5 + $0x88] ss:$0 sm:$0xff]  ;;  %v1935_v46 = vpack.c.bf16 %v1591_v14, %v1510_v53  ;;  %v1698_v33 = vsel %vm1696_vm7, %v1691_v52, %v4832_v62 }
 0x134   : > { %v1673_v58 = vmul.f32 %v4998_v47, %v1617_v45  ;;  %3717 = vmatmul.mubr.msk.bf16.vlgmr.msra.gmra.mrb[0].mxu1 %vm1970_vm12, %v4478_v6  ;;  %6389 = vst [vmem:[#allocation23_spill] sm:$0xff] %v5028_v44  ;;  %6390 = vst [vmem:[#allocation30_spill] sm:$0xff] %v5033_v35  ;;  %v1672_v11 = vmul.f32 %v5013_v2, %v1618_v39  ;;  %v6396_v45 = vld [vmem:[#allocation35_spill] sm:$0xff]  ;;  %v5070_v14 = vrot.slane %v4944_v30, %v4362_v38  ;;  %v6398_v53 = vld [vmem:[#allocation32_spill] sm:$0xff] }
 0x135   : > { %2132 = vmatpush1.bf16.msra.mxu1 %v1925_v16  ;;  %2163 = vmatprep.mubr.bf16.mxu1 %v6344_v61  ;;  %6391 = vst [vmem:[#allocation60_spill] sm:$0xff] %v5038_v13  ;;  %6392 = vst [vmem:[#allocation61_spill] sm:$0xff] %v5045_v17  ;;  %v1754_v42 = vmul.f32 %v5038_v13, %v1698_v33  ;;  %v6399_v39 = vld [vmem:[#allocation3_spill] sm:$0xff] }
 0x136   : > { %v1853_v21 = vpop.permute.xlu1 %1852  ;;  %v1772_v27 = vpop.permute.xlu0 %1771  ;;  %2133 = vmatprep.subr.bf16.mxu1 %v1936_v55  ;;  %v1946_v37 = vpack.c.bf16 %v1673_v58, %v6393_v26  ;;  %6397 = vst [vmem:[#allocation38_spill] sm:$0xff] %v5070_v14  ;;  %v1699_v58 = vsel %vm1696_vm7, %v6398_v53, %v1691_v52  ;;  %v1945_v55 = vpack.c.bf16 %v1672_v11, %v6399_v39 }
 0x137   : > { %v1860_v22 = vsel %vm1858_vm10, %v1853_v21, %v4848_v1  ;;  %v1779_v20 = vsel %vm1777_vm8, %v1772_v27, %v4830_v10  ;;  %v5058_v1 = vld [vmem:[%s6325_s5 + $0x80] ss:$0 sm:$0xff]  ;;  %v1861_v15 = vsel %vm1858_vm10, %v6395_v40, %v1853_v21  ;;  %v1780_v16 = vsel %vm1777_vm8, %v6396_v45, %v1772_v27 }
 0x138   : > { %6394 = vst [vmem:[#allocation4_spill] sm:$0xff] %v5058_v1  ;;  %v1916_v10 = vmul.f32 %v5033_v35, %v1860_v22  ;;  %v1835_v62 = vmul.f32 %v5028_v44, %v1779_v20  ;;  %v1915_v21 = vmul.f32 %v5058_v1, %v1861_v15  ;;  %v1834_v27 = vmul.f32 %v5045_v17, %v1780_v16  ;;  %v6407_v1 = vld [vmem:[#allocation5_spill] sm:$0xff]  ;;  %v6408_v44 = vld [vmem:[#allocation6_spill] sm:$0xff] }
 0x139   : > { %2134 = vmatpush1.bf16.msra.mxu1 %v1935_v46  ;;  %v1753_v38 = vmul.f32 %v5070_v14, %v1699_v58 }
 0x13a   : > { %2135 = vmatprep.subr.bf16.mxu1 %v1946_v37  ;;  %v1956_v22 = vpack.c.bf16 %v1835_v62, %v1754_v42  ;;  %v1966_v20 = vpack.c.bf16 %v6363_v7, %v1916_v10  ;;  %v1965_v30 = vpack.c.bf16 %v6363_v7, %v1915_v21 }
 0x13b   : > { %v1955_v46 = vpack.c.bf16 %v1834_v27, %v1753_v38 }
 0x13c   : > { %v2000_v52 = vand.u32 %v4446_v50, %v1966_v20  ;;  %v1997_v33 = vand.u32 %v4446_v50, %v1965_v30 }
 0x13d   : > { %2136 = vmatpush1.bf16.msra.mxu1 %v1945_v55 }
 0x13e   : > { %2137 = vmatprep.subr.bf16.mxu1 %v1956_v22 }
 0x141   : > { %2138 = vmatpush1.bf16.msra.mxu1 %v1955_v46 }
 0x142   : > { %2139 = vmatprep.subr.bf16.mxu1 %v2000_v52 }
 0x145   : > { %2140 = vmatpush1.bf16.msra.mxu1 %v1997_v33 }
 0x148   : > { %3719 = vmatmul.mubr.msk.bf16.vlgmr.msra.gmra.mrb[4].mxu1 %vm1970_vm12, %v4478_v6 }
 0x149   : > { %2659 = vmatprep.mubr.bf16.mxu1 %v6344_v61 }
 0x1a5   : > { %v2042_v11 = vpop.f32.mrb[0].mxu0 }
 0x1a6   : > { %v5087_v26 = vmax.f32 %v2042_v11, 0.0  ;;  %v2044_v37 = vpop.f32.mrb[1].mxu0 }
 0x1a7   : > { %v2046_v40 = vpop.f32.mrb[2].mxu0  ;;  %v5115_v20 = vmax.f32 %v2044_v37, 0.0 }
 0x1a8   : > { %2223 = vrot.lane.b32.xlu0 %v5087_v26, %s6313_s13  ;;  %v2047_v15 = vpop.f32.mrb[3].mxu0 }
 0x1ac   : > { %2263 = vrot.lane.b32.xlu0 %v5087_v26, %s6314_s8 }
 0x1b0   : > { %2303 = vrot.lane.b32.xlu0 %v5087_v26, %s6316_s4 }
 0x1b4   : > { %2343 = vrot.lane.b32.xlu0 %v5087_v26, %s6318_s27 }
 0x1b8   : > { %2383 = vrot.lane.b32.xlu0 %v5087_v26, %s6320_s30 }
 0x1d5   : > { %v2124_v6 = vpop.f32.mrb[4].mxu0 }
 0x1d6   : > { %v2126_v10 = vpop.f32.mrb[5].mxu0  ;;  %v5159_v11 = vmax.f32 %v2124_v6, 0.0 }
 0x1d7   : > { %v2128_v45 = vpop.f32.mrb[6].mxu0  ;;  %v5179_v40 = vmax.f32 %v2126_v10, 0.0 }
 0x1d8   : > { %v2129_v16 = vpop.f32.mrb[7].mxu0  ;;  %6401 = vst [vmem:[#allocation35_spill] sm:$0xff] %v5159_v11 }
 0x1d9   : > { %6403 = vst [vmem:[#allocation3_spill] sm:$0xff] %v5179_v40 }
 0x1fd   : > { %v5099_v62 = vpop.f32.mrb[8].mxu0 }
 0x1fe   : > { %v2208_v53 = vpop.f32.mrb[9].mxu0  ;;  %v5220_v45 = vmax.f32 %v5099_v62, 0.0 }
 0x1ff   : > { %v2210_v58 = vpop.f32.mrb[10].mxu0  ;;  %v5197_v15 = vmax.f32 %v2208_v53, 0.0 }
 0x200   : > { %v2211_v42 = vpop.f32.mrb[11].mxu0  ;;  %6405 = vst [vmem:[#allocation63_spill] sm:$0xff] %v5220_v45 }
 0x201   : > { %6404 = vst [vmem:[#allocation62_spill] sm:$0xff] %v5197_v15 }
 0x207   : > { %v2083_v39 = vpop.f32.mrb[0].mxu1 }
 0x208   : > { %v5101_v55 = vmax.f32 %v2083_v39, 0.0  ;;  %v2085_v21 = vpop.f32.mrb[1].mxu1 }
 0x209   : > { %v2087_v27 = vpop.f32.mrb[2].mxu1  ;;  %v5141_v33 = vmax.f32 %v2085_v21, 0.0 }
 0x20a   : > { %2427 = vrot.lane.b32.xlu0 %v5101_v55, %s6400_s2  ;;  %2387 = vrot.lane.b32.xlu1 %v5101_v55, %s6320_s30  ;;  %v2088_v22 = vpop.f32.mrb[3].mxu1 }
 0x20e   : > { %2467 = vrot.lane.b32.xlu0 %v5101_v55, %s6321_s7  ;;  %2423 = vrot.lane.b32.xlu1 %v5087_v26, %s6400_s2 }
 0x212   : > { %2463 = vrot.lane.b32.xlu0 %v5087_v26, %s6321_s7  ;;  %2503 = vrot.lane.b32.xlu1 %v5087_v26, %s6322_s1 }
 0x216   : > { %2507 = vrot.lane.b32.xlu0 %v5101_v55, %s6322_s1  ;;  %2225 = vrot.lane.b32.xlu1 %v5115_v20, %s6313_s13 }
 0x21a   : > { %2227 = vrot.lane.b32.xlu0 %v5101_v55, %s6313_s13  ;;  %2265 = vrot.lane.b32.xlu1 %v5115_v20, %s6314_s8  ;;  %v5203_v6 = vpop.permute.xlu0 %2223 }
 0x21b   : > { %v2165_v38 = vpop.f32.mrb[4].mxu1 }
 0x21c   : > { %v2167_v30 = vpop.f32.mrb[5].mxu1  ;;  %v5165_v37 = vmax.f32 %v2165_v38, 0.0 }
 0x21d   : > { %v2169_v46 = vpop.f32.mrb[6].mxu1  ;;  %v5238_v62 = vmax.f32 %v2167_v30, 0.0 }
 0x21e   : > { %2267 = vrot.lane.b32.xlu0 %v5101_v55, %s6314_s8  ;;  %2305 = vrot.lane.b32.xlu1 %v5115_v20, %s6316_s4  ;;  %v2170_v52 = vpop.f32.mrb[7].mxu1  ;;  %6402 = vst [vmem:[#allocation32_spill] sm:$0xff] %v5165_v37  ;;  %v5213_v10 = vpop.permute.xlu0 %2263 }
 0x21f   : > { %6406 = vst [vmem:[#allocation64_spill] sm:$0xff] %v5238_v62 }
 0x222   : > { %2307 = vrot.lane.b32.xlu0 %v5101_v55, %s6316_s4  ;;  %2345 = vrot.lane.b32.xlu1 %v5115_v20, %s6318_s27  ;;  %v5222_v16 = vpop.permute.xlu0 %2303 }
 0x226   : > { %2347 = vrot.lane.b32.xlu0 %v5101_v55, %s6318_s27  ;;  %2425 = vrot.lane.b32.xlu1 %v5115_v20, %s6400_s2  ;;  %v5228_v53 = vpop.permute.xlu0 %2343 }
 0x22a   : > { %2385 = vrot.lane.b32.xlu0 %v5115_v20, %s6320_s30  ;;  %2465 = vrot.lane.b32.xlu1 %v5115_v20, %s6321_s7  ;;  %v5240_v58 = vpop.permute.xlu0 %2383 }
 0x22e   : > { %2505 = vrot.lane.b32.xlu1 %v5115_v20, %s6322_s1  ;;  %2389 = vrot.lane.b32.xlu0 %v5141_v33, %s6320_s30 }
 0x232   : > { %2429 = vrot.lane.b32.xlu0 %v5141_v33, %s6400_s2  ;;  %2229 = vrot.lane.b32.xlu1 %v5141_v33, %s6313_s13 }
 0x236   : > { %2469 = vrot.lane.b32.xlu0 %v5141_v33, %s6321_s7  ;;  %2269 = vrot.lane.b32.xlu1 %v5141_v33, %s6314_s8 }
 0x23a   : > { %2509 = vrot.lane.b32.xlu0 %v5141_v33, %s6322_s1  ;;  %2309 = vrot.lane.b32.xlu1 %v5141_v33, %s6316_s4 }
 0x23e   : > { %2231 = vrot.lane.b32.xlu0 %v5159_v11, %s6313_s13  ;;  %2349 = vrot.lane.b32.xlu1 %v5141_v33, %s6318_s27 }
 0x242   : > { %2271 = vrot.lane.b32.xlu0 %v5159_v11, %s6314_s8  ;;  %2391 = vrot.lane.b32.xlu1 %v5159_v11, %s6320_s30 }
 0x246   : > { %2311 = vrot.lane.b32.xlu0 %v5159_v11, %s6316_s4  ;;  %2395 = vrot.lane.b32.xlu1 %v5165_v37, %s6320_s30 }
 0x24a   : > { %2351 = vrot.lane.b32.xlu0 %v5159_v11, %s6318_s27  ;;  %2431 = vrot.lane.b32.xlu1 %v5159_v11, %s6400_s2 }
 0x24e   : > { %2393 = vrot.lane.b32.xlu0 %v5179_v40, %s6320_s30  ;;  %2471 = vrot.lane.b32.xlu1 %v5159_v11, %s6321_s7 }
 0x252   : > { %2433 = vrot.lane.b32.xlu0 %v5179_v40, %s6400_s2  ;;  %2435 = vrot.lane.b32.xlu1 %v5165_v37, %s6400_s2 }
 0x256   : > { %2473 = vrot.lane.b32.xlu0 %v5179_v40, %s6321_s7  ;;  %2475 = vrot.lane.b32.xlu1 %v5165_v37, %s6321_s7 }
 0x25a   : > { %2513 = vrot.lane.b32.xlu0 %v5179_v40, %s6322_s1  ;;  %2511 = vrot.lane.b32.xlu1 %v5159_v11, %s6322_s1 }
 0x25e   : > { %2241 = vrot.lane.b32.xlu0 %v5197_v15, %s6313_s13  ;;  %2233 = vrot.lane.b32.xlu1 %v5179_v40, %s6313_s13 }
 0x262   : > { %2321 = vrot.lane.b32.xlu0 %v5197_v15, %s6316_s4  ;;  %2273 = vrot.lane.b32.xlu1 %v5179_v40, %s6314_s8 }
 0x266   : > { %2235 = vrot.lane.b32.xlu0 %v5165_v37, %s6313_s13  ;;  %2313 = vrot.lane.b32.xlu1 %v5179_v40, %s6316_s4 }
 0x26a   : > { %2275 = vrot.lane.b32.xlu0 %v5165_v37, %s6314_s8  ;;  %2353 = vrot.lane.b32.xlu1 %v5179_v40, %s6318_s27 }
 0x26e   : > { %2239 = vrot.lane.b32.xlu0 %v5220_v45, %s6313_s13  ;;  %2281 = vrot.lane.b32.xlu1 %v5197_v15, %s6314_s8 }
 0x272   : > { %2315 = vrot.lane.b32.xlu0 %v5165_v37, %s6316_s4  ;;  %2361 = vrot.lane.b32.xlu1 %v5197_v15, %s6318_s27 }
 0x276   : > { %2355 = vrot.lane.b32.xlu0 %v5165_v37, %s6318_s27  ;;  %2515 = vrot.lane.b32.xlu1 %v5165_v37, %s6322_s1 }
 0x27a   : > { %2319 = vrot.lane.b32.xlu0 %v5220_v45, %s6316_s4  ;;  %2237 = vrot.lane.b32.xlu1 %v5238_v62, %s6313_s13 }
 0x27c   : > { %v5246_v42 = vpop.permute.xlu1 %2387  ;;  %v5248_v39 = vpop.permute.xlu0 %2427 }
 0x27e   : > { %2397 = vrot.lane.b32.xlu0 %v5238_v62, %s6320_s30  ;;  %2277 = vrot.lane.b32.xlu1 %v5238_v62, %s6314_s8 }
 0x280   : > { %v5254_v21 = vpop.permute.xlu1 %2423  ;;  %v5256_v27 = vpop.permute.xlu0 %2467 }
 0x282   : > { %2439 = vrot.lane.b32.xlu0 %v5220_v45, %s6400_s2  ;;  %2279 = vrot.lane.b32.xlu1 %v5220_v45, %s6314_s8 }
 0x284   : > { %v5262_v22 = vpop.permute.xlu1 %2503  ;;  %v5264_v38 = vpop.permute.xlu0 %2463 }
 0x286   : > { %2479 = vrot.lane.b32.xlu0 %v5220_v45, %s6321_s7  ;;  %2317 = vrot.lane.b32.xlu1 %v5238_v62, %s6316_s4 }
 0x288   : > { %v2226_v30 = vpop.permute.xlu1 %2225  ;;  %v5270_v46 = vpop.permute.xlu0 %2507 }
 0x289   : > { %v2251_v52 = vsel %vm1291_vm2, %v5203_v6, %v2226_v30 }
 0x28a   : > { %2401 = vrot.lane.b32.xlu0 %v5197_v15, %s6320_s30  ;;  %2357 = vrot.lane.b32.xlu1 %v5238_v62, %s6318_s27  ;;  %v2254_v9 = vmul.f32 %v2251_v52, %v6407_v1 }
 0x28c   : > { %v2266_v43 = vpop.permute.xlu1 %2265  ;;  %v2228_v0 = vpop.permute.xlu0 %2227 }
 0x28d   : > { %v2291_v35 = vsel %vm1372_vm3, %v5213_v10, %v2266_v43 }
 0x28e   : > { %v2294_v17 = vmul.f32 %v2291_v35, %v6408_v44  ;;  %2481 = vrot.lane.b32.xlu0 %v5197_v15, %s6321_s7  ;;  %2359 = vrot.lane.b32.xlu1 %v5220_v45, %s6318_s27 }
 0x290   : > { %v5288_v13 = vpop.permute.xlu1 %2305  ;;  %v2268_v14 = vpop.permute.xlu0 %2267  ;;  %v2544_v63 = vpack.c.bf16 %v2294_v17, %v2254_v9 }
 0x291   : > { %v2290_v2 = vsel %vm1372_vm3, %v2266_v43, %v2268_v14 }
 0x292   : > { %2519 = vrot.lane.b32.xlu0 %v5220_v45, %s6322_s1  ;;  %2399 = vrot.lane.b32.xlu1 %v5220_v45, %s6320_s30  ;;  %v2295_v49 = vmul.f32 %v2290_v2, %v4736_v36 }
 0x293   : > { %2627 = vmatprep.subr.bf16.mxu1 %v2544_v63 }
 0x294   : > { %v5294_v52 = vpop.permute.xlu1 %2345  ;;  %v2308_v35 = vpop.permute.xlu0 %2307 }
 0x296   : > { %2437 = vrot.lane.b32.xlu1 %v5238_v62, %s6400_s2 }
 0x298   : > { %v5298_v1 = vpop.permute.xlu1 %2425  ;;  %v2348_v44 = vpop.permute.xlu0 %2347 }
 0x29a   : > { %2477 = vrot.lane.b32.xlu1 %v5238_v62, %s6321_s7 }
 0x29c   : > { %v5302_v9 = vpop.permute.xlu1 %2465  ;;  %v5304_v17 = vpop.permute.xlu0 %2385 }
 0x29e   : > { %2517 = vrot.lane.b32.xlu1 %v5238_v62, %s6322_s1  ;;  %v2250_v62 = vsel %vm1291_vm2, %v2226_v30, %v2228_v0  ;;  %v2370_v30 = vsel %vm1534_vm5, %v5294_v52, %v2348_v44 }
 0x29f   : > { %v2255_v40 = vmul.f32 %v2250_v62, %v4732_v23 }
 0x2a0   : > { %v5308_v63 = vpop.permute.xlu1 %2505  ;;  %v2390_v45 = vpop.permute.xlu0 %2389 }
 0x2a2   : > { %2441 = vrot.lane.b32.xlu1 %v5197_v15, %s6400_s2 }
 0x2a4   : > { %v5312_v37 = vpop.permute.xlu1 %2229  ;;  %v2430_v47 = vpop.permute.xlu0 %2429 }
 0x2a5   : > { %6409 = vst [vmem:[#allocation65_spill] sm:$0xff] %v5312_v37  ;;  %v2249_v60 = vsel %vm1291_vm2, %v2228_v0, %v5312_v37  ;;  %v2545_v0 = vpack.c.bf16 %v2295_v49, %v2255_v40  ;;  %v2375_v49 = vmul.f32 %v2370_v30, %v4772_v51 }
 0x2a6   : > { %2521 = vrot.lane.b32.xlu1 %v5197_v15, %s6322_s1  ;;  %v2256_v43 = vmul.f32 %v2249_v60, %v4722_v4 }
 0x2a8   : > { %v5323_v11 = vpop.permute.xlu1 %2269  ;;  %v2470_v24 = vpop.permute.xlu0 %2469 }
 0x2a9   : > { %v2289_v3 = vsel %vm1372_vm3, %v2268_v14, %v5323_v11 }
 0x2aa   : > { %v2296_v15 = vmul.f32 %v2289_v3, %v4726_v8  ;;  %v2330_v8 = vsel %vm1453_vm4, %v5288_v13, %v2308_v35 }
 0x2ab   : > { %v2335_v14 = vmul.f32 %v2330_v8, %v4782_v54 }
 0x2ac   : > { %v5332_v56 = vpop.permute.xlu1 %2309  ;;  %v2510_v37 = vpop.permute.xlu0 %2509  ;;  %v2546_v59 = vpack.c.bf16 %v2296_v15, %v2256_v43 }
 0x2ad   : > { %v2329_v36 = vsel %vm1453_vm4, %v2308_v35, %v5332_v56  ;;  %v2555_v51 = vpack.c.bf16 %v2375_v49, %v2335_v14 }
 0x2ae   : > { %2668 = vmatprep.subr.bf16.mxu0 %v2546_v59  ;;  %v2409_v59 = vsel %vm1615_vm6, %v5246_v42, %v2390_v45  ;;  %v2336_v60 = vmul.f32 %v2329_v36, %v4786_v32  ;;  %v2449_v36 = vsel %vm1696_vm7, %v5248_v39, %v2430_v47 }
 0x2af   : > { %2669 = vmatpush1.bf16.msra.mxu0 %v2545_v0  ;;  %v2415_v35 = vmul.f32 %v2409_v59, %v4858_v18 }
 0x2b0   : > { %v5343_v4 = vpop.permute.xlu1 %2349  ;;  %v5345_v23 = vpop.permute.xlu0 %2231 }
 0x2b1   : > { %v2369_v3 = vsel %vm1534_vm5, %v2348_v44, %v5343_v4  ;;  %v2565_v0 = vpack.c.bf16 %v2415_v35, %v5101_v55 }
 0x2b2   : > { %v2376_v2 = vmul.f32 %v2369_v3, %v4776_v29 }
 0x2b4   : > { %v5357_v40 = vpop.permute.xlu1 %2391  ;;  %v5359_v15 = vpop.permute.xlu0 %2271  ;;  %v2556_v62 = vpack.c.bf16 %v2376_v2, %v2336_v60  ;;  %v2455_v60 = vmul.f32 %v2449_v36, %v4867_v31 }
 0x2b5   : > { %v2408_v44 = vsel %vm1615_vm6, %v2390_v45, %v5357_v40  ;;  %v2489_v45 = vsel %vm1777_vm8, %v5256_v27, %v2470_v24 }
 0x2b6   : > { %v2416_v43 = vmul.f32 %v2408_v44, %v4862_v25  ;;  %2670 = vmatprep.subr.bf16.mxu0 %v2556_v62  ;;  %v2495_v55 = vmul.f32 %v2489_v45, %v4895_v28  ;;  %v6412_v44 = vld [vmem:[#allocation37_spill] sm:$0xff] }
 0x2b7   : > { %2671 = vmatpush1.bf16.msra.mxu0 %v2555_v51  ;;  %v6410_v51 = vld [vmem:[#allocation36_spill] sm:$0xff] }
 0x2b8   : > { %v5366_v32 = vpop.permute.xlu1 %2395  ;;  %v5368_v29 = vpop.permute.xlu0 %2311  ;;  %v2566_v54 = vpack.c.bf16 %v2416_v43, %v5141_v33 }
 0x2ba   : > { %2672 = vmatprep.subr.bf16.mxu0 %v2566_v54 }
 0x2bb   : > { %2673 = vmatpush1.bf16.msra.mxu0 %v2565_v0  ;;  %v6417_v0 = vld [vmem:[#allocation8_spill] sm:$0xff] }
 0x2bc   : > { %v2432_v30 = vpop.permute.xlu1 %2431  ;;  %v5372_v18 = vpop.permute.xlu0 %2351 }
 0x2bd   : > { %v2448_v25 = vsel %vm1696_vm7, %v2430_v47, %v2432_v30  ;;  %v2575_v47 = vpack.c.bf16 %v2495_v55, %v2455_v60 }
 0x2be   : > { %v2456_v3 = vmul.f32 %v2448_v25, %v4871_v19  ;;  %v2529_v19 = vsel %vm1858_vm10, %v5270_v46, %v2510_v37 }
 0x2bf   : > { %v2535_v54 = vmul.f32 %v4904_v41, %v2529_v19 }
 0x2c0   : > { %v2472_v8 = vpop.permute.xlu1 %2471  ;;  %v5382_v33 = vpop.permute.xlu0 %2393 }
 0x2c1   : > { %v2488_v49 = vsel %vm1777_vm8, %v2470_v24, %v2472_v8 }
 0x2c2   : > { %v2496_v59 = vmul.f32 %v2488_v49, %v4899_v48 }
 0x2c4   : > { %v5390_v2 = vpop.permute.xlu1 %2435  ;;  %v5392_v14 = vpop.permute.xlu0 %2433  ;;  %v2576_v62 = vpack.c.bf16 %v2496_v59, %v2456_v3 }
 0x2c5   : > { %v2447_v28 = vsel %vm1696_vm7, %v2432_v30, %v5392_v14 }
 0x2c6   : > { %2674 = vmatprep.subr.bf16.mxu0 %v2576_v62  ;;  %v5408_v35 = vmul.f32 %v2447_v28, %v6410_v51  ;;  %v2331_v51 = vsel %vm1453_vm4, %v5222_v16, %v5288_v13  ;;  %v2410_v13 = vsel %vm1615_vm6, %v5304_v17, %v5246_v42  ;;  %v2411_v42 = vsel %vm1615_vm6, %v5240_v58, %v5304_v17  ;;  %v6420_v17 = vld [vmem:[#allocation12_spill] sm:$0xff] }
 0x2c7   : > { %2675 = vmatpush1.bf16.msra.mxu0 %v2575_v47 }
 0x2c8   : > { %v5400_v24 = vpop.permute.xlu1 %2475  ;;  %v5402_v48 = vpop.permute.xlu0 %2473  ;;  %6411 = vst [vmem:[#allocation36_spill] sm:$0xff] %v5408_v35 }
 0x2c9   : > { %v2487_v31 = vsel %vm1777_vm8, %v2472_v8, %v5402_v48  ;;  %v2585_v8 = vpack.c.bf16 %v6363_v7, %v2535_v54  ;;  %v6414_v54 = vld [vmem:[#allocation10_spill] sm:$0xff] }
 0x2ca   : > { %v5411_v43 = vmul.f32 %v2487_v31, %v6412_v44  ;;  %v2371_v31 = vsel %vm1534_vm5, %v5228_v53, %v5294_v52 }
 0x2cb   : > { %v2604_v59 = vand.u32 %v2585_v8, %v4446_v50 }
 0x2cc   : > { %6413 = vst [vmem:[#allocation37_spill] sm:$0xff] %v5411_v43  ;;  %v5416_v30 = vpop.permute.xlu1 %2511  ;;  %v5418_v45 = vpop.permute.xlu0 %2513 }
 0x2cd   : > { %v2528_v25 = vsel %vm1858_vm10, %v2510_v37, %v5416_v30 }
 0x2ce   : > { %v2536_v36 = vmul.f32 %v4909_v5, %v2528_v25  ;;  %v5437_v5 = vld [vmem:[%s6163_s17] sm:$0x3]  ;;  %v2374_v25 = vmul.f32 %v2371_v31, %v6414_v54 }
 0x2d0   : > { %v2586_v55 = vpack.c.bf16 %v6363_v7, %v2536_v36  ;;  %v5426_v49 = vpop.permute.xlu1 %2233  ;;  %v5428_v41 = vpop.permute.xlu0 %2241 }
 0x2d1   : > { %v2252_v44 = vsel %vm1291_vm2, %v5428_v41, %v5203_v6 }
 0x2d2   : > { %v2607_v3 = vand.u32 %v2586_v55, %v4446_v50  ;;  %v6415_v55 = vld [vmem:[#allocation9_spill] sm:$0xff] }
 0x2d4   : > { %v2274_v60 = vpop.permute.xlu1 %2273  ;;  %2676 = vmatprep.subr.bf16.mxu0 %v2607_v3  ;;  %v5432_v62 = vpop.permute.xlu0 %2321  ;;  %v2334_v3 = vmul.f32 %v2331_v51, %v6415_v55  ;;  %v6418_v55 = vld [vmem:[#allocation13_spill] sm:$0xff] }
 0x2d5   : > { %2677 = vmatpush1.bf16.msra.mxu0 %v2604_v59  ;;  %v6416_v59 = vld [vmem:[#allocation7_spill] sm:$0xff]  ;;  %v2332_v54 = vsel %vm1453_vm4, %v5432_v62, %v5222_v16 }
 0x2d6   : > { %v2253_v6 = vmul.f32 %v2252_v44, %v6416_v59  ;;  %v2554_v51 = vpack.c.bf16 %v2374_v25, %v2334_v3  ;;  %v2414_v44 = vmul.f32 %v2410_v13, %v6418_v55  ;;  %v2490_v25 = vsel %vm1777_vm8, %v5302_v9, %v5256_v27  ;;  %v6419_v3 = vld [vmem:[#allocation11_spill] sm:$0xff]  ;;  %v6421_v13 = vld [vmem:[#allocation14_spill] sm:$0xff] }
 0x2d7   : > { %v2413_v55 = vmul.f32 %v2411_v42, %v6421_v13  ;;  %v5517_v27 = vld [vmem:[%s6325_s5 + $0x58] ss:$0 sm:$0xff]  ;;  %v2287_v13 = vsel %vm1372_vm3, %v5359_v15, %v2274_v60 }
 0x2d8   : > { %v5439_v37 = vpop.permute.xlu1 %2313  ;;  %v5441_v47 = vpop.permute.xlu0 %2235  ;;  %3722 = vmatmul.mubr.msk.bf16.vlgmr.msra.gmra.mrb[12].mxu0 %vm1970_vm12, %v5437_v5  ;;  %6422 = vst [vmem:[#allocation7_spill] sm:$0xff] %v5517_v27 }
 0x2d9   : > { %2782 = vmatprep.mubr.bf16.mxu0 %v6344_v61 }
 0x2dc   : > { %v5446_v28 = vpop.permute.xlu1 %2353  ;;  %v5448_v19 = vpop.permute.xlu0 %2275 }
 0x2e0   : > { %v5463_v36 = vpop.permute.xlu1 %2281  ;;  %v5465_v8 = vpop.permute.xlu0 %2239 }
 0x2e1   : > { %v2292_v52 = vsel %vm1372_vm3, %v5463_v36, %v5213_v10 }
 0x2e2   : > { %v2293_v31 = vmul.f32 %v2292_v52, %v6417_v0  ;;  %v2530_v52 = vsel %vm1858_vm10, %v5308_v63, %v5270_v46  ;;  %v2450_v46 = vsel %vm1696_vm7, %v5298_v1, %v5248_v39  ;;  %v2491_v39 = vsel %vm1777_vm8, %v5264_v38, %v5302_v9  ;;  %v6426_v9 = vld [vmem:[#allocation18_spill] sm:$0xff] }
 0x2e4   : > { %v2543_v35 = vpack.c.bf16 %v2293_v31, %v2253_v6  ;;  %v5482_v43 = vpop.permute.xlu1 %2361  ;;  %v5484_v10 = vpop.permute.xlu0 %2315  ;;  %v2333_v6 = vmul.f32 %v2332_v54, %v6419_v3 }
 0x2e5   : > { %v2372_v16 = vsel %vm1534_vm5, %v5482_v43, %v5228_v53  ;;  %v2531_v53 = vsel %vm1858_vm10, %v5262_v22, %v5308_v63  ;;  %v2564_v63 = vpack.c.bf16 %v2414_v44, %v5115_v20  ;;  %v2563_v20 = vpack.c.bf16 %v2413_v55, %v5087_v26 }
 0x2e6   : > { %v2373_v31 = vmul.f32 %v2372_v16, %v6420_v17  ;;  %2628 = vmatpush1.bf16.msra.mxu1 %v2543_v35  ;;  %v2534_v35 = vmul.f32 %v5517_v27, %v2530_v52  ;;  %v2451_v52 = vsel %vm1696_vm7, %v5254_v21, %v5298_v1  ;;  %v5538_v27 = vld [vmem:[%s6325_s5 + $0x50] ss:$0 sm:$0xff] }
 0x2e7   : > { %2629 = vmatprep.subr.bf16.mxu1 %v2554_v51  ;;  %v6423_v51 = vld [vmem:[#allocation16_spill] sm:$0xff]  ;;  %6425 = vst [vmem:[#allocation8_spill] sm:$0xff] %v5538_v27  ;;  %v2533_v17 = vmul.f32 %v5538_v27, %v2531_v53  ;;  %v2286_v53 = vsel %vm1372_vm3, %v2274_v60, %v5448_v19  ;;  %v2246_v60 = vsel %vm1291_vm2, %v5426_v49, %v5441_v47  ;;  %v6433_v27 = vld [vmem:[#allocation21_spill] sm:$0xff] }
 0x2e8   : > { %v2553_v54 = vpack.c.bf16 %v2373_v31, %v2333_v6  ;;  %v5520_v16 = vpop.permute.xlu1 %2515  ;;  %v5522_v3 = vpop.permute.xlu0 %2355  ;;  %v2494_v42 = vmul.f32 %v2490_v25, %v6423_v51  ;;  %v6424_v6 = vld [vmem:[#allocation15_spill] sm:$0xff]  ;;  %v2493_v25 = vmul.f32 %v2491_v39, %v6426_v9  ;;  %v2584_v1 = vpack.c.bf16 %v6363_v7, %v2534_v35 }
 0x2e9   : > { %v2454_v31 = vmul.f32 %v2450_v46, %v6424_v6  ;;  %v6427_v46 = vld [vmem:[#allocation17_spill] sm:$0xff]  ;;  %v2583_v26 = vpack.c.bf16 %v6363_v7, %v2533_v17  ;;  %v2247_v39 = vsel %vm1291_vm2, %v5345_v23, %v5426_v49  ;;  %v2367_v49 = vsel %vm1534_vm5, %v5372_v18, %v5446_v28 }
 0x2ea   : > { %2630 = vmatpush1.bf16.msra.mxu1 %v2553_v54  ;;  %v2453_v6 = vmul.f32 %v2451_v52, %v6427_v46  ;;  %v2601_v17 = vand.u32 %v2584_v1, %v4446_v50 }
 0x2eb   : > { %2631 = vmatprep.subr.bf16.mxu1 %v2564_v63  ;;  %v2574_v51 = vpack.c.bf16 %v2494_v42, %v2454_v31  ;;  %v6428_v63 = vld [vmem:[#allocation20_spill] sm:$0xff] }
 0x2ec   : > { %v5543_v44 = vpop.permute.xlu1 %2237  ;;  %v5545_v54 = vpop.permute.xlu0 %2319  ;;  %v2573_v35 = vpack.c.bf16 %v2493_v25, %v2453_v6  ;;  %v2298_v52 = vmul.f32 %v2287_v13, %v6428_v63  ;;  %v2299_v6 = vmul.f32 %v2286_v53, %v4949_v34  ;;  %v6429_v25 = vld [vmem:[#allocation54_spill] sm:$0xff]  ;;  %v2598_v63 = vand.u32 %v2583_v26, %v4446_v50 }
 0x2ed   : > { %v2245_v55 = vsel %vm1291_vm2, %v5441_v47, %v5543_v44  ;;  %v2406_v26 = vsel %vm1615_vm6, %v5382_v33, %v5366_v32 }
 0x2ee   : > { %2632 = vmatpush1.bf16.msra.mxu1 %v2563_v20  ;;  %v2260_v47 = vmul.f32 %v2245_v55, %v4919_v57  ;;  %v2368_v57 = vsel %vm1534_vm5, %v5343_v4, %v5372_v18  ;;  %v2327_v55 = vsel %vm1453_vm4, %v5368_v29, %v5439_v37  ;;  %v2328_v4 = vsel %vm1453_vm4, %v5332_v56, %v5368_v29  ;;  %v6436_v18 = vld [vmem:[#allocation27_spill] sm:$0xff] }
 0x2ef   : > { %2633 = vmatprep.subr.bf16.mxu1 %v2574_v51  ;;  %v2288_v51 = vsel %vm1372_vm3, %v5323_v11, %v5359_v15  ;;  %v6430_v11 = vld [vmem:[#allocation65_spill] sm:$0xff]  ;;  %v6431_v15 = vld [vmem:[#allocation19_spill] sm:$0xff]  ;;  %v2407_v56 = vsel %vm1615_vm6, %v5357_v40, %v5382_v33  ;;  %v2366_v40 = vsel %vm1534_vm5, %v5446_v28, %v5522_v3 }
 0x2f0   : > { %v5568_v42 = vpop.permute.xlu1 %2277  ;;  %v5587_v1 = vpop.permute.xlu0 %2397  ;;  %v2248_v34 = vsel %vm1291_vm2, %v6430_v11, %v5345_v23  ;;  %v2258_v13 = vmul.f32 %v2247_v39, %v6431_v15  ;;  %v2297_v46 = vmul.f32 %v2288_v51, %v6433_v27  ;;  %v6434_v39 = vld [vmem:[#allocation25_spill] sm:$0xff]  ;;  %v6435_v51 = vld [vmem:[#allocation22_spill] sm:$0xff]  ;;  %v6441_v28 = vld [vmem:[#allocation3_spill] sm:$0xff] }
 0x2f1   : > { %v2285_v31 = vsel %vm1372_vm3, %v5448_v19, %v5568_v42  ;;  %v6432_v19 = vld [vmem:[#allocation55_spill] sm:$0xff]  ;;  %v2378_v27 = vmul.f32 %v2367_v49, %v6434_v39  ;;  %v6438_v15 = vld [vmem:[#allocation29_spill] sm:$0xff]  ;;  %v6442_v39 = vld [vmem:[#allocation34_spill] sm:$0xff] }
 0x2f2   : > { %v2300_v20 = vmul.f32 %v2285_v31, %v6429_v25  ;;  %2634 = vmatpush1.bf16.msra.mxu1 %v2573_v35  ;;  %v2259_v53 = vmul.f32 %v2246_v60, %v6432_v19  ;;  %v2257_v31 = vmul.f32 %v2248_v34, %v6435_v51  ;;  %v6437_v25 = vld [vmem:[#allocation24_spill] sm:$0xff]  ;;  %v2418_v49 = vmul.f32 %v2406_v26, %v6438_v15  ;;  %v6447_v15 = vld [vmem:[#allocation35_spill] sm:$0xff] }
 0x2f3   : > { %2635 = vmatprep.subr.bf16.mxu1 %v2601_v17  ;;  %v2548_v17 = vpack.c.bf16 %v2298_v52, %v2258_v13  ;;  %v6439_v34 = vld [vmem:[#allocation28_spill] sm:$0xff]  ;;  %v2526_v19 = vsel %vm1858_vm10, %v5418_v45, %v5520_v16 }
 0x2f4   : > { %v5605_v23 = vpop.permute.xlu1 %2279  ;;  %v2550_v35 = vpack.c.bf16 %v2300_v20, %v2260_v47  ;;  %v2549_v60 = vpack.c.bf16 %v2299_v6, %v2259_v53  ;;  %v2377_v47 = vmul.f32 %v2368_v57, %v6436_v18  ;;  %v2338_v20 = vmul.f32 %v2327_v55, %v6437_v25  ;;  %v5620_v6 = vpop.permute.xlu0 %2439 }
 0x2f5   : > { %v2547_v11 = vpack.c.bf16 %v2297_v46, %v2257_v31  ;;  %v2337_v13 = vmul.f32 %v2328_v4, %v6439_v34  ;;  %v2486_v46 = vsel %vm1777_vm8, %v5402_v48, %v5400_v24  ;;  %v6440_v48 = vld [vmem:[#allocation31_spill] sm:$0xff]  ;;  %v2446_v57 = vsel %vm1696_vm7, %v5392_v14, %v5390_v2  ;;  %v6444_v31 = vld [vmem:[#allocation57_spill] sm:$0xff] }
 0x2f6   : > { %2636 = vmatpush1.bf16.msra.mxu1 %v2598_v63  ;;  %2750 = vmatprep.subr.bf16.mxu0 %v2550_v35  ;;  %v2558_v29 = vpack.c.bf16 %v2378_v27, %v2338_v20  ;;  %v2417_v63 = vmul.f32 %v2407_v56, %v6440_v48  ;;  %v2527_v55 = vsel %vm1858_vm10, %v5416_v30, %v5418_v45  ;;  %v6443_v30 = vld [vmem:[#allocation58_spill] sm:$0xff]  ;;  %v6446_v20 = vld [vmem:[#allocation33_spill] sm:$0xff] }
 0x2f7   : > { %2709 = vmatprep.subr.bf16.mxu1 %v2548_v17  ;;  %2751 = vmatpush1.bf16.msra.mxu0 %v2549_v60  ;;  %v2557_v53 = vpack.c.bf16 %v2377_v47, %v2337_v13  ;;  %v2568_v26 = vpack.c.bf16 %v2418_v49, %v6441_v28  ;;  %v2498_v27 = vmul.f32 %v2486_v46, %v6442_v39  ;;  %v3788_v17 = vld [vmem:[%s6325_s5 + $0x78] ss:$0 sm:$0xff]  ;;  %v6445_v47 = vld [vmem:[#allocation56_spill] sm:$0xff] }
 0x2f8   : > { %v5622_v52 = vpop.permute.xlu1 %2317  ;;  %v2326_v60 = vsel %vm1453_vm4, %v5439_v37, %v5484_v10  ;;  %v2538_v14 = vmul.f32 %v3788_v17, %v2526_v19  ;;  %v2379_v45 = vmul.f32 %v2366_v40, %v6443_v30  ;;  %v5671_v18 = vpop.permute.xlu0 %2479  ;;  %v2458_v37 = vmul.f32 %v2446_v57, %v6446_v20  ;;  %v6452_v17 = vld [vmem:[#allocation37_spill] sm:$0xff]  ;;  %v6459_v20 = vld [vmem:[#allocation43_spill] sm:$0xff] }
 0x2f9   : > { %3721 = vmatmul.mubr.msk.bf16.vlgmr.msra.gmra.mrb[8].mxu1 %vm1970_vm12, %v5437_v5  ;;  %v2325_v33 = vsel %vm1453_vm4, %v5484_v10, %v5622_v52  ;;  %v3789_v10 = vld [vmem:[%s6325_s5 + $0x70] ss:$0 sm:$0xff]  ;;  %v2567_v49 = vpack.c.bf16 %v2417_v63, %v6447_v15  ;;  %v2405_v46 = vsel %vm1615_vm6, %v5366_v32, %v5587_v1  ;;  %v2283_v40 = vsel %vm1372_vm3, %v5605_v23, %v5463_v36  ;;  %v6449_v63 = vld [vmem:[#allocation26_spill] sm:$0xff] }
 0x2fa   : > { %2710 = vmatpush1.bf16.msra.mxu1 %v2547_v11  ;;  %2741 = vmatprep.mubr.bf16.mxu1 %v6344_v61  ;;  %v2340_v4 = vmul.f32 %v2325_v33, %v6444_v31  ;;  %v2537_v11 = vmul.f32 %v3789_v10, %v2527_v55  ;;  %v2578_v19 = vpack.c.bf16 %v2498_v27, %v2458_v37  ;;  %v6451_v27 = vld [vmem:[#allocation47_spill] sm:$0xff] }
 0x2fb   : > { %2711 = vmatprep.subr.bf16.mxu1 %v2558_v29  ;;  %v2588_v29 = vpack.c.bf16 %v6363_v7, %v2538_v14  ;;  %v2243_v48 = vsel %vm1291_vm2, %v5465_v8, %v5428_v41  ;;  %v2244_v32 = vsel %vm1291_vm2, %v5543_v44, %v5465_v8  ;;  %v2419_v57 = vmul.f32 %v2405_v46, %v6449_v63  ;;  %v6453_v14 = vld [vmem:[#allocation36_spill] sm:$0xff]  ;;  %v6465_v63 = vld [vmem:[#allocation38_spill] sm:$0xff] }
 0x2fc   : > { %v2358_v35 = vpop.permute.xlu1 %2357  ;;  %v2587_v33 = vpack.c.bf16 %v6363_v7, %v2537_v11  ;;  %v2284_v36 = vsel %vm1372_vm3, %v5568_v42, %v5605_v23  ;;  %v2402_v55 = vpop.permute.xlu0 %2401  ;;  %v6454_v42 = vpack.c.bf16 %v6452_v17, %v6453_v14  ;;  %v6460_v11 = vld [vmem:[#allocation64_spill] sm:$0xff] }
 0x2fd   : > { %v2365_v51 = vsel %vm1534_vm5, %v5522_v3, %v2358_v35  ;;  %v6448_v3 = vld [vmem:[#allocation59_spill] sm:$0xff]  ;;  %v2613_v44 = vand.u32 %v2588_v29, %v4446_v50 }
 0x2fe   : > { %v2380_v25 = vmul.f32 %v2365_v51, %v6445_v47  ;;  %2712 = vmatpush1.bf16.msra.mxu1 %v2557_v53  ;;  %v2339_v34 = vmul.f32 %v2326_v60, %v6448_v3  ;;  %v2610_v23 = vand.u32 %v2587_v33, %v4446_v50  ;;  %v6455_v51 = vld [vmem:[#allocation40_spill] sm:$0xff] }
 0x2ff   : > { %2713 = vmatprep.subr.bf16.mxu1 %v2568_v26  ;;  %v6450_v26 = vld [vmem:[#allocation39_spill] sm:$0xff]  ;;  %v2262_v30 = vmul.f32 %v2243_v48, %v6455_v51  ;;  %v6458_v47 = vld [vmem:[#allocation32_spill] sm:$0xff] }
 0x300   : > { %v2360_v13 = vpop.permute.xlu1 %2359  ;;  %v2560_v56 = vpack.c.bf16 %v2380_v25, %v2340_v4  ;;  %v2559_v53 = vpack.c.bf16 %v2379_v45, %v2339_v34  ;;  %v2302_v39 = vmul.f32 %v2283_v40, %v6450_v26  ;;  %v6456_v45 = vld [vmem:[#allocation41_spill] sm:$0xff]  ;;  %v2569_v25 = vpack.c.bf16 %v2419_v57, %v6458_v47  ;;  %v2482_v46 = vpop.permute.xlu0 %2481 }
 0x301   : > { %v2363_v41 = vsel %vm1534_vm5, %v2360_v13, %v5482_v43  ;;  %v2323_v43 = vsel %vm1453_vm4, %v5545_v54, %v5432_v62  ;;  %v2301_v31 = vmul.f32 %v2284_v36, %v6456_v45  ;;  %v2412_v62 = vsel %vm1615_vm6, %v2402_v55, %v5240_v58  ;;  %v6462_v58 = vld [vmem:[#allocation46_spill] sm:$0xff]  ;;  %v6464_v40 = vld [vmem:[#allocation45_spill] sm:$0xff] }
 0x302   : > { %2714 = vmatpush1.bf16.msra.mxu1 %v2567_v49  ;;  %2752 = vmatprep.subr.bf16.mxu0 %v2560_v56  ;;  %v2382_v37 = vmul.f32 %v2363_v41, %v6459_v20  ;;  %v2324_v49 = vsel %vm1453_vm4, %v5622_v52, %v5545_v54  ;;  %v2364_v3 = vsel %vm1534_vm5, %v2358_v35, %v2360_v13  ;;  %v6461_v56 = vld [vmem:[#allocation44_spill] sm:$0xff]  ;;  %v6463_v35 = vld [vmem:[#allocation49_spill] sm:$0xff]  ;;  %v6470_v45 = vld [vmem:[#allocation62_spill] sm:$0xff] }
 0x303   : > { %2715 = vmatprep.subr.bf16.mxu1 %v2578_v19  ;;  %2753 = vmatpush1.bf16.msra.mxu0 %v2559_v53  ;;  %v2552_v34 = vpack.c.bf16 %v2302_v39, %v2262_v30  ;;  %v2342_v29 = vmul.f32 %v2323_v43, %v6461_v56  ;;  %v2341_v52 = vmul.f32 %v2324_v49, %v6462_v58  ;;  %v6466_v39 = vld [vmem:[#allocation60_spill] sm:$0xff] }
 0x304   : > { %v2400_v28 = vpop.permute.xlu1 %2399  ;;  %v2422_v13 = vmul.f32 %v2412_v62, %v6463_v35  ;;  %v2381_v33 = vmul.f32 %v2364_v3, %v6464_v40  ;;  %v2520_v14 = vpop.permute.xlu0 %2519  ;;  %v2483_v51 = vsel %vm1777_vm8, %v5671_v18, %v2482_v46  ;;  %v6475_v62 = vld [vmem:[#allocation50_spill] sm:$0xff] }
 0x305   : > { %v2404_v8 = vsel %vm1615_vm6, %v5587_v1, %v2400_v28  ;;  %v6457_v1 = vld [vmem:[#allocation42_spill] sm:$0xff] }
 0x306   : > { %v2420_v60 = vmul.f32 %v2404_v8, %v6451_v27  ;;  %2716 = vmatpush1.bf16.msra.mxu1 %v6454_v42  ;;  %v2261_v4 = vmul.f32 %v2244_v32, %v6457_v1  ;;  %v2562_v32 = vpack.c.bf16 %v2382_v37, %v2342_v29  ;;  %v6467_v8 = vld [vmem:[#allocation61_spill] sm:$0xff]  ;;  %v6468_v27 = vld [vmem:[#allocation23_spill] sm:$0xff]  ;;  %v2492_v1 = vsel %vm1777_vm8, %v2482_v46, %v5264_v38 }
 0x307   : > { %2717 = vmatprep.subr.bf16.mxu1 %v2613_v44  ;;  %v2502_v3 = vmul.f32 %v2492_v1, %v6475_v62  ;;  %v6476_v29 = vld [vmem:[#allocation53_spill] sm:$0xff] }
 0x308   : > { %v2438_v10 = vpop.permute.xlu1 %2437  ;;  %v2570_v15 = vpack.c.bf16 %v2420_v60, %v6460_v11  ;;  %v2551_v53 = vpack.c.bf16 %v2301_v31, %v2261_v4  ;;  %v2572_v31 = vpack.c.bf16 %v2422_v13, %v6470_v45  ;;  %v6471_v4 = vld [vmem:[#allocation4_spill] sm:$0xff]  ;;  %v3790_v13 = vld [vmem:[%s6325_s5 + $0x90] ss:$0 sm:$0xff] }
 0x309   : > { %v2445_v19 = vsel %vm1696_vm7, %v5390_v2, %v2438_v10  ;;  %v2444_v54 = vsel %vm1696_vm7, %v2438_v10, %v5620_v6  ;;  %v2403_v2 = vsel %vm1615_vm6, %v2400_v28, %v2402_v55  ;;  %v2561_v55 = vpack.c.bf16 %v2381_v33, %v2341_v52  ;;  %v6469_v28 = vld [vmem:[#allocation48_spill] sm:$0xff]  ;;  %v3791_v33 = vld [vmem:[%s6325_s5 + $0x98] ss:$0 sm:$0xff] }
 0x30a   : > { %2718 = vmatpush1.bf16.msra.mxu1 %v2610_v23  ;;  %2754 = vmatprep.subr.bf16.mxu0 %v2570_v15  ;;  %v2459_v57 = vmul.f32 %v2445_v19, %v6465_v63  ;;  %v2460_v41 = vmul.f32 %v2444_v54, %v6466_v39  ;;  %v2421_v17 = vmul.f32 %v2403_v2, %v6469_v28  ;;  %v6474_v15 = vld [vmem:[#allocation52_spill] sm:$0xff]  ;;  %v6477_v19 = vld [vmem:[#allocation51_spill] sm:$0xff] }
 0x30b   : > { %2755 = vmatpush1.bf16.msra.mxu0 %v2569_v25  ;;  %2791 = vmatprep.subr.bf16.mxu1 %v2552_v34  ;;  %v6472_v25 = vld [vmem:[#allocation30_spill] sm:$0xff]  ;;  %v2501_v49 = vmul.f32 %v2483_v51, %v6474_v15 }
 0x30c   : > { %v2478_v48 = vpop.permute.xlu1 %2477 }
 0x30d   : > { %v2484_v36 = vsel %vm1777_vm8, %v2478_v48, %v5671_v18  ;;  %v2485_v26 = vsel %vm1777_vm8, %v5400_v24, %v2478_v48  ;;  %3723 = vmatmul.mubr.msk.bf16.vlgmr.msra.gmra.mrb[12].mxu1 %vm1970_vm12, %v5437_v5  ;;  %v6473_v18 = vld [vmem:[#allocation63_spill] sm:$0xff] }
 0x30e   : > { %v2499_v44 = vmul.f32 %v2485_v26, %v6467_v8  ;;  %v2500_v60 = vmul.f32 %v2484_v36, %v6468_v27  ;;  %2792 = vmatpush1.bf16.msra.mxu1 %v2551_v53  ;;  %2823 = vmatprep.mubr.bf16.mxu1 %v6344_v61  ;;  %v2571_v37 = vpack.c.bf16 %v2421_v17, %v6473_v18 }
 0x30f   : > { %2793 = vmatprep.subr.bf16.mxu1 %v2562_v32 }
 0x310   : > { %v2579_v42 = vpack.c.bf16 %v2499_v44, %v2459_v57  ;;  %v2518_v23 = vpop.permute.xlu1 %2517  ;;  %v2580_v24 = vpack.c.bf16 %v2500_v60, %v2460_v41 }
 0x311   : > { %v2524_v30 = vsel %vm1858_vm10, %v2518_v23, %v2520_v14  ;;  %v2525_v43 = vsel %vm1858_vm10, %v5520_v16, %v2518_v23 }
 0x312   : > { %v2539_v47 = vmul.f32 %v6471_v4, %v2525_v43  ;;  %v2540_v20 = vmul.f32 %v6472_v25, %v2524_v30  ;;  %2756 = vmatprep.subr.bf16.mxu0 %v2580_v24  ;;  %2794 = vmatpush1.bf16.msra.mxu1 %v2561_v55 }
 0x313   : > { %2757 = vmatpush1.bf16.msra.mxu0 %v2579_v42  ;;  %2795 = vmatprep.subr.bf16.mxu1 %v2572_v31 }
 0x314   : > { %v2589_v10 = vpack.c.bf16 %v6363_v7, %v2539_v47  ;;  %v2590_v16 = vpack.c.bf16 %v6363_v7, %v2540_v20  ;;  %v2442_v11 = vpop.permute.xlu1 %2441 }
 0x315   : > { %v2443_v38 = vsel %vm1696_vm7, %v5620_v6, %v2442_v11  ;;  %v2452_v34 = vsel %vm1696_vm7, %v2442_v11, %v5254_v21 }
 0x316   : > { %v2616_v56 = vand.u32 %v2589_v10, %v4446_v50  ;;  %v2461_v46 = vmul.f32 %v2443_v38, %v6476_v29  ;;  %v2462_v53 = vmul.f32 %v2452_v34, %v6477_v19  ;;  %2796 = vmatpush1.bf16.msra.mxu1 %v2571_v37  ;;  %v2619_v54 = vand.u32 %v2590_v16, %v4446_v50 }
 0x318   : > { %v2581_v58 = vpack.c.bf16 %v2501_v49, %v2461_v46  ;;  %v2522_v52 = vpop.permute.xlu1 %2521  ;;  %2758 = vmatprep.subr.bf16.mxu0 %v2619_v54  ;;  %v2582_v35 = vpack.c.bf16 %v2502_v3, %v2462_v53 }
 0x319   : > { %v2523_v6 = vsel %vm1858_vm10, %v2520_v14, %v2522_v52  ;;  %v2532_v21 = vsel %vm1858_vm10, %v2522_v52, %v5262_v22  ;;  %2759 = vmatpush1.bf16.msra.mxu0 %v2616_v56 }
 0x31a   : > { %v2541_v40 = vmul.f32 %v3790_v13, %v2523_v6  ;;  %v2542_v48 = vmul.f32 %v3791_v33, %v2532_v21  ;;  %2797 = vmatprep.subr.bf16.mxu1 %v2582_v35 }
 0x31b   : > { %2798 = vmatpush1.bf16.msra.mxu1 %v2581_v58 }
 0x31c   : > { %v2591_v32 = vpack.c.bf16 %v6363_v7, %v2541_v40  ;;  %v2592_v2 = vpack.c.bf16 %v6363_v7, %v2542_v48  ;;  %3724 = vmatmul.mubr.msk.bf16.vlgmr.msra.gmra.mrb[16].mxu0 %vm1970_vm12, %v5437_v5 }
 0x31d   : > { %3130 = vmatprep.mubr.bf16.mxu0 %v6344_v61 }
 0x31e   : > { %v2622_v22 = vand.u32 %v2591_v32, %v4446_v50  ;;  %v2625_v63 = vand.u32 %v2592_v2, %v4446_v50 }
 0x320   : > { %2799 = vmatprep.subr.bf16.mxu1 %v2625_v63 }
 0x321   : > { %2800 = vmatpush1.bf16.msra.mxu1 %v2622_v22  ;;  %v6478_v22 = vld [vmem:[#allocation6_spill] sm:$0xff] }
 0x324   : > { %3725 = vmatmul.mubr.msk.bf16.vlgmr.msra.gmra.mrb[16].mxu1 %vm1970_vm12, %v5437_v5 }
 0x325   : > { %3257 = vmatprep.mubr.bf16.mxu1 %v6344_v61 }
 0x3ab   : > { %v2702_v57 = vpop.f32.mrb[12].mxu0 }
 0x3ac   : > { %v2704_v36 = vpop.f32.mrb[13].mxu0  ;;  %v2857_v8 = vrot.slane %v2702_v57, 5 }
 0x3ad   : > { %v2839_v26 = vcombine.low %v2702_v57, %v2704_v36  ;;  %v2706_v39 = vpop.f32.mrb[14].mxu0  ;;  %v2858_v44 = vrot.slane %v2704_v36, 5 }
 0x3ae   : > { %v2707_v41 = vpop.f32.mrb[15].mxu0 }
 0x3af   : > { %2841 = vst [vmem:[%s1090_s26] sm:$0x77] %v2839_v26  ;;  %s1095_s26 = scalar_lea.vmem %s6169_s23, %s3955_s6 }
 0x3cc   : > { %v2661_v27 = vpop.f32.mrb[8].mxu1 }
 0x3cd   : > { %v2869_v60 = vsel %vm1151_vm0, %v2661_v27, %v2857_v8  ;;  %v2663_v61 = vpop.f32.mrb[9].mxu1 }
 0x3ce   : > { %v2834_v5 = vcombine.low %v2661_v27, %v2663_v61  ;;  %v2870_v55 = vsel %vm1151_vm0, %v2663_v61, %v2858_v44  ;;  %v2665_v28 = vpop.f32.mrb[10].mxu1  ;;  %v6479_v61 = vld [vmem:[#allocation5_spill] sm:$0xff] }
 0x3cf   : > { %v2666_v17 = vpop.f32.mrb[11].mxu1 }
 0x3d0   : > { %2836 = vst [vmem:[%s1085_s3] sm:$0x77] %v2834_v5 }
 0x3e0   : > { %v2743_v14 = vpop.f32.mrb[12].mxu1 }
 0x3e1   : > { %v2745_v42 = vpop.f32.mrb[13].mxu1 }
 0x3e2   : > { %v2844_v23 = vcombine.low %v2743_v14, %v2745_v42  ;;  %v2747_v24 = vpop.f32.mrb[14].mxu1 }
 0x3e3   : > { %v2748_v51 = vpop.f32.mrb[15].mxu1 }
 0x3e4   : > { %2846 = vst [vmem:[%s1095_s26] sm:$0x77] %v2844_v23 }
 0x3ef   : > { %v2784_v30 = vpop.f32.mrb[16].mxu0 }
 0x3f0   : > { %v2861_v43 = vrot.slane %v2784_v30, 2  ;;  %v2786_v45 = vpop.f32.mrb[17].mxu0 }
 0x3f1   : > { %v2849_v31 = vcombine.low %v2784_v30, %v2786_v45  ;;  %v2862_v1 = vrot.slane %v2786_v45, 2  ;;  %v2788_v4 = vpop.f32.mrb[18].mxu0 }
 0x3f2   : > { %v5830_v47 = vsel %vm1154_vm1, %v2869_v60, %v2861_v43  ;;  %v2789_v25 = vpop.f32.mrb[19].mxu0 }
 0x3f3   : > { %2851 = vst [vmem:[%s1100_s10] sm:$0x77] %v2849_v31  ;;  %v5833_v20 = vsel %vm1154_vm1, %v2870_v55, %v2862_v1  ;;  %2892 = vrot.lane.b32.xlu0 %v5830_v47, %s6314_s8 }
 0x3f4   : > { %2896 = vrot.lane.b32.xlu1 %v5833_v20, %s6314_s8 }
 0x3f7   : > { %2876 = vrot.lane.b32.xlu0 %v5830_v47, %s6313_s13  ;;  %v2825_v18 = vpop.f32.mrb[16].mxu1 }
 0x3f8   : > { %v2865_v37 = vrot.slane %v2825_v18, 7  ;;  %2880 = vrot.lane.b32.xlu1 %v5833_v20, %s6313_s13  ;;  %v2827_v10 = vpop.f32.mrb[17].mxu1 }
 0x3f9   : > { %v2854_v16 = vcombine.low %v2825_v18, %v2827_v10  ;;  %v2866_v11 = vrot.slane %v2827_v10, 7  ;;  %v2829_v15 = vpop.f32.mrb[18].mxu1 }
 0x3fa   : > { %v5847_v49 = vsel %vm2873_vm13, %v2861_v43, %v2865_v37  ;;  %v2830_v62 = vpop.f32.mrb[19].mxu1  ;;  %v6481_v15 = vld [vmem:[#allocation13_spill] sm:$0xff] }
 0x3fb   : > { %2856 = vst [vmem:[%s1105_s29] sm:$0x77] %v2854_v16  ;;  %v5849_v3 = vsel %vm2873_vm13, %v2862_v1, %v2866_v11  ;;  %2908 = vrot.lane.b32.xlu0 %v5830_v47, %s6316_s4  ;;  %v6480_v16 = vld [vmem:[#allocation14_spill] sm:$0xff] }
 0x3fc   : > { %2912 = vrot.lane.b32.xlu1 %v5833_v20, %s6316_s4 }
 0x3ff   : > { %2924 = vrot.lane.b32.xlu0 %v5830_v47, %s6318_s27 }
 0x400   : > { %2944 = vrot.lane.b32.xlu1 %v5833_v20, %s6320_s30 }
 0x403   : > { %2940 = vrot.lane.b32.xlu0 %v5830_v47, %s6320_s30 }
 0x404   : > { %2960 = vrot.lane.b32.xlu1 %v5833_v20, %s6400_s2 }
 0x407   : > { %2956 = vrot.lane.b32.xlu0 %v5830_v47, %s6400_s2 }
 0x408   : > { %2926 = vrot.lane.b32.xlu1 %v5847_v49, %s6318_s27 }
 0x40b   : > { %2972 = vrot.lane.b32.xlu0 %v5830_v47, %s6321_s7 }
 0x40c   : > { %2974 = vrot.lane.b32.xlu1 %v5847_v49, %s6321_s7 }
 0x40f   : > { %2928 = vrot.lane.b32.xlu0 %v5833_v20, %s6318_s27 }
 0x410   : > { %2882 = vrot.lane.b32.xlu1 %v5849_v3, %s6313_s13 }
 0x413   : > { %2878 = vrot.lane.b32.xlu0 %v5847_v49, %s6313_s13 }
 0x414   : > { %2898 = vrot.lane.b32.xlu1 %v5849_v3, %s6314_s8 }
 0x417   : > { %2894 = vrot.lane.b32.xlu0 %v5847_v49, %s6314_s8 }
 0x418   : > { %2930 = vrot.lane.b32.xlu1 %v5849_v3, %s6318_s27 }
 0x41b   : > { %2976 = vrot.lane.b32.xlu0 %v5833_v20, %s6321_s7 }
 0x41c   : > { %2914 = vrot.lane.b32.xlu1 %v5849_v3, %s6316_s4 }
 0x41f   : > { %2910 = vrot.lane.b32.xlu0 %v5847_v49, %s6316_s4 }
 0x420   : > { %2946 = vrot.lane.b32.xlu1 %v5849_v3, %s6320_s30 }
 0x423   : > { %2942 = vrot.lane.b32.xlu0 %v5847_v49, %s6320_s30 }
 0x424   : > { %2978 = vrot.lane.b32.xlu1 %v5849_v3, %s6321_s7 }
 0x427   : > { %2958 = vrot.lane.b32.xlu0 %v5847_v49, %s6400_s2 }
 0x428   : > { %2962 = vrot.lane.b32.xlu1 %v5849_v3, %s6400_s2 }
 0x42b   : > { %2990 = vrot.lane.b32.xlu0 %v5847_v49, %s6322_s1 }
 0x42c   : > { %2994 = vrot.lane.b32.xlu1 %v5849_v3, %s6322_s1 }
 0x42f   : > { %2988 = vrot.lane.b32.xlu0 %v5830_v47, %s6322_s1 }
 0x430   : > { %2992 = vrot.lane.b32.xlu1 %v5833_v20, %s6322_s1 }
 0x465   : > { %v2893_v38 = vpop.permute.xlu0 %2892 }
 0x466   : > { %v2897_v34 = vpop.permute.xlu1 %2896 }
 0x467   : > { %v2900_v40 = vsel %vm1372_vm3, %v2893_v38, %v2897_v34  ;;  %v2902_v33 = vsel %vm1372_vm3, %v2897_v34, %v2893_v38 }
 0x468   : > { %v2904_v2 = vmul.f32 %v2902_v33, %v6417_v0  ;;  %v2905_v63 = vmul.f32 %v2900_v40, %v6478_v22  ;;  %v6484_v40 = vld [vmem:[#allocation11_spill] sm:$0xff] }
 0x469   : > { %v2877_v56 = vpop.permute.xlu0 %2876 }
 0x46a   : > { %v2881_v29 = vpop.permute.xlu1 %2880  ;;  %v3008_v44 = vrot.slane %v2904_v2, 4  ;;  %v3009_v27 = vrot.slane %v2905_v63, 4 }
 0x46b   : > { %v2884_v57 = vsel %vm1291_vm2, %v2877_v56, %v2881_v29  ;;  %v2886_v36 = vsel %vm1291_vm2, %v2881_v29, %v2877_v56 }
 0x46c   : > { %v2888_v55 = vmul.f32 %v2886_v36, %v6416_v59  ;;  %v2889_v28 = vmul.f32 %v2884_v57, %v6479_v61 }
 0x46d   : > { %v2909_v46 = vpop.permute.xlu0 %2908 }
 0x46e   : > { %v2913_v19 = vpop.permute.xlu1 %2912 }
 0x46f   : > { %v2916_v17 = vsel %vm1453_vm4, %v2909_v46, %v2913_v19  ;;  %v2918_v14 = vsel %vm1453_vm4, %v2913_v19, %v2909_v46  ;;  %v6482_v46 = vld [vmem:[#allocation12_spill] sm:$0xff] }
 0x470   : > { %v2920_v33 = vmul.f32 %v2918_v14, %v6484_v40 }
 0x471   : > { %v2925_v53 = vpop.permute.xlu0 %2924 }
 0x472   : > { %v2945_v54 = vpop.permute.xlu1 %2944 }
 0x475   : > { %v2941_v58 = vpop.permute.xlu0 %2940 }
 0x476   : > { %v5907_v52 = vpop.permute.xlu1 %2960  ;;  %v2948_v42 = vsel %vm1615_vm6, %v2941_v58, %v2945_v54  ;;  %v2950_v23 = vsel %vm1615_vm6, %v2945_v54, %v2941_v58  ;;  %v6483_v54 = vld [vmem:[#allocation10_spill] sm:$0xff] }
 0x477   : > { %v5954_v11 = vmul.f32 %v2948_v42, %v6480_v16  ;;  %v5957_v62 = vmul.f32 %v2950_v23, %v6481_v15 }
 0x479   : > { %v5909_v35 = vpop.permute.xlu0 %2956 }
 0x47a   : > { %v2927_v6 = vpop.permute.xlu1 %2926 }
 0x47d   : > { %v5911_v21 = vpop.permute.xlu0 %2972 }
 0x47e   : > { %v5913_v13 = vpop.permute.xlu1 %2974 }
 0x481   : > { %v2929_v48 = vpop.permute.xlu0 %2928 }
 0x482   : > { %v2883_v32 = vpop.permute.xlu1 %2882  ;;  %v2932_v38 = vsel %vm1534_vm5, %v2925_v53, %v2929_v48  ;;  %v2934_v34 = vsel %vm1534_vm5, %v2929_v48, %v2925_v53 }
 0x483   : > { %v2936_v57 = vmul.f32 %v2934_v34, %v6482_v46  ;;  %v2937_v36 = vmul.f32 %v2932_v38, %v6483_v54 }
 0x485   : > { %v2879_v26 = vpop.permute.xlu0 %2878  ;;  %v3022_v42 = vrot.slane %v2936_v57, 4  ;;  %v3023_v23 = vrot.slane %v2937_v36, 4 }
 0x486   : > { %v2885_v39 = vsel %vm1291_vm2, %v2879_v26, %v2883_v32  ;;  %v2887_v41 = vsel %vm1291_vm2, %v2883_v32, %v2879_v26  ;;  %v2899_v8 = vpop.permute.xlu1 %2898  ;;  %v6485_v32 = vld [vmem:[#allocation9_spill] sm:$0xff]  ;;  %v3036_v26 = vrot.slane %v5954_v11, 4 }
 0x487   : > { %v2890_v60 = vmul.f32 %v2887_v41, %v6416_v59  ;;  %v2891_v5 = vmul.f32 %v2885_v39, %v6479_v61  ;;  %v2921_v2 = vmul.f32 %v2916_v17, %v6485_v32  ;;  %v3037_v39 = vrot.slane %v5957_v62, 4 }
 0x489   : > { %v3060_v24 = vsel %vm1974_vm9, %v2890_v60, %v3008_v44  ;;  %v2895_v51 = vpop.permute.xlu0 %2894  ;;  %v3061_v30 = vsel %vm1974_vm9, %v2891_v5, %v3009_v27 }
 0x48a   : > { %v2901_v43 = vsel %vm1372_vm3, %v2895_v51, %v2899_v8  ;;  %v2903_v45 = vsel %vm1372_vm3, %v2899_v8, %v2895_v51  ;;  %v2931_v31 = vpop.permute.xlu1 %2930  ;;  %v3071_v1 = vpack.c.bf16 %v3061_v30, %v2889_v28  ;;  %v3070_v4 = vpack.c.bf16 %v3060_v24, %v2888_v55 }
 0x48b   : > { %v2906_v25 = vmul.f32 %v2903_v45, %v6417_v0  ;;  %v2907_v18 = vmul.f32 %v2901_v43, %v6478_v22  ;;  %v2933_v37 = vsel %vm1534_vm5, %v2927_v6, %v2931_v31  ;;  %v2935_v10 = vsel %vm1534_vm5, %v2931_v31, %v2927_v6  ;;  %v6486_v45 = vld [vmem:[#allocation16_spill] sm:$0xff] }
 0x48c   : > { %3098 = vmatprep.subr.bf16.mxu0 %v3071_v1  ;;  %v2938_v19 = vmul.f32 %v2935_v10, %v6482_v46  ;;  %v2939_v58 = vmul.f32 %v2933_v37, %v6483_v54  ;;  %v3064_v30 = vsel %vm1974_vm9, %v5847_v49, %v3036_v26  ;;  %v3065_v1 = vsel %vm1974_vm9, %v5849_v3, %v3037_v39 }
 0x48d   : > { %v3010_v56 = vrot.slane %v2906_v25, 4  ;;  %v3012_v29 = vrot.slane %v2907_v18, 4  ;;  %v2977_v6 = vpop.permute.xlu0 %2976  ;;  %3099 = vmatpush1.bf16.msra.mxu0 %v3070_v4 }
 0x48e   : > { %v2915_v63 = vpop.permute.xlu1 %2914  ;;  %v3024_v60 = vrot.slane %v2938_v19, 4  ;;  %v3026_v5 = vrot.slane %v2939_v58, 4  ;;  %v2982_v55 = vsel %vm1777_vm8, %v2977_v6, %v5911_v21  ;;  %v2980_v43 = vsel %vm1777_vm8, %v5911_v21, %v2977_v6 }
 0x48f   : > { %v3011_v53 = vsel %vm1974_vm9, %v3008_v44, %v3010_v56  ;;  %v3013_v48 = vsel %vm1974_vm9, %v3009_v27, %v3012_v29  ;;  %v2966_v44 = vsel %vm1696_vm7, %v5907_v52, %v5909_v35  ;;  %v2985_v31 = vmul.f32 %v2982_v55, %v6486_v45  ;;  %v6488_v55 = vld [vmem:[#allocation17_spill] sm:$0xff] }
 0x490   : > { %v3073_v41 = vpack.c.bf16 %v2921_v2, %v3013_v48  ;;  %v3072_v8 = vpack.c.bf16 %v2920_v33, %v3011_v53  ;;  %v3025_v4 = vsel %vm1974_vm9, %v3022_v42, %v3024_v60  ;;  %v3027_v37 = vsel %vm1974_vm9, %v3023_v23, %v3026_v5  ;;  %v6487_v33 = vld [vmem:[#allocation15_spill] sm:$0xff] }
 0x491   : > { %v2911_v28 = vpop.permute.xlu0 %2910  ;;  %v3077_v58 = vpack.c.bf16 %v3065_v1, %v5833_v20  ;;  %v2964_v6 = vsel %vm1696_vm7, %v5909_v35, %v5907_v52  ;;  %v2969_v2 = vmul.f32 %v2966_v44, %v6487_v33  ;;  %v2984_v53 = vmul.f32 %v2980_v43, %v6426_v9  ;;  %v6489_v1 = vld [vmem:[#allocation8_spill] sm:$0xff] }
 0x492   : > { %v2917_v27 = vsel %vm1453_vm4, %v2911_v28, %v2915_v63  ;;  %v2919_v17 = vsel %vm1453_vm4, %v2915_v63, %v2911_v28  ;;  %3100 = vmatprep.subr.bf16.mxu0 %v3073_v41  ;;  %v2947_v14 = vpop.permute.xlu1 %2946  ;;  %v3076_v20 = vpack.c.bf16 %v3064_v30, %v5830_v47 }
 0x493   : > { %v2922_v24 = vmul.f32 %v2919_v17, %v6484_v40  ;;  %v2923_v51 = vmul.f32 %v2917_v27, %v6485_v32  ;;  %3101 = vmatpush1.bf16.msra.mxu0 %v3072_v8  ;;  %v3051_v8 = vrot.slane %v2985_v31, 4  ;;  %v2968_v17 = vmul.f32 %v2964_v6, %v6488_v55 }
 0x494   : > { %v3050_v47 = vrot.slane %v2984_v53, 4 }
 0x495   : > { %v3062_v25 = vsel %vm1974_vm9, %v2922_v24, %v3022_v42  ;;  %v2943_v18 = vpop.permute.xlu0 %2942  ;;  %v3063_v10 = vsel %vm1974_vm9, %v2923_v51, %v3023_v23 }
 0x496   : > { %v2949_v49 = vsel %vm1615_vm6, %v2943_v18, %v2947_v14  ;;  %v2951_v21 = vsel %vm1615_vm6, %v2947_v14, %v2943_v18  ;;  %v2979_v11 = vpop.permute.xlu1 %2978  ;;  %v3075_v62 = vpack.c.bf16 %v3027_v37, %v3063_v10  ;;  %v3074_v38 = vpack.c.bf16 %v3025_v4, %v3062_v25  ;;  %v6490_v25 = vld [vmem:[#allocation7_spill] sm:$0xff] }
 0x497   : > { %v2954_v3 = vmul.f32 %v2949_v49, %v6480_v16  ;;  %v2955_v34 = vmul.f32 %v2951_v21, %v6481_v15  ;;  %v2981_v56 = vsel %vm1777_vm8, %v5913_v13, %v2979_v11  ;;  %v2983_v29 = vsel %vm1777_vm8, %v2979_v11, %v5913_v13 }
 0x498   : > { %v2987_v19 = vmul.f32 %v2983_v29, %v6486_v45  ;;  %3102 = vmatprep.subr.bf16.mxu0 %v3075_v62  ;;  %v2986_v13 = vmul.f32 %v2981_v56, %v6426_v9  ;;  %v6491_v21 = vmov 65535  }
 0x499   : > { %v3038_v63 = vrot.slane %v2954_v3, 4  ;;  %v3040_v57 = vrot.slane %v2955_v34, 4  ;;  %v2959_v36 = vpop.permute.xlu0 %2958  ;;  %3103 = vmatpush1.bf16.msra.mxu0 %v3074_v38  ;;  %v3090_v11 = vsel %vm1154_vm1, 4294967295, %v6491_v21 }
 0x49a   : > { %v3054_v48 = vrot.slane %v2987_v19, 4  ;;  %v2963_v41 = vpop.permute.xlu1 %2962  ;;  %3104 = vmatprep.subr.bf16.mxu0 %v3077_v58  ;;  %v3052_v42 = vrot.slane %v2986_v13, 4  ;;  %v3091_v58 = vsel %vm3089_vm14, %v3090_v11, 0 }
 0x49b   : > { %v2965_v60 = vsel %vm1696_vm7, %v2959_v36, %v2963_v41  ;;  %v2967_v52 = vsel %vm1696_vm7, %v2963_v41, %v2959_v36  ;;  %v3041_v35 = vsel %vm1974_vm9, %v3037_v39, %v3040_v57  ;;  %v3039_v5 = vsel %vm1974_vm9, %v3036_v26, %v3038_v63  ;;  %v3084_v36 = vld [vmem:[%s6164_s18] sm:$0xf] }
 0x49c   : > { %v2970_v28 = vmul.f32 %v2965_v60, %v6488_v55  ;;  %v2971_v44 = vmul.f32 %v2967_v52, %v6487_v33  ;;  %v3079_v27 = vpack.c.bf16 %v2969_v2, %v3041_v35  ;;  %v3055_v24 = vsel %vm1974_vm9, %v3051_v8, %v3054_v48 }
 0x49d   : > { %v2991_v14 = vpop.permute.xlu0 %2990  ;;  %3105 = vmatpush1.bf16.msra.mxu0 %v3076_v20  ;;  %v3078_v30 = vpack.c.bf16 %v2968_v17, %v3039_v5  ;;  %v3053_v10 = vsel %vm1974_vm9, %v3050_v47, %v3052_v42 }
 0x49e   : > { %v2995_v23 = vpop.permute.xlu1 %2994  ;;  %3106 = vmatprep.subr.bf16.mxu0 %v3079_v27  ;;  %v3067_v51 = vsel %vm1974_vm9, %v2971_v44, %v3051_v8  ;;  %v3066_v31 = vsel %vm1974_vm9, %v2970_v28, %v3050_v47 }
 0x49f   : > { %v2997_v26 = vsel %vm1858_vm10, %v2991_v14, %v2995_v23  ;;  %v2999_v39 = vsel %vm1858_vm10, %v2995_v23, %v2991_v14  ;;  %v3081_v43 = vpack.c.bf16 %v3055_v24, %v3067_v51  ;;  %v3080_v3 = vpack.c.bf16 %v3053_v10, %v3066_v31 }
 0x4a0   : > { %v3002_v4 = vmul.f32 %v6489_v1, %v2997_v26  ;;  %v3003_v18 = vmul.f32 %v6490_v25, %v2999_v39 }
 0x4a1   : > { %v2989_v37 = vpop.permute.xlu0 %2988  ;;  %3107 = vmatpush1.bf16.msra.mxu0 %v3078_v30 }
 0x4a2   : > { %v2993_v49 = vpop.permute.xlu1 %2992  ;;  %3108 = vmatprep.subr.bf16.mxu0 %v3081_v43  ;;  %v3068_v29 = vsel %vm1974_vm9, %v3002_v4, 1.0  ;;  %v3069_v19 = vsel %vm1974_vm9, %v3003_v18, 1.0 }
 0x4a3   : > { %v2996_v62 = vsel %vm1858_vm10, %v2989_v37, %v2993_v49  ;;  %v2998_v38 = vsel %vm1858_vm10, %v2993_v49, %v2989_v37 }
 0x4a4   : > { %v3000_v34 = vmul.f32 %v6489_v1, %v2996_v62  ;;  %v3001_v56 = vmul.f32 %v6490_v25, %v2998_v38 }
 0x4a5   : > { %3109 = vmatpush1.bf16.msra.mxu0 %v3080_v3 }
 0x4a6   : > { %v3082_v6 = vpack.c.bf16 %v3068_v29, %v3000_v34  ;;  %v3083_v2 = vpack.c.bf16 %v3069_v19, %v3001_v56 }
 0x4a8   : > { %v3093_v63 = vand.u32 %v3091_v58, %v3082_v6  ;;  %v3096_v57 = vand.u32 %v3091_v58, %v3083_v2 }
 0x4aa   : > { %3110 = vmatprep.subr.bf16.mxu0 %v3096_v57 }
 0x4ab   : > { %3111 = vmatpush1.bf16.msra.mxu0 %v3093_v63 }
 0x4ae   : > { %3726 = vmatmul.mubr.msk.bf16.vlgmr.msra.gmra.mrb[20].mxu0 %vm3085_vm15, %v3084_v36 }
 0x581   : > { %v3132_v53 = vpop.f32.mrb[20].mxu0 }
 0x582   : > { %v6052_v13 = vmax.f32 %v3132_v53, 0.0  ;;  %v3134_v48 = vpop.f32.mrb[21].mxu0 }
 0x583   : > { %v3140_v41 = vmax.f32 %v3134_v48, 0.0  ;;  %v3136_v20 = vpop.f32.mrb[22].mxu0 }
 0x584   : > { %3141 = vrot.lane.b32.xlu0 %v6052_v13, %s6313_s13  ;;  %v3137_v8 = vpop.f32.mrb[23].mxu0 }
 0x585   : > { %3143 = vrot.lane.b32.xlu1 %v3140_v41, %s6313_s13 }
 0x588   : > { %3149 = vrot.lane.b32.xlu0 %v6052_v13, %s6314_s8 }
 0x589   : > { %3151 = vrot.lane.b32.xlu1 %v3140_v41, %s6314_s8 }
 0x58c   : > { %3157 = vrot.lane.b32.xlu0 %v6052_v13, %s6316_s4 }
 0x58d   : > { %3159 = vrot.lane.b32.xlu1 %v3140_v41, %s6316_s4 }
 0x590   : > { %3165 = vrot.lane.b32.xlu0 %v6052_v13, %s6318_s27 }
 0x591   : > { %3167 = vrot.lane.b32.xlu1 %v3140_v41, %s6318_s27 }
 0x594   : > { %3173 = vrot.lane.b32.xlu0 %v6052_v13, %s6320_s30 }
 0x595   : > { %3175 = vrot.lane.b32.xlu1 %v3140_v41, %s6320_s30 }
 0x598   : > { %3181 = vrot.lane.b32.xlu0 %v6052_v13, %s6400_s2 }
 0x599   : > { %3183 = vrot.lane.b32.xlu1 %v3140_v41, %s6400_s2 }
 0x59c   : > { %3189 = vrot.lane.b32.xlu0 %v6052_v13, %s6321_s7 }
 0x59d   : > { %3191 = vrot.lane.b32.xlu1 %v3140_v41, %s6321_s7 }
 0x5a0   : > { %3197 = vrot.lane.b32.xlu0 %v6052_v13, %s6322_s1 }
 0x5a1   : > { %3199 = vrot.lane.b32.xlu1 %v3140_v41, %s6322_s1 }
 0x5f6   : > { %v3142_v60 = vpop.permute.xlu0 %3141 }
 0x5f7   : > { %v3144_v52 = vpop.permute.xlu1 %3143 }
 0x5f8   : > { %v3145_v35 = vsel %vm1291_vm2, %v3142_v60, %v3144_v52  ;;  %v3146_v5 = vsel %vm1291_vm2, %v3144_v52, %v3142_v60  ;;  %v3215_v60 = vld [vmem:[%s6165_s19] sm:$0x3] }
 0x5f9   : > { %v3147_v14 = vmul.f32 %v3146_v5, %v6416_v59  ;;  %v3148_v47 = vmul.f32 %v3145_v35, %v6479_v61 }
 0x5fa   : > { %v3150_v28 = vpop.permute.xlu0 %3149 }
 0x5fb   : > { %v3152_v44 = vpop.permute.xlu1 %3151 }
 0x5fc   : > { %v3153_v27 = vsel %vm1372_vm3, %v3150_v28, %v3152_v44  ;;  %v3154_v17 = vsel %vm1372_vm3, %v3152_v44, %v3150_v28 }
 0x5fd   : > { %v3155_v42 = vmul.f32 %v3154_v17, %v6417_v0  ;;  %v3156_v23 = vmul.f32 %v3153_v27, %v6478_v22 }
 0x5fe   : > { %v3158_v24 = vpop.permute.xlu0 %3157 }
 0x5ff   : > { %v3205_v51 = vpack.c.bf16 %v3155_v42, %v3147_v14  ;;  %v3160_v26 = vpop.permute.xlu1 %3159  ;;  %v3206_v39 = vpack.c.bf16 %v3156_v23, %v3148_v47 }
 0x600   : > { %v3161_v30 = vsel %vm1453_vm4, %v3158_v24, %v3160_v26  ;;  %v3162_v43 = vsel %vm1453_vm4, %v3160_v26, %v3158_v24 }
 0x601   : > { %3225 = vmatprep.subr.bf16.mxu1 %v3206_v39  ;;  %v3163_v22 = vmul.f32 %v3162_v43, %v6484_v40  ;;  %v3164_v1 = vmul.f32 %v3161_v30, %v6485_v32 }
 0x602   : > { %v3166_v31 = vpop.permute.xlu0 %3165  ;;  %3226 = vmatpush1.bf16.msra.mxu1 %v3205_v51 }
 0x603   : > { %v3168_v59 = vpop.permute.xlu1 %3167 }
 0x604   : > { %v3169_v61 = vsel %vm1534_vm5, %v3166_v31, %v3168_v59  ;;  %v3170_v0 = vsel %vm1534_vm5, %v3168_v59, %v3166_v31 }
 0x605   : > { %v3171_v4 = vmul.f32 %v3170_v0, %v6482_v46  ;;  %v3172_v25 = vmul.f32 %v3169_v61, %v6483_v54 }
 0x606   : > { %v3174_v18 = vpop.permute.xlu0 %3173 }
 0x607   : > { %v3207_v37 = vpack.c.bf16 %v3171_v4, %v3163_v22  ;;  %v3176_v10 = vpop.permute.xlu1 %3175  ;;  %v3208_v49 = vpack.c.bf16 %v3172_v25, %v3164_v1 }
 0x608   : > { %v3177_v21 = vsel %vm1615_vm6, %v3174_v18, %v3176_v10  ;;  %v3178_v11 = vsel %vm1615_vm6, %v3176_v10, %v3174_v18 }
 0x609   : > { %v3179_v62 = vmul.f32 %v3177_v21, %v6480_v16  ;;  %v3180_v40 = vmul.f32 %v3178_v11, %v6481_v15  ;;  %3227 = vmatprep.subr.bf16.mxu1 %v3208_v49 }
 0x60a   : > { %v3182_v32 = vpop.permute.xlu0 %3181  ;;  %3228 = vmatpush1.bf16.msra.mxu1 %v3207_v37 }
 0x60b   : > { %v3209_v46 = vpack.c.bf16 %v3179_v62, %v6052_v13  ;;  %v3184_v54 = vpop.permute.xlu1 %3183  ;;  %v3210_v38 = vpack.c.bf16 %v3180_v40, %v3140_v41 }
 0x60c   : > { %v3185_v3 = vsel %vm1696_vm7, %v3182_v32, %v3184_v54  ;;  %v3186_v34 = vsel %vm1696_vm7, %v3184_v54, %v3182_v32 }
 0x60d   : > { %3229 = vmatprep.subr.bf16.mxu1 %v3210_v38  ;;  %v3187_v19 = vmul.f32 %v3185_v3, %v6488_v55  ;;  %v3188_v58 = vmul.f32 %v3186_v34, %v6487_v33  ;;  %v3792_v55 = vld [vmem:[%s6325_s5 + $0x50] ss:$0 sm:$0xff] }
 0x60e   : > { %v3190_v56 = vpop.permute.xlu0 %3189  ;;  %3230 = vmatpush1.bf16.msra.mxu1 %v3209_v46 }
 0x60f   : > { %v3192_v29 = vpop.permute.xlu1 %3191 }
 0x610   : > { %v3193_v16 = vsel %vm1777_vm8, %v3190_v56, %v3192_v29  ;;  %v3194_v15 = vsel %vm1777_vm8, %v3192_v29, %v3190_v56 }
 0x611   : > { %v3195_v6 = vmul.f32 %v3193_v16, %v6426_v9  ;;  %v3196_v2 = vmul.f32 %v3194_v15, %v6486_v45  ;;  %v3793_v9 = vld [vmem:[%s6325_s5 + $0x58] ss:$0 sm:$0xff] }
 0x612   : > { %v3198_v63 = vpop.permute.xlu0 %3197 }
 0x613   : > { %v3211_v57 = vpack.c.bf16 %v3195_v6, %v3187_v19  ;;  %v3200_v36 = vpop.permute.xlu1 %3199  ;;  %v3212_v53 = vpack.c.bf16 %v3196_v2, %v3188_v58 }
 0x614   : > { %v3201_v13 = vsel %vm1858_vm10, %v3198_v63, %v3200_v36  ;;  %v3202_v48 = vsel %vm1858_vm10, %v3200_v36, %v3198_v63 }
 0x615   : > { %v3203_v33 = vmul.f32 %v3792_v55, %v3201_v13  ;;  %v3204_v45 = vmul.f32 %v3793_v9, %v3202_v48  ;;  %3231 = vmatprep.subr.bf16.mxu1 %v3212_v53 }
 0x616   : > { %3232 = vmatpush1.bf16.msra.mxu1 %v3211_v57 }
 0x617   : > { %v3213_v41 = vpack.c.bf16 %v6363_v7, %v3203_v33  ;;  %v3214_v20 = vpack.c.bf16 %v6363_v7, %v3204_v45 }
 0x619   : > { %v3220_v12 = vand.u32 %v3213_v41, %v4446_v50  ;;  %v3223_v8 = vand.u32 %v3214_v20, %v4446_v50 }
 0x61b   : > { %3233 = vmatprep.subr.bf16.mxu1 %v3223_v8 }
 0x61c   : > { %3234 = vmatpush1.bf16.msra.mxu1 %v3220_v12 }
 0x61f   : > { %3727 = vmatmul.mubr.msk.bf16.vlgmr.msra.gmra.mrb[20].mxu1 %vm1970_vm12, %v3215_v60 }
 0x6f2   : > { %v3259_v52 = vpop.f32.mrb[20].mxu1 }
 0x6f3   : > { %v3261_v35 = vpop.f32.mrb[21].mxu1 }
 0x6f4   : > { %v3268_v5 = vcombine.low %v3259_v52, %v3261_v35  ;;  %v3263_v7 = vpop.f32.mrb[22].mxu1 }
 0x6f5   : > { %v3264_v28 = vpop.f32.mrb[23].mxu1 }
 0x6f6   : > { %3270 = vst [vmem:[%s1080_s28] sm:$0x77] %v3268_v5 }
 0x6f7 PF: > { %s6492_s0 = sld [smem:[#allocation2_spill]] }
 0x6fd   : > { %s36_s29 = sadd.s32 1, %s6492_s0  }
 0x6fe   : > { %p33_p4 = scmp.ge.s32.totalorder %s36_s29, 4  }
 0x700   :  { %35 = sbr.rel (!%p33_p4) target bundleno = 13 (0xd), region = 232 }

</bundles_post_ra>
